<compile_context>
chip_gen: v7x
topology: tpu7x:2x2x1
jax: 0.10.0
libtpu: 0.0.40
codegen_flags: <defaults>
</compile_context>

<pallas_src>
import functools

import jax
import jax.numpy as jnp
from jax.experimental import pallas as pl
from jax.experimental.pallas import tpu as pltpu


LAYER_KEYS = ("g1", "b1", "wqkv", "bqkv", "wo", "bo",
              "g2", "b2", "w1", "bm1", "w2", "bm2")


# ---------------------------------------------------------------------------
# BlockSpec helpers
# ---------------------------------------------------------------------------

def _full_spec(shape):
    # Whole-array block, same block index every grid step (stays VMEM-resident).
    nd = len(shape)
    return pl.BlockSpec(shape, lambda b, _n=nd: (0,) * _n)


# ---------------------------------------------------------------------------
# In-kernel building blocks (operate on values / param refs)
# ---------------------------------------------------------------------------

def _layernorm(x, g, b):
    mu = jnp.mean(x, axis=-1, keepdims=True)
    var = jnp.mean(jnp.square(x - mu), axis=-1, keepdims=True)
    return (x - mu) * jax.lax.rsqrt(var + 1e-5) * g + b


def _mha(xn, wqkv_ref, bqkv_ref, wo_ref, bo_ref, num_heads):
    n, d = xn.shape
    hd = d // num_heads
    qkv = jnp.dot(xn.astype(jnp.bfloat16), wqkv_ref[...],
                  preferred_element_type=jnp.float32) + bqkv_ref[...]
    # Fold 1/sqrt(hd) into q (N x D) instead of scaling per-head N x N scores.
    q = qkv[:, 0:d] * (1.0 / (hd ** 0.5))
    k = qkv[:, d:2 * d]
    v = qkv[:, 2 * d:3 * d]

    def split_heads(t):  # (n, d) -> (H, n, hd)
        return jnp.stack([t[:, h * hd:(h + 1) * hd] for h in range(num_heads)],
                         axis=0)

    qh = split_heads(q).astype(jnp.bfloat16)
    kh = split_heads(k).astype(jnp.bfloat16)
    vh = split_heads(v).astype(jnp.bfloat16)

    # One batched contraction for all heads (scores); softmax kept in f32.
    s = jnp.einsum('hqc,hkc->hqk', qh, kh, preferred_element_type=jnp.float32)
    s = s - jnp.max(s, axis=-1, keepdims=True)
    p = jnp.exp(s)
    p = p * pl.reciprocal(jnp.sum(p, axis=-1, keepdims=True), approx=True)
    ctx = jnp.einsum('hqk,hkc->hqc', p.astype(jnp.bfloat16), vh,
                     preferred_element_type=jnp.float32)          # (H, n, hd)
    ctx = jnp.concatenate([ctx[h] for h in range(num_heads)], axis=-1)  # (n, d)
    return jnp.dot(ctx.astype(jnp.bfloat16), wo_ref[...],
                   preferred_element_type=jnp.float32) + bo_ref[...]


def _block(x, g1, b1, wqkv, bqkv, wo, bo, g2, b2, w1, bm1, w2, bm2, num_heads):
    """Pre-LN transformer block: x + MHA(LN(x)); then x + MLP(LN(x))."""
    xn = _layernorm(x, g1[...], b1[...])
    x = x + _mha(xn, wqkv, bqkv, wo, bo, num_heads)
    xn2 = _layernorm(x, g2[...], b2[...])
    h1 = jnp.dot(xn2.astype(jnp.bfloat16), w1[...],
                 preferred_element_type=jnp.float32) + bm1[...]
    h1 = jax.nn.gelu(h1, approximate=True)        # tanh-GELU (EUP-friendly)
    mlp = jnp.dot(h1.astype(jnp.bfloat16), w2[...],
                  preferred_element_type=jnp.float32) + bm2[...]
    return x + mlp


# ---------------------------------------------------------------------------
# Fused kernels
# ---------------------------------------------------------------------------

def _encoder_kernel(*refs, depth, num_heads):
    # refs: [unmasked_patches, unmasked_pos, pe_w, pe_b,
    #        12*depth layer params, final_ln_g, final_ln_b, e2d_w, e2d_b, out]
    xp_ref, pos_ref, pe_w_ref, pe_b_ref = refs[0:4]
    layer_refs = refs[4:4 + 12 * depth]
    gf_ref, bf_ref, e2dw_ref, e2db_ref = refs[4 + 12 * depth:4 + 12 * depth + 4]
    o_ref = refs[-1]

    # Patch embedding of the (already gathered) unmasked patches + pos embed.
    x = jnp.dot(xp_ref[0].astype(jnp.bfloat16), pe_w_ref[...],
                preferred_element_type=jnp.float32) + pe_b_ref[...] + pos_ref[0]

    # TODO(synk): reference `Transformer` class not shown; assumed pre-LN blocks
    # plus a final LayerNorm (vit-pytorch convention), dropout=0 (eval mode).
    for li in range(depth):
        x = _block(x, *layer_refs[12 * li:12 * (li + 1)], num_heads)

    x = _layernorm(x, gf_ref[...], bf_ref[...])
    # enc -> dec projection fused in (output already in decoder dim).
    o_ref[0] = jnp.dot(x.astype(jnp.bfloat16), e2dw_ref[...],
                       preferred_element_type=jnp.float32) + e2db_ref[...]


def _decoder_kernel(*refs, depth, num_heads, num_masked):
    # refs: [decoder_tokens, 12*depth layer params,
    #        final_ln_g, final_ln_b, pix_w, pix_b, out]
    x_ref = refs[0]
    layer_refs = refs[1:1 + 12 * depth]
    gf_ref, bf_ref, pw_ref, pb_ref = refs[1 + 12 * depth:1 + 12 * depth + 4]
    o_ref = refs[-1]

    x = x_ref[0]
    for li in range(depth):
        x = _block(x, *layer_refs[12 * li:12 * (li + 1)], num_heads)

    x = _layernorm(x, gf_ref[...], bf_ref[...])
    xm = x[:num_masked, :]                       # pixel head only on masked rows
    y = jnp.dot(xm.astype(jnp.bfloat16), pw_ref[...],
                preferred_element_type=jnp.float32) + pb_ref[...]
    o_ref[0] = jax.nn.sigmoid(y)                 # sigmoid fused


# ---------------------------------------------------------------------------
# pallas_call wrappers
# ---------------------------------------------------------------------------

def encoder_forward(unmasked_patches, unmasked_pos, params, num_heads):
    B, Nu, P = unmasked_patches.shape
    De = params["pe_w"].shape[1]
    Dd = params["e2d_w"].shape[1]
    depth = len(params["enc_layers"])

    inputs = [unmasked_patches, unmasked_pos, params["pe_w"], params["pe_b"]]
    in_specs = [pl.BlockSpec((1, Nu, P), lambda b: (b, 0, 0)),
                pl.BlockSpec((1, Nu, De), lambda b: (b, 0, 0)),
                _full_spec(params["pe_w"].shape),
                _full_spec(params["pe_b"].shape)]
    for layer in params["enc_layers"]:
        for name in LAYER_KEYS:
            inputs.append(layer[name])
            in_specs.append(_full_spec(layer[name].shape))
    for arr in (params["enc_final_ln"]["g"], params["enc_final_ln"]["b"],
                params["e2d_w"], params["e2d_b"]):
        inputs.append(arr)
        in_specs.append(_full_spec(arr.shape))

    kernel = functools.partial(_encoder_kernel, depth=depth, num_heads=num_heads)
    return pl.pallas_call(
        kernel,
        out_shape=jax.ShapeDtypeStruct((B, Nu, Dd), jnp.float32),
        grid=(B,),
        in_specs=in_specs,
        out_specs=pl.BlockSpec((1, Nu, Dd), lambda b: (b, 0, 0)),
        compiler_params=pltpu.CompilerParams(dimension_semantics=("parallel",)),
    )(*inputs)


def decoder_forward(decoder_tokens, params, num_heads, num_masked):
    B, N, Dd = decoder_tokens.shape
    P = params["pix_w"].shape[1]
    depth = len(params["dec_layers"])

    inputs = [decoder_tokens]
    in_specs = [pl.BlockSpec((1, N, Dd), lambda b: (b, 0, 0))]
    for layer in params["dec_layers"]:
        for name in LAYER_KEYS:
            inputs.append(layer[name])
            in_specs.append(_full_spec(layer[name].shape))
    for arr in (params["dec_final_ln"]["g"], params["dec_final_ln"]["b"],
                params["pix_w"], params["pix_b"]):
        inputs.append(arr)
        in_specs.append(_full_spec(arr.shape))

    kernel = functools.partial(_decoder_kernel, depth=depth, num_heads=num_heads,
                               num_masked=num_masked)
    return pl.pallas_call(
        kernel,
        out_shape=jax.ShapeDtypeStruct((B, num_masked, P), jnp.float32),
        grid=(B,),
        in_specs=in_specs,
        out_specs=pl.BlockSpec((1, num_masked, P), lambda b: (b, 0, 0)),
        compiler_params=pltpu.CompilerParams(dimension_semantics=("parallel",)),
    )(*inputs)


# ---------------------------------------------------------------------------
# Parameter init (deterministic, synthetic)
# ---------------------------------------------------------------------------

def init_linear(key, din, dout, scale=0.02):
    # MXU-facing weights stored in bf16 (f32 accumulation in-kernel); biases f32.
    w = (scale * jax.random.normal(key, (din, dout), jnp.float32)).astype(jnp.bfloat16)
    b = jnp.zeros((1, dout), jnp.float32)
    return w, b


def init_block(key, dim, expansion):
    k = jax.random.split(key, 4)
    hidden = dim * expansion
    wqkv, bqkv = init_linear(k[0], dim, 3 * dim)
    wo, bo = init_linear(k[1], dim, dim)
    w1, bm1 = init_linear(k[2], dim, hidden)
    w2, bm2 = init_linear(k[3], hidden, dim)
    return dict(
        g1=jnp.ones((1, dim), jnp.float32), b1=jnp.zeros((1, dim), jnp.float32),
        wqkv=wqkv, bqkv=bqkv, wo=wo, bo=bo,
        g2=jnp.ones((1, dim), jnp.float32), b2=jnp.zeros((1, dim), jnp.float32),
        w1=w1, bm1=bm1, w2=w2, bm2=bm2)


def init_params(key, *, patch_dim, num_patches, enc_dim, enc_depth,
                dec_dim, dec_depth, expansion):
    keys = jax.random.split(key, 8 + enc_depth + dec_depth)
    it = iter(keys)
    params = {}
    params["pe_w"], params["pe_b"] = init_linear(next(it), patch_dim, enc_dim)
    # pos_embedding keeps a [cls] slot -> (num_patches + 1, enc_dim); forward uses [1:].
    params["pos_embedding"] = 0.02 * jax.random.normal(
        next(it), (num_patches + 1, enc_dim), jnp.float32)
    params["enc_layers"] = [init_block(next(it), enc_dim, expansion)
                            for _ in range(enc_depth)]
    params["enc_final_ln"] = dict(g=jnp.ones((1, enc_dim), jnp.float32),
                                  b=jnp.zeros((1, enc_dim), jnp.float32))
    params["e2d_w"], params["e2d_b"] = init_linear(next(it), enc_dim, dec_dim)
    params["mask_token"] = jax.random.normal(next(it), (dec_dim,), jnp.float32)
    # The spec sizes nn.Embedding from encoder.pos_embedding.shape[-2]
    # (= num_patches + 1, cls slot included) and indexes it with raw patch ids.
    params["dec_pos_table"] = 0.02 * jax.random.normal(
        next(it), (num_patches + 1, dec_dim), jnp.float32)
    params["dec_layers"] = [init_block(next(it), dec_dim, expansion)
                            for _ in range(dec_depth)]
    params["dec_final_ln"] = dict(g=jnp.ones((1, dec_dim), jnp.float32),
                                  b=jnp.zeros((1, dec_dim), jnp.float32))
    params["pix_w"], params["pix_b"] = init_linear(next(it), dec_dim, patch_dim)
    return params


# ---------------------------------------------------------------------------
# MaskedAE forward
# ---------------------------------------------------------------------------

def to_patch(img, p):
    """NCHW image -> [B, (H/p)*(W/p), p*p*C] with (p1, p2, c) ordering."""
    B, C, H, W = img.shape
    h, w = H // p, W // p
    x = img.reshape(B, C, h, p, w, p)
    x = jnp.transpose(x, (0, 2, 4, 3, 5, 1))      # B, h, w, p1, p2, c
    return x.reshape(B, h * w, p * p * C)


def masked_ae_forward(img, params, mask_rng, *, patch_size, mask_ratio,
                      enc_heads, dec_heads):
    patches = to_patch(img, patch_size)            # [B, N, P]
    B, N, _ = patches.shape
    num_masked = int(mask_ratio * N)

    # torch.rand(...).argsort random masking: glue, plain JAX (deterministic).
    rand_ids = jnp.argsort(jax.random.uniform(mask_rng, (B, N)), axis=-1)
    rand_ids = rand_ids.astype(jnp.int32)
    masked_ids = rand_ids[:, :num_masked]
    unmasked_ids = rand_ids[:, num_masked:]

    # Gather the *raw* unmasked patches / pos rows in JAX (a few KB); the patch
    # embedding itself is fused into the encoder kernel, so the full [B, N, D]
    # token tensor is never materialized in HBM.
    unmasked_patches = jnp.take_along_axis(patches, unmasked_ids[:, :, None], axis=1)
    unmasked_pos = params["pos_embedding"][1:][unmasked_ids]        # [B, Nu, Denc]

    # Fused kernel #1: patch-embed + pos + encoder blocks + final LN + enc->dec.
    dec_unmasked = encoder_forward(unmasked_patches, unmasked_pos, params, enc_heads)

    # Decoder input assembly (glue): mask_token + decoder pos rows of masked ids,
    # concatenated with the projected unmasked tokens.
    # TODO(synk): could be folded into the decoder kernel via scalar-prefetch
    # gather; kept in JAX since it moves only a few KB.
    mask_tokens = params["mask_token"][None, None, :] + params["dec_pos_table"][masked_ids]
    decoder_tokens = jnp.concatenate([mask_tokens, dec_unmasked], axis=1)  # [B, N, Ddec]

    # Fused kernel #2: decoder blocks + final LN + pixel head + sigmoid.
    masked_reconst = decoder_forward(decoder_tokens, params, dec_heads, num_masked)

    return masked_reconst, patches, masked_ids, unmasked_ids


# ---------------------------------------------------------------------------
# Main
# ---------------------------------------------------------------------------

if __name__ == "__main__":
    B, C, HW = 2, 4, 16
    PATCH = 4
    NUM_PATCHES = (HW // PATCH) * (HW // PATCH)    # 16
    PATCH_DIM = C * PATCH * PATCH                  # 64
    ENC_DIM, ENC_DEPTH, ENC_HEADS = 32, 2, 4
    DEC_DIM, DEC_DEPTH, DEC_HEADS = 16, 2, 2
    EXPANSION = 2
    MASK_RATIO = 0.75

    root = jax.random.PRNGKey(0)
    k_img, k_params, k_mask = jax.random.split(root, 3)

    img = jax.random.normal(k_img, (B, C, HW, HW), jnp.float32)
    params = init_params(k_params, patch_dim=PATCH_DIM, num_patches=NUM_PATCHES,
                         enc_dim=ENC_DIM, enc_depth=ENC_DEPTH,
                         dec_dim=DEC_DIM, dec_depth=DEC_DEPTH,
                         expansion=EXPANSION)

    fwd = jax.jit(functools.partial(
        masked_ae_forward, patch_size=PATCH, mask_ratio=MASK_RATIO,
        enc_heads=ENC_HEADS, dec_heads=DEC_HEADS))

    reconst, patches, masked_ids, unmasked_ids = fwd(img, params, k_mask)
    jax.block_until_ready((reconst, patches, masked_ids, unmasked_ids))

    num_masked = int(MASK_RATIO * NUM_PATCHES)
    assert reconst.shape == (B, num_masked, PATCH_DIM)
    assert patches.shape == (B, NUM_PATCHES, PATCH_DIM)
    assert masked_ids.shape == (B, num_masked)
    assert unmasked_ids.shape == (B, NUM_PATCHES - num_masked)
    assert bool(jnp.all(jnp.isfinite(reconst)))
    assert bool(jnp.all((reconst >= 0.0) & (reconst <= 1.0)))

    print("KERNEL_OK")
</pallas_src>

<mosaic_0001>
module attributes {stable_mosaic.version = 11 : i64} {
  func.func @_decoder_kernel(%arg0: i32, %arg1: memref<1x16x16xf32, #tpu.memory_space<vmem>>, %arg2: memref<1x16xf32, #tpu.memory_space<vmem>>, %arg3: memref<1x16xf32, #tpu.memory_space<vmem>>, %arg4: memref<16x48xbf16, #tpu.memory_space<vmem>>, %arg5: memref<1x48xf32, #tpu.memory_space<vmem>>, %arg6: memref<16x16xbf16, #tpu.memory_space<vmem>>, %arg7: memref<1x16xf32, #tpu.memory_space<vmem>>, %arg8: memref<1x16xf32, #tpu.memory_space<vmem>>, %arg9: memref<1x16xf32, #tpu.memory_space<vmem>>, %arg10: memref<16x32xbf16, #tpu.memory_space<vmem>>, %arg11: memref<1x32xf32, #tpu.memory_space<vmem>>, %arg12: memref<32x16xbf16, #tpu.memory_space<vmem>>, %arg13: memref<1x16xf32, #tpu.memory_space<vmem>>, %arg14: memref<1x16xf32, #tpu.memory_space<vmem>>, %arg15: memref<1x16xf32, #tpu.memory_space<vmem>>, %arg16: memref<16x48xbf16, #tpu.memory_space<vmem>>, %arg17: memref<1x48xf32, #tpu.memory_space<vmem>>, %arg18: memref<16x16xbf16, #tpu.memory_space<vmem>>, %arg19: memref<1x16xf32, #tpu.memory_space<vmem>>, %arg20: memref<1x16xf32, #tpu.memory_space<vmem>>, %arg21: memref<1x16xf32, #tpu.memory_space<vmem>>, %arg22: memref<16x32xbf16, #tpu.memory_space<vmem>>, %arg23: memref<1x32xf32, #tpu.memory_space<vmem>>, %arg24: memref<32x16xbf16, #tpu.memory_space<vmem>>, %arg25: memref<1x16xf32, #tpu.memory_space<vmem>>, %arg26: memref<1x16xf32, #tpu.memory_space<vmem>>, %arg27: memref<1x16xf32, #tpu.memory_space<vmem>>, %arg28: memref<16x64xbf16, #tpu.memory_space<vmem>>, %arg29: memref<1x64xf32, #tpu.memory_space<vmem>>, %arg30: memref<1x12x64xf32, #tpu.memory_space<vmem>>) attributes {dimension_semantics = [#tpu.dimension_semantics<parallel>], iteration_bounds = array<i64: 2>, scalar_prefetch = 0 : i64, scratch_operands = 0 : i64, tpu.core_type = #tpu.core_type<tc>, window_params = [{transform_indices = @transform_0, window_bounds = array<i64: 1, 16, 16>}, {pipeline_mode = #tpu.pipeline_mode<synchronous>, transform_indices = @transform_1, window_bounds = array<i64: 1, 16>}, {pipeline_mode = #tpu.pipeline_mode<synchronous>, transform_indices = @transform_2, window_bounds = array<i64: 1, 16>}, {pipeline_mode = #tpu.pipeline_mode<synchronous>, transform_indices = @transform_3, window_bounds = array<i64: 16, 48>}, {pipeline_mode = #tpu.pipeline_mode<synchronous>, transform_indices = @transform_4, window_bounds = array<i64: 1, 48>}, {pipeline_mode = #tpu.pipeline_mode<synchronous>, transform_indices = @transform_5, window_bounds = array<i64: 16, 16>}, {pipeline_mode = #tpu.pipeline_mode<synchronous>, transform_indices = @transform_6, window_bounds = array<i64: 1, 16>}, {pipeline_mode = #tpu.pipeline_mode<synchronous>, transform_indices = @transform_7, window_bounds = array<i64: 1, 16>}, {pipeline_mode = #tpu.pipeline_mode<synchronous>, transform_indices = @transform_8, window_bounds = array<i64: 1, 16>}, {pipeline_mode = #tpu.pipeline_mode<synchronous>, transform_indices = @transform_9, window_bounds = array<i64: 16, 32>}, {pipeline_mode = #tpu.pipeline_mode<synchronous>, transform_indices = @transform_10, window_bounds = array<i64: 1, 32>}, {pipeline_mode = #tpu.pipeline_mode<synchronous>, transform_indices = @transform_11, window_bounds = array<i64: 32, 16>}, {pipeline_mode = #tpu.pipeline_mode<synchronous>, transform_indices = @transform_12, window_bounds = array<i64: 1, 16>}, {pipeline_mode = #tpu.pipeline_mode<synchronous>, transform_indices = @transform_13, window_bounds = array<i64: 1, 16>}, {pipeline_mode = #tpu.pipeline_mode<synchronous>, transform_indices = @transform_14, window_bounds = array<i64: 1, 16>}, {pipeline_mode = #tpu.pipeline_mode<synchronous>, transform_indices = @transform_15, window_bounds = array<i64: 16, 48>}, {pipeline_mode = #tpu.pipeline_mode<synchronous>, transform_indices = @transform_16, window_bounds = array<i64: 1, 48>}, {pipeline_mode = #tpu.pipeline_mode<synchronous>, transform_indices = @transform_17, window_bounds = array<i64: 16, 16>}, {pipeline_mode = #tpu.pipeline_mode<synchronous>, transform_indices = @transform_18, window_bounds = array<i64: 1, 16>}, {pipeline_mode = #tpu.pipeline_mode<synchronous>, transform_indices = @transform_19, window_bounds = array<i64: 1, 16>}, {pipeline_mode = #tpu.pipeline_mode<synchronous>, transform_indices = @transform_20, window_bounds = array<i64: 1, 16>}, {pipeline_mode = #tpu.pipeline_mode<synchronous>, transform_indices = @transform_21, window_bounds = array<i64: 16, 32>}, {pipeline_mode = #tpu.pipeline_mode<synchronous>, transform_indices = @transform_22, window_bounds = array<i64: 1, 32>}, {pipeline_mode = #tpu.pipeline_mode<synchronous>, transform_indices = @transform_23, window_bounds = array<i64: 32, 16>}, {pipeline_mode = #tpu.pipeline_mode<synchronous>, transform_indices = @transform_24, window_bounds = array<i64: 1, 16>}, {pipeline_mode = #tpu.pipeline_mode<synchronous>, transform_indices = @transform_25, window_bounds = array<i64: 1, 16>}, {pipeline_mode = #tpu.pipeline_mode<synchronous>, transform_indices = @transform_26, window_bounds = array<i64: 1, 16>}, {pipeline_mode = #tpu.pipeline_mode<synchronous>, transform_indices = @transform_27, window_bounds = array<i64: 16, 64>}, {pipeline_mode = #tpu.pipeline_mode<synchronous>, transform_indices = @transform_28, window_bounds = array<i64: 1, 64>}, {transform_indices = @transform_29, window_bounds = array<i64: 1, 12, 64>}]} {
    %c0 = arith.constant 0 : index
    %c0_0 = arith.constant 0 : index
    %c0_1 = arith.constant 0 : index
    %0 = vector.load %arg1[%c0, %c0_0, %c0_1] : memref<1x16x16xf32, #tpu.memory_space<vmem>>, vector<1x16x16xf32>
    %1 = vector.shape_cast %0 : vector<1x16x16xf32> to vector<16x16xf32>
    %c0_2 = arith.constant 0 : index
    %c0_3 = arith.constant 0 : index
    %2 = vector.load %arg2[%c0_2, %c0_3] : memref<1x16xf32, #tpu.memory_space<vmem>>, vector<1x16xf32>
    %c0_4 = arith.constant 0 : index
    %c0_5 = arith.constant 0 : index
    %3 = vector.load %arg3[%c0_4, %c0_5] : memref<1x16xf32, #tpu.memory_space<vmem>>, vector<1x16xf32>
    %cst = arith.constant dense<0.000000e+00> : vector<16xf32>
    %4 = vector.multi_reduction <add>, %1, %cst [1] : vector<16x16xf32> to vector<16xf32>
    %5 = vector.shape_cast %4 : vector<16xf32> to vector<16x1xf32>
    %cst_6 = arith.constant 1.600000e+01 : f32
    %6 = vector.broadcast %cst_6 : f32 to vector<16x1xf32>
    %7 = arith.divf %5, %6 : vector<16x1xf32>
    %8 = vector.broadcast %7 : vector<16x1xf32> to vector<16x16xf32>
    %9 = arith.subf %1, %8 : vector<16x16xf32>
    %10 = arith.mulf %9, %9 : vector<16x16xf32>
    %cst_7 = arith.constant dense<0.000000e+00> : vector<16xf32>
    %11 = vector.multi_reduction <add>, %10, %cst_7 [1] : vector<16x16xf32> to vector<16xf32>
    %12 = vector.shape_cast %11 : vector<16xf32> to vector<16x1xf32>
    %cst_8 = arith.constant 1.600000e+01 : f32
    %13 = vector.broadcast %cst_8 : f32 to vector<16x1xf32>
    %14 = arith.divf %12, %13 : vector<16x1xf32>
    %15 = vector.broadcast %7 : vector<16x1xf32> to vector<16x16xf32>
    %16 = arith.subf %1, %15 : vector<16x16xf32>
    %cst_9 = arith.constant 9.99999974E-6 : f32
    %17 = vector.broadcast %cst_9 : f32 to vector<16x1xf32>
    %18 = arith.addf %14, %17 : vector<16x1xf32>
    %19 = math.rsqrt %18 : vector<16x1xf32>
    %20 = vector.broadcast %19 : vector<16x1xf32> to vector<16x16xf32>
    %21 = arith.mulf %16, %20 : vector<16x16xf32>
    %22 = vector.broadcast %2 : vector<1x16xf32> to vector<16x16xf32>
    %23 = arith.mulf %21, %22 : vector<16x16xf32>
    %24 = vector.broadcast %3 : vector<1x16xf32> to vector<16x16xf32>
    %25 = arith.addf %23, %24 : vector<16x16xf32>
    %26 = arith.truncf %25 : vector<16x16xf32> to vector<16x16xbf16>
    %c0_10 = arith.constant 0 : index
    %c0_11 = arith.constant 0 : index
    %27 = vector.load %arg4[%c0_10, %c0_11] : memref<16x48xbf16, #tpu.memory_space<vmem>>, vector<16x48xbf16>
    %cst_12 = arith.constant dense<0.000000e+00> : vector<16x48xf32>
    %28 = tpu.matmul %26, %27, %cst_12 {dimension_numbers = #tpu.dot_dimension_numbers<[1], [0], [0], [1], [0, 0, 1, 1], [], []>} : vector<16x16xbf16>, vector<16x48xbf16>, vector<16x48xf32> -> vector<16x48xf32>
    %c0_13 = arith.constant 0 : index
    %c0_14 = arith.constant 0 : index
    %29 = vector.load %arg5[%c0_13, %c0_14] : memref<1x48xf32, #tpu.memory_space<vmem>>, vector<1x48xf32>
    %30 = vector.broadcast %29 : vector<1x48xf32> to vector<16x48xf32>
    %31 = arith.addf %28, %30 : vector<16x48xf32>
    %32 = vector.extract_strided_slice %31 {offsets = [0, 0], sizes = [16, 16], strides = [1, 1]} : vector<16x48xf32> to vector<16x16xf32>
    %cst_15 = arith.constant 0.353553385 : f32
    %33 = vector.broadcast %cst_15 : f32 to vector<16x16xf32>
    %34 = arith.mulf %32, %33 : vector<16x16xf32>
    %35 = vector.extract_strided_slice %31 {offsets = [0, 16], sizes = [16, 16], strides = [1, 1]} : vector<16x48xf32> to vector<16x16xf32>
    %36 = vector.extract_strided_slice %31 {offsets = [0, 32], sizes = [16, 16], strides = [1, 1]} : vector<16x48xf32> to vector<16x16xf32>
    %37 = vector.extract_strided_slice %34 {offsets = [0, 0], sizes = [16, 8], strides = [1, 1]} : vector<16x16xf32> to vector<16x8xf32>
    %38 = vector.extract_strided_slice %34 {offsets = [0, 8], sizes = [16, 8], strides = [1, 1]} : vector<16x16xf32> to vector<16x8xf32>
    %39 = vector.shape_cast %37 : vector<16x8xf32> to vector<1x16x8xf32>
    %40 = vector.shape_cast %38 : vector<16x8xf32> to vector<1x16x8xf32>
    %41 = tpu.concatenate %39, %40 in 0 : vector<1x16x8xf32>, vector<1x16x8xf32> -> vector<2x16x8xf32>
    %42 = arith.truncf %41 : vector<2x16x8xf32> to vector<2x16x8xbf16>
    %43 = vector.extract_strided_slice %35 {offsets = [0, 0], sizes = [16, 8], strides = [1, 1]} : vector<16x16xf32> to vector<16x8xf32>
    %44 = vector.extract_strided_slice %35 {offsets = [0, 8], sizes = [16, 8], strides = [1, 1]} : vector<16x16xf32> to vector<16x8xf32>
    %45 = vector.shape_cast %43 : vector<16x8xf32> to vector<1x16x8xf32>
    %46 = vector.shape_cast %44 : vector<16x8xf32> to vector<1x16x8xf32>
    %47 = tpu.concatenate %45, %46 in 0 : vector<1x16x8xf32>, vector<1x16x8xf32> -> vector<2x16x8xf32>
    %48 = arith.truncf %47 : vector<2x16x8xf32> to vector<2x16x8xbf16>
    %49 = vector.extract_strided_slice %36 {offsets = [0, 0], sizes = [16, 8], strides = [1, 1]} : vector<16x16xf32> to vector<16x8xf32>
    %50 = vector.extract_strided_slice %36 {offsets = [0, 8], sizes = [16, 8], strides = [1, 1]} : vector<16x16xf32> to vector<16x8xf32>
    %51 = vector.shape_cast %49 : vector<16x8xf32> to vector<1x16x8xf32>
    %52 = vector.shape_cast %50 : vector<16x8xf32> to vector<1x16x8xf32>
    %53 = tpu.concatenate %51, %52 in 0 : vector<1x16x8xf32>, vector<1x16x8xf32> -> vector<2x16x8xf32>
    %54 = arith.truncf %53 : vector<2x16x8xf32> to vector<2x16x8xbf16>
    "tpu.trace_start"() <{level = 10 : i32, message = "hqc,hkc->hqk"}> : () -> ()
    %cst_16 = arith.constant dense<0.000000e+00> : vector<2x16x16xf32>
    %55 = tpu.matmul %42, %48, %cst_16 {dimension_numbers = #tpu.dot_dimension_numbers<[2], [2], [1], [1], [0, 0, 0, 1, 1, 1], [0], [0]>} : vector<2x16x8xbf16>, vector<2x16x8xbf16>, vector<2x16x16xf32> -> vector<2x16x16xf32>
    "tpu.trace_stop"() : () -> ()
    %cst_17 = arith.constant dense<0xFF800000> : vector<2x16xf32>
    %56 = vector.multi_reduction <maximumf>, %55, %cst_17 [2] : vector<2x16x16xf32> to vector<2x16xf32>
    %57 = vector.shape_cast %56 : vector<2x16xf32> to vector<2x16x1xf32>
    %58 = vector.broadcast %57 : vector<2x16x1xf32> to vector<2x16x16xf32>
    %59 = arith.subf %55, %58 : vector<2x16x16xf32>
    %60 = math.exp %59 : vector<2x16x16xf32>
    %cst_18 = arith.constant dense<0.000000e+00> : vector<2x16xf32>
    %61 = vector.multi_reduction <add>, %60, %cst_18 [2] : vector<2x16x16xf32> to vector<2x16xf32>
    %62 = vector.shape_cast %61 : vector<2x16xf32> to vector<2x16x1xf32>
    %63 = tpu.reciprocal %62 {approx = true} : vector<2x16x1xf32> -> vector<2x16x1xf32>
    %64 = vector.broadcast %63 : vector<2x16x1xf32> to vector<2x16x16xf32>
    %65 = arith.mulf %60, %64 : vector<2x16x16xf32>
    %66 = arith.truncf %65 : vector<2x16x16xf32> to vector<2x16x16xbf16>
    "tpu.trace_start"() <{level = 10 : i32, message = "hqk,hkc->hqc"}> : () -> ()
    %cst_19 = arith.constant dense<0.000000e+00> : vector<2x16x8xf32>
    %67 = tpu.matmul %66, %54, %cst_19 {dimension_numbers = #tpu.dot_dimension_numbers<[2], [1], [1], [2], [0, 0, 0, 1, 1, 2], [0], [0]>} : vector<2x16x16xbf16>, vector<2x16x8xbf16>, vector<2x16x8xf32> -> vector<2x16x8xf32>
    "tpu.trace_stop"() : () -> ()
    %68 = vector.extract_strided_slice %67 {offsets = [0, 0, 0], sizes = [1, 16, 8], strides = [1, 1, 1]} : vector<2x16x8xf32> to vector<1x16x8xf32>
    %69 = vector.shape_cast %68 : vector<1x16x8xf32> to vector<16x8xf32>
    %70 = vector.extract_strided_slice %67 {offsets = [1, 0, 0], sizes = [1, 16, 8], strides = [1, 1, 1]} : vector<2x16x8xf32> to vector<1x16x8xf32>
    %71 = vector.shape_cast %70 : vector<1x16x8xf32> to vector<16x8xf32>
    %72 = tpu.concatenate %69, %71 in 1 : vector<16x8xf32>, vector<16x8xf32> -> vector<16x16xf32>
    %73 = arith.truncf %72 : vector<16x16xf32> to vector<16x16xbf16>
    %c0_20 = arith.constant 0 : index
    %c0_21 = arith.constant 0 : index
    %74 = vector.load %arg6[%c0_20, %c0_21] : memref<16x16xbf16, #tpu.memory_space<vmem>>, vector<16x16xbf16>
    %cst_22 = arith.constant dense<0.000000e+00> : vector<16x16xf32>
    %75 = tpu.matmul %73, %74, %cst_22 {dimension_numbers = #tpu.dot_dimension_numbers<[1], [0], [0], [1], [0, 0, 1, 1], [], []>} : vector<16x16xbf16>, vector<16x16xbf16>, vector<16x16xf32> -> vector<16x16xf32>
    %c0_23 = arith.constant 0 : index
    %c0_24 = arith.constant 0 : index
    %76 = vector.load %arg7[%c0_23, %c0_24] : memref<1x16xf32, #tpu.memory_space<vmem>>, vector<1x16xf32>
    %77 = vector.broadcast %76 : vector<1x16xf32> to vector<16x16xf32>
    %78 = arith.addf %75, %77 : vector<16x16xf32>
    %79 = arith.addf %1, %78 : vector<16x16xf32>
    %c0_25 = arith.constant 0 : index
    %c0_26 = arith.constant 0 : index
    %80 = vector.load %arg8[%c0_25, %c0_26] : memref<1x16xf32, #tpu.memory_space<vmem>>, vector<1x16xf32>
    %c0_27 = arith.constant 0 : index
    %c0_28 = arith.constant 0 : index
    %81 = vector.load %arg9[%c0_27, %c0_28] : memref<1x16xf32, #tpu.memory_space<vmem>>, vector<1x16xf32>
    %cst_29 = arith.constant dense<0.000000e+00> : vector<16xf32>
    %82 = vector.multi_reduction <add>, %79, %cst_29 [1] : vector<16x16xf32> to vector<16xf32>
    %83 = vector.shape_cast %82 : vector<16xf32> to vector<16x1xf32>
    %cst_30 = arith.constant 1.600000e+01 : f32
    %84 = vector.broadcast %cst_30 : f32 to vector<16x1xf32>
    %85 = arith.divf %83, %84 : vector<16x1xf32>
    %86 = vector.broadcast %85 : vector<16x1xf32> to vector<16x16xf32>
    %87 = arith.subf %79, %86 : vector<16x16xf32>
    %88 = arith.mulf %87, %87 : vector<16x16xf32>
    %cst_31 = arith.constant dense<0.000000e+00> : vector<16xf32>
    %89 = vector.multi_reduction <add>, %88, %cst_31 [1] : vector<16x16xf32> to vector<16xf32>
    %90 = vector.shape_cast %89 : vector<16xf32> to vector<16x1xf32>
    %cst_32 = arith.constant 1.600000e+01 : f32
    %91 = vector.broadcast %cst_32 : f32 to vector<16x1xf32>
    %92 = arith.divf %90, %91 : vector<16x1xf32>
    %93 = vector.broadcast %85 : vector<16x1xf32> to vector<16x16xf32>
    %94 = arith.subf %79, %93 : vector<16x16xf32>
    %cst_33 = arith.constant 9.99999974E-6 : f32
    %95 = vector.broadcast %cst_33 : f32 to vector<16x1xf32>
    %96 = arith.addf %92, %95 : vector<16x1xf32>
    %97 = math.rsqrt %96 : vector<16x1xf32>
    %98 = vector.broadcast %97 : vector<16x1xf32> to vector<16x16xf32>
    %99 = arith.mulf %94, %98 : vector<16x16xf32>
    %100 = vector.broadcast %80 : vector<1x16xf32> to vector<16x16xf32>
    %101 = arith.mulf %99, %100 : vector<16x16xf32>
    %102 = vector.broadcast %81 : vector<1x16xf32> to vector<16x16xf32>
    %103 = arith.addf %101, %102 : vector<16x16xf32>
    %104 = arith.truncf %103 : vector<16x16xf32> to vector<16x16xbf16>
    %c0_34 = arith.constant 0 : index
    %c0_35 = arith.constant 0 : index
    %105 = vector.load %arg10[%c0_34, %c0_35] : memref<16x32xbf16, #tpu.memory_space<vmem>>, vector<16x32xbf16>
    %cst_36 = arith.constant dense<0.000000e+00> : vector<16x32xf32>
    %106 = tpu.matmul %104, %105, %cst_36 {dimension_numbers = #tpu.dot_dimension_numbers<[1], [0], [0], [1], [0, 0, 1, 1], [], []>} : vector<16x16xbf16>, vector<16x32xbf16>, vector<16x32xf32> -> vector<16x32xf32>
    %c0_37 = arith.constant 0 : index
    %c0_38 = arith.constant 0 : index
    %107 = vector.load %arg11[%c0_37, %c0_38] : memref<1x32xf32, #tpu.memory_space<vmem>>, vector<1x32xf32>
    %108 = vector.broadcast %107 : vector<1x32xf32> to vector<16x32xf32>
    %109 = arith.addf %106, %108 : vector<16x32xf32>
    %110 = arith.mulf %109, %109 : vector<16x32xf32>
    %111 = arith.mulf %109, %110 : vector<16x32xf32>
    %cst_39 = arith.constant 4.471500e-02 : f32
    %112 = vector.broadcast %cst_39 : f32 to vector<16x32xf32>
    %113 = arith.mulf %112, %111 : vector<16x32xf32>
    %114 = arith.addf %109, %113 : vector<16x32xf32>
    %cst_40 = arith.constant 0.797884583 : f32
    %115 = vector.broadcast %cst_40 : f32 to vector<16x32xf32>
    %116 = arith.mulf %115, %114 : vector<16x32xf32>
    %117 = math.tanh %116 : vector<16x32xf32>
    %cst_41 = arith.constant 1.000000e+00 : f32
    %118 = vector.broadcast %cst_41 : f32 to vector<16x32xf32>
    %119 = arith.addf %118, %117 : vector<16x32xf32>
    %cst_42 = arith.constant 5.000000e-01 : f32
    %120 = vector.broadcast %cst_42 : f32 to vector<16x32xf32>
    %121 = arith.mulf %120, %119 : vector<16x32xf32>
    %122 = arith.mulf %109, %121 : vector<16x32xf32>
    %123 = arith.truncf %122 : vector<16x32xf32> to vector<16x32xbf16>
    %c0_43 = arith.constant 0 : index
    %c0_44 = arith.constant 0 : index
    %124 = vector.load %arg12[%c0_43, %c0_44] : memref<32x16xbf16, #tpu.memory_space<vmem>>, vector<32x16xbf16>
    %cst_45 = arith.constant dense<0.000000e+00> : vector<16x16xf32>
    %125 = tpu.matmul %123, %124, %cst_45 {dimension_numbers = #tpu.dot_dimension_numbers<[1], [0], [0], [1], [0, 0, 1, 1], [], []>} : vector<16x32xbf16>, vector<32x16xbf16>, vector<16x16xf32> -> vector<16x16xf32>
    %c0_46 = arith.constant 0 : index
    %c0_47 = arith.constant 0 : index
    %126 = vector.load %arg13[%c0_46, %c0_47] : memref<1x16xf32, #tpu.memory_space<vmem>>, vector<1x16xf32>
    %127 = vector.broadcast %126 : vector<1x16xf32> to vector<16x16xf32>
    %128 = arith.addf %125, %127 : vector<16x16xf32>
    %129 = arith.addf %79, %128 : vector<16x16xf32>
    %c0_48 = arith.constant 0 : index
    %c0_49 = arith.constant 0 : index
    %130 = vector.load %arg14[%c0_48, %c0_49] : memref<1x16xf32, #tpu.memory_space<vmem>>, vector<1x16xf32>
    %c0_50 = arith.constant 0 : index
    %c0_51 = arith.constant 0 : index
    %131 = vector.load %arg15[%c0_50, %c0_51] : memref<1x16xf32, #tpu.memory_space<vmem>>, vector<1x16xf32>
    %cst_52 = arith.constant dense<0.000000e+00> : vector<16xf32>
    %132 = vector.multi_reduction <add>, %129, %cst_52 [1] : vector<16x16xf32> to vector<16xf32>
    %133 = vector.shape_cast %132 : vector<16xf32> to vector<16x1xf32>
    %cst_53 = arith.constant 1.600000e+01 : f32
    %134 = vector.broadcast %cst_53 : f32 to vector<16x1xf32>
    %135 = arith.divf %133, %134 : vector<16x1xf32>
    %136 = vector.broadcast %135 : vector<16x1xf32> to vector<16x16xf32>
    %137 = arith.subf %129, %136 : vector<16x16xf32>
    %138 = arith.mulf %137, %137 : vector<16x16xf32>
    %cst_54 = arith.constant dense<0.000000e+00> : vector<16xf32>
    %139 = vector.multi_reduction <add>, %138, %cst_54 [1] : vector<16x16xf32> to vector<16xf32>
    %140 = vector.shape_cast %139 : vector<16xf32> to vector<16x1xf32>
    %cst_55 = arith.constant 1.600000e+01 : f32
    %141 = vector.broadcast %cst_55 : f32 to vector<16x1xf32>
    %142 = arith.divf %140, %141 : vector<16x1xf32>
    %143 = vector.broadcast %135 : vector<16x1xf32> to vector<16x16xf32>
    %144 = arith.subf %129, %143 : vector<16x16xf32>
    %cst_56 = arith.constant 9.99999974E-6 : f32
    %145 = vector.broadcast %cst_56 : f32 to vector<16x1xf32>
    %146 = arith.addf %142, %145 : vector<16x1xf32>
    %147 = math.rsqrt %146 : vector<16x1xf32>
    %148 = vector.broadcast %147 : vector<16x1xf32> to vector<16x16xf32>
    %149 = arith.mulf %144, %148 : vector<16x16xf32>
    %150 = vector.broadcast %130 : vector<1x16xf32> to vector<16x16xf32>
    %151 = arith.mulf %149, %150 : vector<16x16xf32>
    %152 = vector.broadcast %131 : vector<1x16xf32> to vector<16x16xf32>
    %153 = arith.addf %151, %152 : vector<16x16xf32>
    %154 = arith.truncf %153 : vector<16x16xf32> to vector<16x16xbf16>
    %c0_57 = arith.constant 0 : index
    %c0_58 = arith.constant 0 : index
    %155 = vector.load %arg16[%c0_57, %c0_58] : memref<16x48xbf16, #tpu.memory_space<vmem>>, vector<16x48xbf16>
    %cst_59 = arith.constant dense<0.000000e+00> : vector<16x48xf32>
    %156 = tpu.matmul %154, %155, %cst_59 {dimension_numbers = #tpu.dot_dimension_numbers<[1], [0], [0], [1], [0, 0, 1, 1], [], []>} : vector<16x16xbf16>, vector<16x48xbf16>, vector<16x48xf32> -> vector<16x48xf32>
    %c0_60 = arith.constant 0 : index
    %c0_61 = arith.constant 0 : index
    %157 = vector.load %arg17[%c0_60, %c0_61] : memref<1x48xf32, #tpu.memory_space<vmem>>, vector<1x48xf32>
    %158 = vector.broadcast %157 : vector<1x48xf32> to vector<16x48xf32>
    %159 = arith.addf %156, %158 : vector<16x48xf32>
    %160 = vector.extract_strided_slice %159 {offsets = [0, 0], sizes = [16, 16], strides = [1, 1]} : vector<16x48xf32> to vector<16x16xf32>
    %cst_62 = arith.constant 0.353553385 : f32
    %161 = vector.broadcast %cst_62 : f32 to vector<16x16xf32>
    %162 = arith.mulf %160, %161 : vector<16x16xf32>
    %163 = vector.extract_strided_slice %159 {offsets = [0, 16], sizes = [16, 16], strides = [1, 1]} : vector<16x48xf32> to vector<16x16xf32>
    %164 = vector.extract_strided_slice %159 {offsets = [0, 32], sizes = [16, 16], strides = [1, 1]} : vector<16x48xf32> to vector<16x16xf32>
    %165 = vector.extract_strided_slice %162 {offsets = [0, 0], sizes = [16, 8], strides = [1, 1]} : vector<16x16xf32> to vector<16x8xf32>
    %166 = vector.extract_strided_slice %162 {offsets = [0, 8], sizes = [16, 8], strides = [1, 1]} : vector<16x16xf32> to vector<16x8xf32>
    %167 = vector.shape_cast %165 : vector<16x8xf32> to vector<1x16x8xf32>
    %168 = vector.shape_cast %166 : vector<16x8xf32> to vector<1x16x8xf32>
    %169 = tpu.concatenate %167, %168 in 0 : vector<1x16x8xf32>, vector<1x16x8xf32> -> vector<2x16x8xf32>
    %170 = arith.truncf %169 : vector<2x16x8xf32> to vector<2x16x8xbf16>
    %171 = vector.extract_strided_slice %163 {offsets = [0, 0], sizes = [16, 8], strides = [1, 1]} : vector<16x16xf32> to vector<16x8xf32>
    %172 = vector.extract_strided_slice %163 {offsets = [0, 8], sizes = [16, 8], strides = [1, 1]} : vector<16x16xf32> to vector<16x8xf32>
    %173 = vector.shape_cast %171 : vector<16x8xf32> to vector<1x16x8xf32>
    %174 = vector.shape_cast %172 : vector<16x8xf32> to vector<1x16x8xf32>
    %175 = tpu.concatenate %173, %174 in 0 : vector<1x16x8xf32>, vector<1x16x8xf32> -> vector<2x16x8xf32>
    %176 = arith.truncf %175 : vector<2x16x8xf32> to vector<2x16x8xbf16>
    %177 = vector.extract_strided_slice %164 {offsets = [0, 0], sizes = [16, 8], strides = [1, 1]} : vector<16x16xf32> to vector<16x8xf32>
    %178 = vector.extract_strided_slice %164 {offsets = [0, 8], sizes = [16, 8], strides = [1, 1]} : vector<16x16xf32> to vector<16x8xf32>
    %179 = vector.shape_cast %177 : vector<16x8xf32> to vector<1x16x8xf32>
    %180 = vector.shape_cast %178 : vector<16x8xf32> to vector<1x16x8xf32>
    %181 = tpu.concatenate %179, %180 in 0 : vector<1x16x8xf32>, vector<1x16x8xf32> -> vector<2x16x8xf32>
    %182 = arith.truncf %181 : vector<2x16x8xf32> to vector<2x16x8xbf16>
    "tpu.trace_start"() <{level = 10 : i32, message = "hqc,hkc->hqk"}> : () -> ()
    %cst_63 = arith.constant dense<0.000000e+00> : vector<2x16x16xf32>
    %183 = tpu.matmul %170, %176, %cst_63 {dimension_numbers = #tpu.dot_dimension_numbers<[2], [2], [1], [1], [0, 0, 0, 1, 1, 1], [0], [0]>} : vector<2x16x8xbf16>, vector<2x16x8xbf16>, vector<2x16x16xf32> -> vector<2x16x16xf32>
    "tpu.trace_stop"() : () -> ()
    %cst_64 = arith.constant dense<0xFF800000> : vector<2x16xf32>
    %184 = vector.multi_reduction <maximumf>, %183, %cst_64 [2] : vector<2x16x16xf32> to vector<2x16xf32>
    %185 = vector.shape_cast %184 : vector<2x16xf32> to vector<2x16x1xf32>
    %186 = vector.broadcast %185 : vector<2x16x1xf32> to vector<2x16x16xf32>
    %187 = arith.subf %183, %186 : vector<2x16x16xf32>
    %188 = math.exp %187 : vector<2x16x16xf32>
    %cst_65 = arith.constant dense<0.000000e+00> : vector<2x16xf32>
    %189 = vector.multi_reduction <add>, %188, %cst_65 [2] : vector<2x16x16xf32> to vector<2x16xf32>
    %190 = vector.shape_cast %189 : vector<2x16xf32> to vector<2x16x1xf32>
    %191 = tpu.reciprocal %190 {approx = true} : vector<2x16x1xf32> -> vector<2x16x1xf32>
    %192 = vector.broadcast %191 : vector<2x16x1xf32> to vector<2x16x16xf32>
    %193 = arith.mulf %188, %192 : vector<2x16x16xf32>
    %194 = arith.truncf %193 : vector<2x16x16xf32> to vector<2x16x16xbf16>
    "tpu.trace_start"() <{level = 10 : i32, message = "hqk,hkc->hqc"}> : () -> ()
    %cst_66 = arith.constant dense<0.000000e+00> : vector<2x16x8xf32>
    %195 = tpu.matmul %194, %182, %cst_66 {dimension_numbers = #tpu.dot_dimension_numbers<[2], [1], [1], [2], [0, 0, 0, 1, 1, 2], [0], [0]>} : vector<2x16x16xbf16>, vector<2x16x8xbf16>, vector<2x16x8xf32> -> vector<2x16x8xf32>
    "tpu.trace_stop"() : () -> ()
    %196 = vector.extract_strided_slice %195 {offsets = [0, 0, 0], sizes = [1, 16, 8], strides = [1, 1, 1]} : vector<2x16x8xf32> to vector<1x16x8xf32>
    %197 = vector.shape_cast %196 : vector<1x16x8xf32> to vector<16x8xf32>
    %198 = vector.extract_strided_slice %195 {offsets = [1, 0, 0], sizes = [1, 16, 8], strides = [1, 1, 1]} : vector<2x16x8xf32> to vector<1x16x8xf32>
    %199 = vector.shape_cast %198 : vector<1x16x8xf32> to vector<16x8xf32>
    %200 = tpu.concatenate %197, %199 in 1 : vector<16x8xf32>, vector<16x8xf32> -> vector<16x16xf32>
    %201 = arith.truncf %200 : vector<16x16xf32> to vector<16x16xbf16>
    %c0_67 = arith.constant 0 : index
    %c0_68 = arith.constant 0 : index
    %202 = vector.load %arg18[%c0_67, %c0_68] : memref<16x16xbf16, #tpu.memory_space<vmem>>, vector<16x16xbf16>
    %cst_69 = arith.constant dense<0.000000e+00> : vector<16x16xf32>
    %203 = tpu.matmul %201, %202, %cst_69 {dimension_numbers = #tpu.dot_dimension_numbers<[1], [0], [0], [1], [0, 0, 1, 1], [], []>} : vector<16x16xbf16>, vector<16x16xbf16>, vector<16x16xf32> -> vector<16x16xf32>
    %c0_70 = arith.constant 0 : index
    %c0_71 = arith.constant 0 : index
    %204 = vector.load %arg19[%c0_70, %c0_71] : memref<1x16xf32, #tpu.memory_space<vmem>>, vector<1x16xf32>
    %205 = vector.broadcast %204 : vector<1x16xf32> to vector<16x16xf32>
    %206 = arith.addf %203, %205 : vector<16x16xf32>
    %207 = arith.addf %129, %206 : vector<16x16xf32>
    %c0_72 = arith.constant 0 : index
    %c0_73 = arith.constant 0 : index
    %208 = vector.load %arg20[%c0_72, %c0_73] : memref<1x16xf32, #tpu.memory_space<vmem>>, vector<1x16xf32>
    %c0_74 = arith.constant 0 : index
    %c0_75 = arith.constant 0 : index
    %209 = vector.load %arg21[%c0_74, %c0_75] : memref<1x16xf32, #tpu.memory_space<vmem>>, vector<1x16xf32>
    %cst_76 = arith.constant dense<0.000000e+00> : vector<16xf32>
    %210 = vector.multi_reduction <add>, %207, %cst_76 [1] : vector<16x16xf32> to vector<16xf32>
    %211 = vector.shape_cast %210 : vector<16xf32> to vector<16x1xf32>
    %cst_77 = arith.constant 1.600000e+01 : f32
    %212 = vector.broadcast %cst_77 : f32 to vector<16x1xf32>
    %213 = arith.divf %211, %212 : vector<16x1xf32>
    %214 = vector.broadcast %213 : vector<16x1xf32> to vector<16x16xf32>
    %215 = arith.subf %207, %214 : vector<16x16xf32>
    %216 = arith.mulf %215, %215 : vector<16x16xf32>
    %cst_78 = arith.constant dense<0.000000e+00> : vector<16xf32>
    %217 = vector.multi_reduction <add>, %216, %cst_78 [1] : vector<16x16xf32> to vector<16xf32>
    %218 = vector.shape_cast %217 : vector<16xf32> to vector<16x1xf32>
    %cst_79 = arith.constant 1.600000e+01 : f32
    %219 = vector.broadcast %cst_79 : f32 to vector<16x1xf32>
    %220 = arith.divf %218, %219 : vector<16x1xf32>
    %221 = vector.broadcast %213 : vector<16x1xf32> to vector<16x16xf32>
    %222 = arith.subf %207, %221 : vector<16x16xf32>
    %cst_80 = arith.constant 9.99999974E-6 : f32
    %223 = vector.broadcast %cst_80 : f32 to vector<16x1xf32>
    %224 = arith.addf %220, %223 : vector<16x1xf32>
    %225 = math.rsqrt %224 : vector<16x1xf32>
    %226 = vector.broadcast %225 : vector<16x1xf32> to vector<16x16xf32>
    %227 = arith.mulf %222, %226 : vector<16x16xf32>
    %228 = vector.broadcast %208 : vector<1x16xf32> to vector<16x16xf32>
    %229 = arith.mulf %227, %228 : vector<16x16xf32>
    %230 = vector.broadcast %209 : vector<1x16xf32> to vector<16x16xf32>
    %231 = arith.addf %229, %230 : vector<16x16xf32>
    %232 = arith.truncf %231 : vector<16x16xf32> to vector<16x16xbf16>
    %c0_81 = arith.constant 0 : index
    %c0_82 = arith.constant 0 : index
    %233 = vector.load %arg22[%c0_81, %c0_82] : memref<16x32xbf16, #tpu.memory_space<vmem>>, vector<16x32xbf16>
    %cst_83 = arith.constant dense<0.000000e+00> : vector<16x32xf32>
    %234 = tpu.matmul %232, %233, %cst_83 {dimension_numbers = #tpu.dot_dimension_numbers<[1], [0], [0], [1], [0, 0, 1, 1], [], []>} : vector<16x16xbf16>, vector<16x32xbf16>, vector<16x32xf32> -> vector<16x32xf32>
    %c0_84 = arith.constant 0 : index
    %c0_85 = arith.constant 0 : index
    %235 = vector.load %arg23[%c0_84, %c0_85] : memref<1x32xf32, #tpu.memory_space<vmem>>, vector<1x32xf32>
    %236 = vector.broadcast %235 : vector<1x32xf32> to vector<16x32xf32>
    %237 = arith.addf %234, %236 : vector<16x32xf32>
    %238 = arith.mulf %237, %237 : vector<16x32xf32>
    %239 = arith.mulf %237, %238 : vector<16x32xf32>
    %cst_86 = arith.constant 4.471500e-02 : f32
    %240 = vector.broadcast %cst_86 : f32 to vector<16x32xf32>
    %241 = arith.mulf %240, %239 : vector<16x32xf32>
    %242 = arith.addf %237, %241 : vector<16x32xf32>
    %cst_87 = arith.constant 0.797884583 : f32
    %243 = vector.broadcast %cst_87 : f32 to vector<16x32xf32>
    %244 = arith.mulf %243, %242 : vector<16x32xf32>
    %245 = math.tanh %244 : vector<16x32xf32>
    %cst_88 = arith.constant 1.000000e+00 : f32
    %246 = vector.broadcast %cst_88 : f32 to vector<16x32xf32>
    %247 = arith.addf %246, %245 : vector<16x32xf32>
    %cst_89 = arith.constant 5.000000e-01 : f32
    %248 = vector.broadcast %cst_89 : f32 to vector<16x32xf32>
    %249 = arith.mulf %248, %247 : vector<16x32xf32>
    %250 = arith.mulf %237, %249 : vector<16x32xf32>
    %251 = arith.truncf %250 : vector<16x32xf32> to vector<16x32xbf16>
    %c0_90 = arith.constant 0 : index
    %c0_91 = arith.constant 0 : index
    %252 = vector.load %arg24[%c0_90, %c0_91] : memref<32x16xbf16, #tpu.memory_space<vmem>>, vector<32x16xbf16>
    %cst_92 = arith.constant dense<0.000000e+00> : vector<16x16xf32>
    %253 = tpu.matmul %251, %252, %cst_92 {dimension_numbers = #tpu.dot_dimension_numbers<[1], [0], [0], [1], [0, 0, 1, 1], [], []>} : vector<16x32xbf16>, vector<32x16xbf16>, vector<16x16xf32> -> vector<16x16xf32>
    %c0_93 = arith.constant 0 : index
    %c0_94 = arith.constant 0 : index
    %254 = vector.load %arg25[%c0_93, %c0_94] : memref<1x16xf32, #tpu.memory_space<vmem>>, vector<1x16xf32>
    %255 = vector.broadcast %254 : vector<1x16xf32> to vector<16x16xf32>
    %256 = arith.addf %253, %255 : vector<16x16xf32>
    %257 = arith.addf %207, %256 : vector<16x16xf32>
    %c0_95 = arith.constant 0 : index
    %c0_96 = arith.constant 0 : index
    %258 = vector.load %arg26[%c0_95, %c0_96] : memref<1x16xf32, #tpu.memory_space<vmem>>, vector<1x16xf32>
    %c0_97 = arith.constant 0 : index
    %c0_98 = arith.constant 0 : index
    %259 = vector.load %arg27[%c0_97, %c0_98] : memref<1x16xf32, #tpu.memory_space<vmem>>, vector<1x16xf32>
    %cst_99 = arith.constant dense<0.000000e+00> : vector<16xf32>
    %260 = vector.multi_reduction <add>, %257, %cst_99 [1] : vector<16x16xf32> to vector<16xf32>
    %261 = vector.shape_cast %260 : vector<16xf32> to vector<16x1xf32>
    %cst_100 = arith.constant 1.600000e+01 : f32
    %262 = vector.broadcast %cst_100 : f32 to vector<16x1xf32>
    %263 = arith.divf %261, %262 : vector<16x1xf32>
    %264 = vector.broadcast %263 : vector<16x1xf32> to vector<16x16xf32>
    %265 = arith.subf %257, %264 : vector<16x16xf32>
    %266 = arith.mulf %265, %265 : vector<16x16xf32>
    %cst_101 = arith.constant dense<0.000000e+00> : vector<16xf32>
    %267 = vector.multi_reduction <add>, %266, %cst_101 [1] : vector<16x16xf32> to vector<16xf32>
    %268 = vector.shape_cast %267 : vector<16xf32> to vector<16x1xf32>
    %cst_102 = arith.constant 1.600000e+01 : f32
    %269 = vector.broadcast %cst_102 : f32 to vector<16x1xf32>
    %270 = arith.divf %268, %269 : vector<16x1xf32>
    %271 = vector.broadcast %263 : vector<16x1xf32> to vector<16x16xf32>
    %272 = arith.subf %257, %271 : vector<16x16xf32>
    %cst_103 = arith.constant 9.99999974E-6 : f32
    %273 = vector.broadcast %cst_103 : f32 to vector<16x1xf32>
    %274 = arith.addf %270, %273 : vector<16x1xf32>
    %275 = math.rsqrt %274 : vector<16x1xf32>
    %276 = vector.broadcast %275 : vector<16x1xf32> to vector<16x16xf32>
    %277 = arith.mulf %272, %276 : vector<16x16xf32>
    %278 = vector.broadcast %258 : vector<1x16xf32> to vector<16x16xf32>
    %279 = arith.mulf %277, %278 : vector<16x16xf32>
    %280 = vector.broadcast %259 : vector<1x16xf32> to vector<16x16xf32>
    %281 = arith.addf %279, %280 : vector<16x16xf32>
    %282 = vector.extract_strided_slice %281 {offsets = [0, 0], sizes = [12, 16], strides = [1, 1]} : vector<16x16xf32> to vector<12x16xf32>
    %283 = arith.truncf %282 : vector<12x16xf32> to vector<12x16xbf16>
    %c0_104 = arith.constant 0 : index
    %c0_105 = arith.constant 0 : index
    %284 = vector.load %arg28[%c0_104, %c0_105] : memref<16x64xbf16, #tpu.memory_space<vmem>>, vector<16x64xbf16>
    %cst_106 = arith.constant dense<0.000000e+00> : vector<12x64xf32>
    %285 = tpu.matmul %283, %284, %cst_106 {dimension_numbers = #tpu.dot_dimension_numbers<[1], [0], [0], [1], [0, 0, 1, 1], [], []>} : vector<12x16xbf16>, vector<16x64xbf16>, vector<12x64xf32> -> vector<12x64xf32>
    %c0_107 = arith.constant 0 : index
    %c0_108 = arith.constant 0 : index
    %286 = vector.load %arg29[%c0_107, %c0_108] : memref<1x64xf32, #tpu.memory_space<vmem>>, vector<1x64xf32>
    %287 = vector.broadcast %286 : vector<1x64xf32> to vector<12x64xf32>
    %288 = arith.addf %285, %287 : vector<12x64xf32>
    %289 = arith.negf %288 : vector<12x64xf32>
    %290 = math.exp %289 : vector<12x64xf32>
    %cst_109 = arith.constant 1.000000e+00 : f32
    %291 = vector.broadcast %cst_109 : f32 to vector<12x64xf32>
    %292 = arith.addf %291, %290 : vector<12x64xf32>
    %293 = arith.divf %291, %292 : vector<12x64xf32>
    %c0_110 = arith.constant 0 : index
    %c0_111 = arith.constant 0 : index
    %c0_112 = arith.constant 0 : index
    %294 = vector.load %arg30[%c0_110, %c0_111, %c0_112] : memref<1x12x64xf32, #tpu.memory_space<vmem>>, vector<1x12x64xf32>
    %295 = vector.shape_cast %294 : vector<1x12x64xf32> to vector<12x64xf32>
    %296 = vector.shape_cast %293 : vector<12x64xf32> to vector<1x12x64xf32>
    tpu.vector_store %arg30[%c0_110, %c0_111, %c0_112], %296 {strides = array<i32>} : memref<1x12x64xf32, #tpu.memory_space<vmem>>, vector<1x12x64xf32>,
    return
  }
  func.func @transform_0(%arg0: i32) -> (i32, i32, i32) {
    %c0_i32 = arith.constant 0 : i32
    %c0_i32_0 = arith.constant 0 : i32
    %c0_i32_1 = arith.constant 0 : i32
    return %arg0, %c0_i32, %c0_i32_0 : i32, i32, i32
  }
  func.func @transform_1(%arg0: i32) -> (i32, i32) {
    %c0_i32 = arith.constant 0 : i32
    %c0_i32_0 = arith.constant 0 : i32
    %c0_i32_1 = arith.constant 0 : i32
    return %c0_i32, %c0_i32_0 : i32, i32
  }
  func.func @transform_2(%arg0: i32) -> (i32, i32) {
    %c0_i32 = arith.constant 0 : i32
    %c0_i32_0 = arith.constant 0 : i32
    %c0_i32_1 = arith.constant 0 : i32
    return %c0_i32, %c0_i32_0 : i32, i32
  }
  func.func @transform_3(%arg0: i32) -> (i32, i32) {
    %c0_i32 = arith.constant 0 : i32
    %c0_i32_0 = arith.constant 0 : i32
    %c0_i32_1 = arith.constant 0 : i32
    return %c0_i32, %c0_i32_0 : i32, i32
  }
  func.func @transform_4(%arg0: i32) -> (i32, i32) {
    %c0_i32 = arith.constant 0 : i32
    %c0_i32_0 = arith.constant 0 : i32
    %c0_i32_1 = arith.constant 0 : i32
    return %c0_i32, %c0_i32_0 : i32, i32
  }
  func.func @transform_5(%arg0: i32) -> (i32, i32) {
    %c0_i32 = arith.constant 0 : i32
    %c0_i32_0 = arith.constant 0 : i32
    %c0_i32_1 = arith.constant 0 : i32
    return %c0_i32, %c0_i32_0 : i32, i32
  }
  func.func @transform_6(%arg0: i32) -> (i32, i32) {
    %c0_i32 = arith.constant 0 : i32
    %c0_i32_0 = arith.constant 0 : i32
    %c0_i32_1 = arith.constant 0 : i32
    return %c0_i32, %c0_i32_0 : i32, i32
  }
  func.func @transform_7(%arg0: i32) -> (i32, i32) {
    %c0_i32 = arith.constant 0 : i32
    %c0_i32_0 = arith.constant 0 : i32
    %c0_i32_1 = arith.constant 0 : i32
    return %c0_i32, %c0_i32_0 : i32, i32
  }
  func.func @transform_8(%arg0: i32) -> (i32, i32) {
    %c0_i32 = arith.constant 0 : i32
    %c0_i32_0 = arith.constant 0 : i32
    %c0_i32_1 = arith.constant 0 : i32
    return %c0_i32, %c0_i32_0 : i32, i32
  }
  func.func @transform_9(%arg0: i32) -> (i32, i32) {
    %c0_i32 = arith.constant 0 : i32
    %c0_i32_0 = arith.constant 0 : i32
    %c0_i32_1 = arith.constant 0 : i32
    return %c0_i32, %c0_i32_0 : i32, i32
  }
  func.func @transform_10(%arg0: i32) -> (i32, i32) {
    %c0_i32 = arith.constant 0 : i32
    %c0_i32_0 = arith.constant 0 : i32
    %c0_i32_1 = arith.constant 0 : i32
    return %c0_i32, %c0_i32_0 : i32, i32
  }
  func.func @transform_11(%arg0: i32) -> (i32, i32) {
    %c0_i32 = arith.constant 0 : i32
    %c0_i32_0 = arith.constant 0 : i32
    %c0_i32_1 = arith.constant 0 : i32
    return %c0_i32, %c0_i32_0 : i32, i32
  }
  func.func @transform_12(%arg0: i32) -> (i32, i32) {
    %c0_i32 = arith.constant 0 : i32
    %c0_i32_0 = arith.constant 0 : i32
    %c0_i32_1 = arith.constant 0 : i32
    return %c0_i32, %c0_i32_0 : i32, i32
  }
  func.func @transform_13(%arg0: i32) -> (i32, i32) {
    %c0_i32 = arith.constant 0 : i32
    %c0_i32_0 = arith.constant 0 : i32
    %c0_i32_1 = arith.constant 0 : i32
    return %c0_i32, %c0_i32_0 : i32, i32
  }
  func.func @transform_14(%arg0: i32) -> (i32, i32) {
    %c0_i32 = arith.constant 0 : i32
    %c0_i32_0 = arith.constant 0 : i32
    %c0_i32_1 = arith.constant 0 : i32
    return %c0_i32, %c0_i32_0 : i32, i32
  }
  func.func @transform_15(%arg0: i32) -> (i32, i32) {
    %c0_i32 = arith.constant 0 : i32
    %c0_i32_0 = arith.constant 0 : i32
    %c0_i32_1 = arith.constant 0 : i32
    return %c0_i32, %c0_i32_0 : i32, i32
  }
  func.func @transform_16(%arg0: i32) -> (i32, i32) {
    %c0_i32 = arith.constant 0 : i32
    %c0_i32_0 = arith.constant 0 : i32
    %c0_i32_1 = arith.constant 0 : i32
    return %c0_i32, %c0_i32_0 : i32, i32
  }
  func.func @transform_17(%arg0: i32) -> (i32, i32) {
    %c0_i32 = arith.constant 0 : i32
    %c0_i32_0 = arith.constant 0 : i32
    %c0_i32_1 = arith.constant 0 : i32
    return %c0_i32, %c0_i32_0 : i32, i32
  }
  func.func @transform_18(%arg0: i32) -> (i32, i32) {
    %c0_i32 = arith.constant 0 : i32
    %c0_i32_0 = arith.constant 0 : i32
    %c0_i32_1 = arith.constant 0 : i32
    return %c0_i32, %c0_i32_0 : i32, i32
  }
  func.func @transform_19(%arg0: i32) -> (i32, i32) {
    %c0_i32 = arith.constant 0 : i32
    %c0_i32_0 = arith.constant 0 : i32
    %c0_i32_1 = arith.constant 0 : i32
    return %c0_i32, %c0_i32_0 : i32, i32
  }
  func.func @transform_20(%arg0: i32) -> (i32, i32) {
    %c0_i32 = arith.constant 0 : i32
    %c0_i32_0 = arith.constant 0 : i32
    %c0_i32_1 = arith.constant 0 : i32
    return %c0_i32, %c0_i32_0 : i32, i32
  }
  func.func @transform_21(%arg0: i32) -> (i32, i32) {
    %c0_i32 = arith.constant 0 : i32
    %c0_i32_0 = arith.constant 0 : i32
    %c0_i32_1 = arith.constant 0 : i32
    return %c0_i32, %c0_i32_0 : i32, i32
  }
  func.func @transform_22(%arg0: i32) -> (i32, i32) {
    %c0_i32 = arith.constant 0 : i32
    %c0_i32_0 = arith.constant 0 : i32
    %c0_i32_1 = arith.constant 0 : i32
    return %c0_i32, %c0_i32_0 : i32, i32
  }
  func.func @transform_23(%arg0: i32) -> (i32, i32) {
    %c0_i32 = arith.constant 0 : i32
    %c0_i32_0 = arith.constant 0 : i32
    %c0_i32_1 = arith.constant 0 : i32
    return %c0_i32, %c0_i32_0 : i32, i32
  }
  func.func @transform_24(%arg0: i32) -> (i32, i32) {
    %c0_i32 = arith.constant 0 : i32
    %c0_i32_0 = arith.constant 0 : i32
    %c0_i32_1 = arith.constant 0 : i32
    return %c0_i32, %c0_i32_0 : i32, i32
  }
  func.func @transform_25(%arg0: i32) -> (i32, i32) {
    %c0_i32 = arith.constant 0 : i32
    %c0_i32_0 = arith.constant 0 : i32
    %c0_i32_1 = arith.constant 0 : i32
    return %c0_i32, %c0_i32_0 : i32, i32
  }
  func.func @transform_26(%arg0: i32) -> (i32, i32) {
    %c0_i32 = arith.constant 0 : i32
    %c0_i32_0 = arith.constant 0 : i32
    %c0_i32_1 = arith.constant 0 : i32
    return %c0_i32, %c0_i32_0 : i32, i32
  }
  func.func @transform_27(%arg0: i32) -> (i32, i32) {
    %c0_i32 = arith.constant 0 : i32
    %c0_i32_0 = arith.constant 0 : i32
    %c0_i32_1 = arith.constant 0 : i32
    return %c0_i32, %c0_i32_0 : i32, i32
  }
  func.func @transform_28(%arg0: i32) -> (i32, i32) {
    %c0_i32 = arith.constant 0 : i32
    %c0_i32_0 = arith.constant 0 : i32
    %c0_i32_1 = arith.constant 0 : i32
    return %c0_i32, %c0_i32_0 : i32, i32
  }
  func.func @transform_29(%arg0: i32) -> (i32, i32, i32) {
    %c0_i32 = arith.constant 0 : i32
    %c0_i32_0 = arith.constant 0 : i32
    %c0_i32_1 = arith.constant 0 : i32
    return %arg0, %c0_i32, %c0_i32_0 : i32, i32, i32
  }
}

module attributes {stable_mosaic.version = 11 : i64} {
  func.func @_encoder_kernel(%arg0: i32, %arg1: memref<1x4x64xf32, #tpu.memory_space<vmem>>, %arg2: memref<1x4x32xf32, #tpu.memory_space<vmem>>, %arg3: memref<64x32xbf16, #tpu.memory_space<vmem>>, %arg4: memref<1x32xf32, #tpu.memory_space<vmem>>, %arg5: memref<1x32xf32, #tpu.memory_space<vmem>>, %arg6: memref<1x32xf32, #tpu.memory_space<vmem>>, %arg7: memref<32x96xbf16, #tpu.memory_space<vmem>>, %arg8: memref<1x96xf32, #tpu.memory_space<vmem>>, %arg9: memref<32x32xbf16, #tpu.memory_space<vmem>>, %arg10: memref<1x32xf32, #tpu.memory_space<vmem>>, %arg11: memref<1x32xf32, #tpu.memory_space<vmem>>, %arg12: memref<1x32xf32, #tpu.memory_space<vmem>>, %arg13: memref<32x64xbf16, #tpu.memory_space<vmem>>, %arg14: memref<1x64xf32, #tpu.memory_space<vmem>>, %arg15: memref<64x32xbf16, #tpu.memory_space<vmem>>, %arg16: memref<1x32xf32, #tpu.memory_space<vmem>>, %arg17: memref<1x32xf32, #tpu.memory_space<vmem>>, %arg18: memref<1x32xf32, #tpu.memory_space<vmem>>, %arg19: memref<32x96xbf16, #tpu.memory_space<vmem>>, %arg20: memref<1x96xf32, #tpu.memory_space<vmem>>, %arg21: memref<32x32xbf16, #tpu.memory_space<vmem>>, %arg22: memref<1x32xf32, #tpu.memory_space<vmem>>, %arg23: memref<1x32xf32, #tpu.memory_space<vmem>>, %arg24: memref<1x32xf32, #tpu.memory_space<vmem>>, %arg25: memref<32x64xbf16, #tpu.memory_space<vmem>>, %arg26: memref<1x64xf32, #tpu.memory_space<vmem>>, %arg27: memref<64x32xbf16, #tpu.memory_space<vmem>>, %arg28: memref<1x32xf32, #tpu.memory_space<vmem>>, %arg29: memref<1x32xf32, #tpu.memory_space<vmem>>, %arg30: memref<1x32xf32, #tpu.memory_space<vmem>>, %arg31: memref<32x16xbf16, #tpu.memory_space<vmem>>, %arg32: memref<1x16xf32, #tpu.memory_space<vmem>>, %arg33: memref<1x4x16xf32, #tpu.memory_space<vmem>>) attributes {dimension_semantics = [#tpu.dimension_semantics<parallel>], iteration_bounds = array<i64: 2>, scalar_prefetch = 0 : i64, scratch_operands = 0 : i64, tpu.core_type = #tpu.core_type<tc>, window_params = [{transform_indices = @transform_0, window_bounds = array<i64: 1, 4, 64>}, {transform_indices = @transform_1, window_bounds = array<i64: 1, 4, 32>}, {pipeline_mode = #tpu.pipeline_mode<synchronous>, transform_indices = @transform_2, window_bounds = array<i64: 64, 32>}, {pipeline_mode = #tpu.pipeline_mode<synchronous>, transform_indices = @transform_3, window_bounds = array<i64: 1, 32>}, {pipeline_mode = #tpu.pipeline_mode<synchronous>, transform_indices = @transform_4, window_bounds = array<i64: 1, 32>}, {pipeline_mode = #tpu.pipeline_mode<synchronous>, transform_indices = @transform_5, window_bounds = array<i64: 1, 32>}, {pipeline_mode = #tpu.pipeline_mode<synchronous>, transform_indices = @transform_6, window_bounds = array<i64: 32, 96>}, {pipeline_mode = #tpu.pipeline_mode<synchronous>, transform_indices = @transform_7, window_bounds = array<i64: 1, 96>}, {pipeline_mode = #tpu.pipeline_mode<synchronous>, transform_indices = @transform_8, window_bounds = array<i64: 32, 32>}, {pipeline_mode = #tpu.pipeline_mode<synchronous>, transform_indices = @transform_9, window_bounds = array<i64: 1, 32>}, {pipeline_mode = #tpu.pipeline_mode<synchronous>, transform_indices = @transform_10, window_bounds = array<i64: 1, 32>}, {pipeline_mode = #tpu.pipeline_mode<synchronous>, transform_indices = @transform_11, window_bounds = array<i64: 1, 32>}, {pipeline_mode = #tpu.pipeline_mode<synchronous>, transform_indices = @transform_12, window_bounds = array<i64: 32, 64>}, {pipeline_mode = #tpu.pipeline_mode<synchronous>, transform_indices = @transform_13, window_bounds = array<i64: 1, 64>}, {pipeline_mode = #tpu.pipeline_mode<synchronous>, transform_indices = @transform_14, window_bounds = array<i64: 64, 32>}, {pipeline_mode = #tpu.pipeline_mode<synchronous>, transform_indices = @transform_15, window_bounds = array<i64: 1, 32>}, {pipeline_mode = #tpu.pipeline_mode<synchronous>, transform_indices = @transform_16, window_bounds = array<i64: 1, 32>}, {pipeline_mode = #tpu.pipeline_mode<synchronous>, transform_indices = @transform_17, window_bounds = array<i64: 1, 32>}, {pipeline_mode = #tpu.pipeline_mode<synchronous>, transform_indices = @transform_18, window_bounds = array<i64: 32, 96>}, {pipeline_mode = #tpu.pipeline_mode<synchronous>, transform_indices = @transform_19, window_bounds = array<i64: 1, 96>}, {pipeline_mode = #tpu.pipeline_mode<synchronous>, transform_indices = @transform_20, window_bounds = array<i64: 32, 32>}, {pipeline_mode = #tpu.pipeline_mode<synchronous>, transform_indices = @transform_21, window_bounds = array<i64: 1, 32>}, {pipeline_mode = #tpu.pipeline_mode<synchronous>, transform_indices = @transform_22, window_bounds = array<i64: 1, 32>}, {pipeline_mode = #tpu.pipeline_mode<synchronous>, transform_indices = @transform_23, window_bounds = array<i64: 1, 32>}, {pipeline_mode = #tpu.pipeline_mode<synchronous>, transform_indices = @transform_24, window_bounds = array<i64: 32, 64>}, {pipeline_mode = #tpu.pipeline_mode<synchronous>, transform_indices = @transform_25, window_bounds = array<i64: 1, 64>}, {pipeline_mode = #tpu.pipeline_mode<synchronous>, transform_indices = @transform_26, window_bounds = array<i64: 64, 32>}, {pipeline_mode = #tpu.pipeline_mode<synchronous>, transform_indices = @transform_27, window_bounds = array<i64: 1, 32>}, {pipeline_mode = #tpu.pipeline_mode<synchronous>, transform_indices = @transform_28, window_bounds = array<i64: 1, 32>}, {pipeline_mode = #tpu.pipeline_mode<synchronous>, transform_indices = @transform_29, window_bounds = array<i64: 1, 32>}, {pipeline_mode = #tpu.pipeline_mode<synchronous>, transform_indices = @transform_30, window_bounds = array<i64: 32, 16>}, {pipeline_mode = #tpu.pipeline_mode<synchronous>, transform_indices = @transform_31, window_bounds = array<i64: 1, 16>}, {transform_indices = @transform_32, window_bounds = array<i64: 1, 4, 16>}]} {
    %c0 = arith.constant 0 : index
    %c0_0 = arith.constant 0 : index
    %c0_1 = arith.constant 0 : index
    %0 = vector.load %arg1[%c0, %c0_0, %c0_1] : memref<1x4x64xf32, #tpu.memory_space<vmem>>, vector<1x4x64xf32>
    %1 = vector.shape_cast %0 : vector<1x4x64xf32> to vector<4x64xf32>
    %2 = arith.truncf %1 : vector<4x64xf32> to vector<4x64xbf16>
    %c0_2 = arith.constant 0 : index
    %c0_3 = arith.constant 0 : index
    %3 = vector.load %arg3[%c0_2, %c0_3] : memref<64x32xbf16, #tpu.memory_space<vmem>>, vector<64x32xbf16>
    %cst = arith.constant dense<0.000000e+00> : vector<4x32xf32>
    %4 = tpu.matmul %2, %3, %cst {dimension_numbers = #tpu.dot_dimension_numbers<[1], [0], [0], [1], [0, 0, 1, 1], [], []>} : vector<4x64xbf16>, vector<64x32xbf16>, vector<4x32xf32> -> vector<4x32xf32>
    %c0_4 = arith.constant 0 : index
    %c0_5 = arith.constant 0 : index
    %5 = vector.load %arg4[%c0_4, %c0_5] : memref<1x32xf32, #tpu.memory_space<vmem>>, vector<1x32xf32>
    %6 = vector.broadcast %5 : vector<1x32xf32> to vector<4x32xf32>
    %7 = arith.addf %4, %6 : vector<4x32xf32>
    %c0_6 = arith.constant 0 : index
    %c0_7 = arith.constant 0 : index
    %c0_8 = arith.constant 0 : index
    %8 = vector.load %arg2[%c0_6, %c0_7, %c0_8] : memref<1x4x32xf32, #tpu.memory_space<vmem>>, vector<1x4x32xf32>
    %9 = vector.shape_cast %8 : vector<1x4x32xf32> to vector<4x32xf32>
    %10 = arith.addf %7, %9 : vector<4x32xf32>
    %c0_9 = arith.constant 0 : index
    %c0_10 = arith.constant 0 : index
    %11 = vector.load %arg5[%c0_9, %c0_10] : memref<1x32xf32, #tpu.memory_space<vmem>>, vector<1x32xf32>
    %c0_11 = arith.constant 0 : index
    %c0_12 = arith.constant 0 : index
    %12 = vector.load %arg6[%c0_11, %c0_12] : memref<1x32xf32, #tpu.memory_space<vmem>>, vector<1x32xf32>
    %cst_13 = arith.constant dense<0.000000e+00> : vector<4xf32>
    %13 = vector.multi_reduction <add>, %10, %cst_13 [1] : vector<4x32xf32> to vector<4xf32>
    %14 = vector.shape_cast %13 : vector<4xf32> to vector<4x1xf32>
    %cst_14 = arith.constant 3.200000e+01 : f32
    %15 = vector.broadcast %cst_14 : f32 to vector<4x1xf32>
    %16 = arith.divf %14, %15 : vector<4x1xf32>
    %17 = vector.broadcast %16 : vector<4x1xf32> to vector<4x32xf32>
    %18 = arith.subf %10, %17 : vector<4x32xf32>
    %19 = arith.mulf %18, %18 : vector<4x32xf32>
    %cst_15 = arith.constant dense<0.000000e+00> : vector<4xf32>
    %20 = vector.multi_reduction <add>, %19, %cst_15 [1] : vector<4x32xf32> to vector<4xf32>
    %21 = vector.shape_cast %20 : vector<4xf32> to vector<4x1xf32>
    %cst_16 = arith.constant 3.200000e+01 : f32
    %22 = vector.broadcast %cst_16 : f32 to vector<4x1xf32>
    %23 = arith.divf %21, %22 : vector<4x1xf32>
    %24 = vector.broadcast %16 : vector<4x1xf32> to vector<4x32xf32>
    %25 = arith.subf %10, %24 : vector<4x32xf32>
    %cst_17 = arith.constant 9.99999974E-6 : f32
    %26 = vector.broadcast %cst_17 : f32 to vector<4x1xf32>
    %27 = arith.addf %23, %26 : vector<4x1xf32>
    %28 = math.rsqrt %27 : vector<4x1xf32>
    %29 = vector.broadcast %28 : vector<4x1xf32> to vector<4x32xf32>
    %30 = arith.mulf %25, %29 : vector<4x32xf32>
    %31 = vector.broadcast %11 : vector<1x32xf32> to vector<4x32xf32>
    %32 = arith.mulf %30, %31 : vector<4x32xf32>
    %33 = vector.broadcast %12 : vector<1x32xf32> to vector<4x32xf32>
    %34 = arith.addf %32, %33 : vector<4x32xf32>
    %35 = arith.truncf %34 : vector<4x32xf32> to vector<4x32xbf16>
    %c0_18 = arith.constant 0 : index
    %c0_19 = arith.constant 0 : index
    %36 = vector.load %arg7[%c0_18, %c0_19] : memref<32x96xbf16, #tpu.memory_space<vmem>>, vector<32x96xbf16>
    %cst_20 = arith.constant dense<0.000000e+00> : vector<4x96xf32>
    %37 = tpu.matmul %35, %36, %cst_20 {dimension_numbers = #tpu.dot_dimension_numbers<[1], [0], [0], [1], [0, 0, 1, 1], [], []>} : vector<4x32xbf16>, vector<32x96xbf16>, vector<4x96xf32> -> vector<4x96xf32>
    %c0_21 = arith.constant 0 : index
    %c0_22 = arith.constant 0 : index
    %38 = vector.load %arg8[%c0_21, %c0_22] : memref<1x96xf32, #tpu.memory_space<vmem>>, vector<1x96xf32>
    %39 = vector.broadcast %38 : vector<1x96xf32> to vector<4x96xf32>
    %40 = arith.addf %37, %39 : vector<4x96xf32>
    %41 = vector.extract_strided_slice %40 {offsets = [0, 0], sizes = [4, 32], strides = [1, 1]} : vector<4x96xf32> to vector<4x32xf32>
    %cst_23 = arith.constant 0.353553385 : f32
    %42 = vector.broadcast %cst_23 : f32 to vector<4x32xf32>
    %43 = arith.mulf %41, %42 : vector<4x32xf32>
    %44 = vector.extract_strided_slice %40 {offsets = [0, 32], sizes = [4, 32], strides = [1, 1]} : vector<4x96xf32> to vector<4x32xf32>
    %45 = vector.extract_strided_slice %40 {offsets = [0, 64], sizes = [4, 32], strides = [1, 1]} : vector<4x96xf32> to vector<4x32xf32>
    %46 = vector.extract_strided_slice %43 {offsets = [0, 0], sizes = [4, 8], strides = [1, 1]} : vector<4x32xf32> to vector<4x8xf32>
    %47 = vector.extract_strided_slice %43 {offsets = [0, 8], sizes = [4, 8], strides = [1, 1]} : vector<4x32xf32> to vector<4x8xf32>
    %48 = vector.extract_strided_slice %43 {offsets = [0, 16], sizes = [4, 8], strides = [1, 1]} : vector<4x32xf32> to vector<4x8xf32>
    %49 = vector.extract_strided_slice %43 {offsets = [0, 24], sizes = [4, 8], strides = [1, 1]} : vector<4x32xf32> to vector<4x8xf32>
    %50 = vector.shape_cast %46 : vector<4x8xf32> to vector<1x4x8xf32>
    %51 = vector.shape_cast %47 : vector<4x8xf32> to vector<1x4x8xf32>
    %52 = vector.shape_cast %48 : vector<4x8xf32> to vector<1x4x8xf32>
    %53 = vector.shape_cast %49 : vector<4x8xf32> to vector<1x4x8xf32>
    %54 = tpu.concatenate %50, %51, %52, %53 in 0 : vector<1x4x8xf32>, vector<1x4x8xf32>, vector<1x4x8xf32>, vector<1x4x8xf32> -> vector<4x4x8xf32>
    %55 = arith.truncf %54 : vector<4x4x8xf32> to vector<4x4x8xbf16>
    %56 = vector.extract_strided_slice %44 {offsets = [0, 0], sizes = [4, 8], strides = [1, 1]} : vector<4x32xf32> to vector<4x8xf32>
    %57 = vector.extract_strided_slice %44 {offsets = [0, 8], sizes = [4, 8], strides = [1, 1]} : vector<4x32xf32> to vector<4x8xf32>
    %58 = vector.extract_strided_slice %44 {offsets = [0, 16], sizes = [4, 8], strides = [1, 1]} : vector<4x32xf32> to vector<4x8xf32>
    %59 = vector.extract_strided_slice %44 {offsets = [0, 24], sizes = [4, 8], strides = [1, 1]} : vector<4x32xf32> to vector<4x8xf32>
    %60 = vector.shape_cast %56 : vector<4x8xf32> to vector<1x4x8xf32>
    %61 = vector.shape_cast %57 : vector<4x8xf32> to vector<1x4x8xf32>
    %62 = vector.shape_cast %58 : vector<4x8xf32> to vector<1x4x8xf32>
    %63 = vector.shape_cast %59 : vector<4x8xf32> to vector<1x4x8xf32>
    %64 = tpu.concatenate %60, %61, %62, %63 in 0 : vector<1x4x8xf32>, vector<1x4x8xf32>, vector<1x4x8xf32>, vector<1x4x8xf32> -> vector<4x4x8xf32>
    %65 = arith.truncf %64 : vector<4x4x8xf32> to vector<4x4x8xbf16>
    %66 = vector.extract_strided_slice %45 {offsets = [0, 0], sizes = [4, 8], strides = [1, 1]} : vector<4x32xf32> to vector<4x8xf32>
    %67 = vector.extract_strided_slice %45 {offsets = [0, 8], sizes = [4, 8], strides = [1, 1]} : vector<4x32xf32> to vector<4x8xf32>
    %68 = vector.extract_strided_slice %45 {offsets = [0, 16], sizes = [4, 8], strides = [1, 1]} : vector<4x32xf32> to vector<4x8xf32>
    %69 = vector.extract_strided_slice %45 {offsets = [0, 24], sizes = [4, 8], strides = [1, 1]} : vector<4x32xf32> to vector<4x8xf32>
    %70 = vector.shape_cast %66 : vector<4x8xf32> to vector<1x4x8xf32>
    %71 = vector.shape_cast %67 : vector<4x8xf32> to vector<1x4x8xf32>
    %72 = vector.shape_cast %68 : vector<4x8xf32> to vector<1x4x8xf32>
    %73 = vector.shape_cast %69 : vector<4x8xf32> to vector<1x4x8xf32>
    %74 = tpu.concatenate %70, %71, %72, %73 in 0 : vector<1x4x8xf32>, vector<1x4x8xf32>, vector<1x4x8xf32>, vector<1x4x8xf32> -> vector<4x4x8xf32>
    %75 = arith.truncf %74 : vector<4x4x8xf32> to vector<4x4x8xbf16>
    "tpu.trace_start"() <{level = 10 : i32, message = "hqc,hkc->hqk"}> : () -> ()
    %cst_24 = arith.constant dense<0.000000e+00> : vector<4x4x4xf32>
    %76 = tpu.matmul %55, %65, %cst_24 {dimension_numbers = #tpu.dot_dimension_numbers<[2], [2], [1], [1], [0, 0, 0, 1, 1, 1], [0], [0]>} : vector<4x4x8xbf16>, vector<4x4x8xbf16>, vector<4x4x4xf32> -> vector<4x4x4xf32>
    "tpu.trace_stop"() : () -> ()
    %cst_25 = arith.constant dense<0xFF800000> : vector<4x4xf32>
    %77 = vector.multi_reduction <maximumf>, %76, %cst_25 [2] : vector<4x4x4xf32> to vector<4x4xf32>
    %78 = vector.shape_cast %77 : vector<4x4xf32> to vector<4x4x1xf32>
    %79 = vector.broadcast %78 : vector<4x4x1xf32> to vector<4x4x4xf32>
    %80 = arith.subf %76, %79 : vector<4x4x4xf32>
    %81 = math.exp %80 : vector<4x4x4xf32>
    %cst_26 = arith.constant dense<0.000000e+00> : vector<4x4xf32>
    %82 = vector.multi_reduction <add>, %81, %cst_26 [2] : vector<4x4x4xf32> to vector<4x4xf32>
    %83 = vector.shape_cast %82 : vector<4x4xf32> to vector<4x4x1xf32>
    %84 = tpu.reciprocal %83 {approx = true} : vector<4x4x1xf32> -> vector<4x4x1xf32>
    %85 = vector.broadcast %84 : vector<4x4x1xf32> to vector<4x4x4xf32>
    %86 = arith.mulf %81, %85 : vector<4x4x4xf32>
    %87 = arith.truncf %86 : vector<4x4x4xf32> to vector<4x4x4xbf16>
    "tpu.trace_start"() <{level = 10 : i32, message = "hqk,hkc->hqc"}> : () -> ()
    %cst_27 = arith.constant dense<0.000000e+00> : vector<4x4x8xf32>
    %88 = tpu.matmul %87, %75, %cst_27 {dimension_numbers = #tpu.dot_dimension_numbers<[2], [1], [1], [2], [0, 0, 0, 1, 1, 2], [0], [0]>} : vector<4x4x4xbf16>, vector<4x4x8xbf16>, vector<4x4x8xf32> -> vector<4x4x8xf32>
    "tpu.trace_stop"() : () -> ()
    %89 = vector.extract_strided_slice %88 {offsets = [0, 0, 0], sizes = [1, 4, 8], strides = [1, 1, 1]} : vector<4x4x8xf32> to vector<1x4x8xf32>
    %90 = vector.shape_cast %89 : vector<1x4x8xf32> to vector<4x8xf32>
    %91 = vector.extract_strided_slice %88 {offsets = [1, 0, 0], sizes = [1, 4, 8], strides = [1, 1, 1]} : vector<4x4x8xf32> to vector<1x4x8xf32>
    %92 = vector.shape_cast %91 : vector<1x4x8xf32> to vector<4x8xf32>
    %93 = vector.extract_strided_slice %88 {offsets = [2, 0, 0], sizes = [1, 4, 8], strides = [1, 1, 1]} : vector<4x4x8xf32> to vector<1x4x8xf32>
    %94 = vector.shape_cast %93 : vector<1x4x8xf32> to vector<4x8xf32>
    %95 = vector.extract_strided_slice %88 {offsets = [3, 0, 0], sizes = [1, 4, 8], strides = [1, 1, 1]} : vector<4x4x8xf32> to vector<1x4x8xf32>
    %96 = vector.shape_cast %95 : vector<1x4x8xf32> to vector<4x8xf32>
    %97 = tpu.concatenate %90, %92, %94, %96 in 1 : vector<4x8xf32>, vector<4x8xf32>, vector<4x8xf32>, vector<4x8xf32> -> vector<4x32xf32>
    %98 = arith.truncf %97 : vector<4x32xf32> to vector<4x32xbf16>
    %c0_28 = arith.constant 0 : index
    %c0_29 = arith.constant 0 : index
    %99 = vector.load %arg9[%c0_28, %c0_29] : memref<32x32xbf16, #tpu.memory_space<vmem>>, vector<32x32xbf16>
    %cst_30 = arith.constant dense<0.000000e+00> : vector<4x32xf32>
    %100 = tpu.matmul %98, %99, %cst_30 {dimension_numbers = #tpu.dot_dimension_numbers<[1], [0], [0], [1], [0, 0, 1, 1], [], []>} : vector<4x32xbf16>, vector<32x32xbf16>, vector<4x32xf32> -> vector<4x32xf32>
    %c0_31 = arith.constant 0 : index
    %c0_32 = arith.constant 0 : index
    %101 = vector.load %arg10[%c0_31, %c0_32] : memref<1x32xf32, #tpu.memory_space<vmem>>, vector<1x32xf32>
    %102 = vector.broadcast %101 : vector<1x32xf32> to vector<4x32xf32>
    %103 = arith.addf %100, %102 : vector<4x32xf32>
    %104 = arith.addf %10, %103 : vector<4x32xf32>
    %c0_33 = arith.constant 0 : index
    %c0_34 = arith.constant 0 : index
    %105 = vector.load %arg11[%c0_33, %c0_34] : memref<1x32xf32, #tpu.memory_space<vmem>>, vector<1x32xf32>
    %c0_35 = arith.constant 0 : index
    %c0_36 = arith.constant 0 : index
    %106 = vector.load %arg12[%c0_35, %c0_36] : memref<1x32xf32, #tpu.memory_space<vmem>>, vector<1x32xf32>
    %cst_37 = arith.constant dense<0.000000e+00> : vector<4xf32>
    %107 = vector.multi_reduction <add>, %104, %cst_37 [1] : vector<4x32xf32> to vector<4xf32>
    %108 = vector.shape_cast %107 : vector<4xf32> to vector<4x1xf32>
    %cst_38 = arith.constant 3.200000e+01 : f32
    %109 = vector.broadcast %cst_38 : f32 to vector<4x1xf32>
    %110 = arith.divf %108, %109 : vector<4x1xf32>
    %111 = vector.broadcast %110 : vector<4x1xf32> to vector<4x32xf32>
    %112 = arith.subf %104, %111 : vector<4x32xf32>
    %113 = arith.mulf %112, %112 : vector<4x32xf32>
    %cst_39 = arith.constant dense<0.000000e+00> : vector<4xf32>
    %114 = vector.multi_reduction <add>, %113, %cst_39 [1] : vector<4x32xf32> to vector<4xf32>
    %115 = vector.shape_cast %114 : vector<4xf32> to vector<4x1xf32>
    %cst_40 = arith.constant 3.200000e+01 : f32
    %116 = vector.broadcast %cst_40 : f32 to vector<4x1xf32>
    %117 = arith.divf %115, %116 : vector<4x1xf32>
    %118 = vector.broadcast %110 : vector<4x1xf32> to vector<4x32xf32>
    %119 = arith.subf %104, %118 : vector<4x32xf32>
    %cst_41 = arith.constant 9.99999974E-6 : f32
    %120 = vector.broadcast %cst_41 : f32 to vector<4x1xf32>
    %121 = arith.addf %117, %120 : vector<4x1xf32>
    %122 = math.rsqrt %121 : vector<4x1xf32>
    %123 = vector.broadcast %122 : vector<4x1xf32> to vector<4x32xf32>
    %124 = arith.mulf %119, %123 : vector<4x32xf32>
    %125 = vector.broadcast %105 : vector<1x32xf32> to vector<4x32xf32>
    %126 = arith.mulf %124, %125 : vector<4x32xf32>
    %127 = vector.broadcast %106 : vector<1x32xf32> to vector<4x32xf32>
    %128 = arith.addf %126, %127 : vector<4x32xf32>
    %129 = arith.truncf %128 : vector<4x32xf32> to vector<4x32xbf16>
    %c0_42 = arith.constant 0 : index
    %c0_43 = arith.constant 0 : index
    %130 = vector.load %arg13[%c0_42, %c0_43] : memref<32x64xbf16, #tpu.memory_space<vmem>>, vector<32x64xbf16>
    %cst_44 = arith.constant dense<0.000000e+00> : vector<4x64xf32>
    %131 = tpu.matmul %129, %130, %cst_44 {dimension_numbers = #tpu.dot_dimension_numbers<[1], [0], [0], [1], [0, 0, 1, 1], [], []>} : vector<4x32xbf16>, vector<32x64xbf16>, vector<4x64xf32> -> vector<4x64xf32>
    %c0_45 = arith.constant 0 : index
    %c0_46 = arith.constant 0 : index
    %132 = vector.load %arg14[%c0_45, %c0_46] : memref<1x64xf32, #tpu.memory_space<vmem>>, vector<1x64xf32>
    %133 = vector.broadcast %132 : vector<1x64xf32> to vector<4x64xf32>
    %134 = arith.addf %131, %133 : vector<4x64xf32>
    %135 = arith.mulf %134, %134 : vector<4x64xf32>
    %136 = arith.mulf %134, %135 : vector<4x64xf32>
    %cst_47 = arith.constant 4.471500e-02 : f32
    %137 = vector.broadcast %cst_47 : f32 to vector<4x64xf32>
    %138 = arith.mulf %137, %136 : vector<4x64xf32>
    %139 = arith.addf %134, %138 : vector<4x64xf32>
    %cst_48 = arith.constant 0.797884583 : f32
    %140 = vector.broadcast %cst_48 : f32 to vector<4x64xf32>
    %141 = arith.mulf %140, %139 : vector<4x64xf32>
    %142 = math.tanh %141 : vector<4x64xf32>
    %cst_49 = arith.constant 1.000000e+00 : f32
    %143 = vector.broadcast %cst_49 : f32 to vector<4x64xf32>
    %144 = arith.addf %143, %142 : vector<4x64xf32>
    %cst_50 = arith.constant 5.000000e-01 : f32
    %145 = vector.broadcast %cst_50 : f32 to vector<4x64xf32>
    %146 = arith.mulf %145, %144 : vector<4x64xf32>
    %147 = arith.mulf %134, %146 : vector<4x64xf32>
    %148 = arith.truncf %147 : vector<4x64xf32> to vector<4x64xbf16>
    %c0_51 = arith.constant 0 : index
    %c0_52 = arith.constant 0 : index
    %149 = vector.load %arg15[%c0_51, %c0_52] : memref<64x32xbf16, #tpu.memory_space<vmem>>, vector<64x32xbf16>
    %cst_53 = arith.constant dense<0.000000e+00> : vector<4x32xf32>
    %150 = tpu.matmul %148, %149, %cst_53 {dimension_numbers = #tpu.dot_dimension_numbers<[1], [0], [0], [1], [0, 0, 1, 1], [], []>} : vector<4x64xbf16>, vector<64x32xbf16>, vector<4x32xf32> -> vector<4x32xf32>
    %c0_54 = arith.constant 0 : index
    %c0_55 = arith.constant 0 : index
    %151 = vector.load %arg16[%c0_54, %c0_55] : memref<1x32xf32, #tpu.memory_space<vmem>>, vector<1x32xf32>
    %152 = vector.broadcast %151 : vector<1x32xf32> to vector<4x32xf32>
    %153 = arith.addf %150, %152 : vector<4x32xf32>
    %154 = arith.addf %104, %153 : vector<4x32xf32>
    %c0_56 = arith.constant 0 : index
    %c0_57 = arith.constant 0 : index
    %155 = vector.load %arg17[%c0_56, %c0_57] : memref<1x32xf32, #tpu.memory_space<vmem>>, vector<1x32xf32>
    %c0_58 = arith.constant 0 : index
    %c0_59 = arith.constant 0 : index
    %156 = vector.load %arg18[%c0_58, %c0_59] : memref<1x32xf32, #tpu.memory_space<vmem>>, vector<1x32xf32>
    %cst_60 = arith.constant dense<0.000000e+00> : vector<4xf32>
    %157 = vector.multi_reduction <add>, %154, %cst_60 [1] : vector<4x32xf32> to vector<4xf32>
    %158 = vector.shape_cast %157 : vector<4xf32> to vector<4x1xf32>
    %cst_61 = arith.constant 3.200000e+01 : f32
    %159 = vector.broadcast %cst_61 : f32 to vector<4x1xf32>
    %160 = arith.divf %158, %159 : vector<4x1xf32>
    %161 = vector.broadcast %160 : vector<4x1xf32> to vector<4x32xf32>
    %162 = arith.subf %154, %161 : vector<4x32xf32>
    %163 = arith.mulf %162, %162 : vector<4x32xf32>
    %cst_62 = arith.constant dense<0.000000e+00> : vector<4xf32>
    %164 = vector.multi_reduction <add>, %163, %cst_62 [1] : vector<4x32xf32> to vector<4xf32>
    %165 = vector.shape_cast %164 : vector<4xf32> to vector<4x1xf32>
    %cst_63 = arith.constant 3.200000e+01 : f32
    %166 = vector.broadcast %cst_63 : f32 to vector<4x1xf32>
    %167 = arith.divf %165, %166 : vector<4x1xf32>
    %168 = vector.broadcast %160 : vector<4x1xf32> to vector<4x32xf32>
    %169 = arith.subf %154, %168 : vector<4x32xf32>
    %cst_64 = arith.constant 9.99999974E-6 : f32
    %170 = vector.broadcast %cst_64 : f32 to vector<4x1xf32>
    %171 = arith.addf %167, %170 : vector<4x1xf32>
    %172 = math.rsqrt %171 : vector<4x1xf32>
    %173 = vector.broadcast %172 : vector<4x1xf32> to vector<4x32xf32>
    %174 = arith.mulf %169, %173 : vector<4x32xf32>
    %175 = vector.broadcast %155 : vector<1x32xf32> to vector<4x32xf32>
    %176 = arith.mulf %174, %175 : vector<4x32xf32>
    %177 = vector.broadcast %156 : vector<1x32xf32> to vector<4x32xf32>
    %178 = arith.addf %176, %177 : vector<4x32xf32>
    %179 = arith.truncf %178 : vector<4x32xf32> to vector<4x32xbf16>
    %c0_65 = arith.constant 0 : index
    %c0_66 = arith.constant 0 : index
    %180 = vector.load %arg19[%c0_65, %c0_66] : memref<32x96xbf16, #tpu.memory_space<vmem>>, vector<32x96xbf16>
    %cst_67 = arith.constant dense<0.000000e+00> : vector<4x96xf32>
    %181 = tpu.matmul %179, %180, %cst_67 {dimension_numbers = #tpu.dot_dimension_numbers<[1], [0], [0], [1], [0, 0, 1, 1], [], []>} : vector<4x32xbf16>, vector<32x96xbf16>, vector<4x96xf32> -> vector<4x96xf32>
    %c0_68 = arith.constant 0 : index
    %c0_69 = arith.constant 0 : index
    %182 = vector.load %arg20[%c0_68, %c0_69] : memref<1x96xf32, #tpu.memory_space<vmem>>, vector<1x96xf32>
    %183 = vector.broadcast %182 : vector<1x96xf32> to vector<4x96xf32>
    %184 = arith.addf %181, %183 : vector<4x96xf32>
    %185 = vector.extract_strided_slice %184 {offsets = [0, 0], sizes = [4, 32], strides = [1, 1]} : vector<4x96xf32> to vector<4x32xf32>
    %cst_70 = arith.constant 0.353553385 : f32
    %186 = vector.broadcast %cst_70 : f32 to vector<4x32xf32>
    %187 = arith.mulf %185, %186 : vector<4x32xf32>
    %188 = vector.extract_strided_slice %184 {offsets = [0, 32], sizes = [4, 32], strides = [1, 1]} : vector<4x96xf32> to vector<4x32xf32>
    %189 = vector.extract_strided_slice %184 {offsets = [0, 64], sizes = [4, 32], strides = [1, 1]} : vector<4x96xf32> to vector<4x32xf32>
    %190 = vector.extract_strided_slice %187 {offsets = [0, 0], sizes = [4, 8], strides = [1, 1]} : vector<4x32xf32> to vector<4x8xf32>
    %191 = vector.extract_strided_slice %187 {offsets = [0, 8], sizes = [4, 8], strides = [1, 1]} : vector<4x32xf32> to vector<4x8xf32>
    %192 = vector.extract_strided_slice %187 {offsets = [0, 16], sizes = [4, 8], strides = [1, 1]} : vector<4x32xf32> to vector<4x8xf32>
    %193 = vector.extract_strided_slice %187 {offsets = [0, 24], sizes = [4, 8], strides = [1, 1]} : vector<4x32xf32> to vector<4x8xf32>
    %194 = vector.shape_cast %190 : vector<4x8xf32> to vector<1x4x8xf32>
    %195 = vector.shape_cast %191 : vector<4x8xf32> to vector<1x4x8xf32>
    %196 = vector.shape_cast %192 : vector<4x8xf32> to vector<1x4x8xf32>
    %197 = vector.shape_cast %193 : vector<4x8xf32> to vector<1x4x8xf32>
    %198 = tpu.concatenate %194, %195, %196, %197 in 0 : vector<1x4x8xf32>, vector<1x4x8xf32>, vector<1x4x8xf32>, vector<1x4x8xf32> -> vector<4x4x8xf32>
    %199 = arith.truncf %198 : vector<4x4x8xf32> to vector<4x4x8xbf16>
    %200 = vector.extract_strided_slice %188 {offsets = [0, 0], sizes = [4, 8], strides = [1, 1]} : vector<4x32xf32> to vector<4x8xf32>
    %201 = vector.extract_strided_slice %188 {offsets = [0, 8], sizes = [4, 8], strides = [1, 1]} : vector<4x32xf32> to vector<4x8xf32>
    %202 = vector.extract_strided_slice %188 {offsets = [0, 16], sizes = [4, 8], strides = [1, 1]} : vector<4x32xf32> to vector<4x8xf32>
    %203 = vector.extract_strided_slice %188 {offsets = [0, 24], sizes = [4, 8], strides = [1, 1]} : vector<4x32xf32> to vector<4x8xf32>
    %204 = vector.shape_cast %200 : vector<4x8xf32> to vector<1x4x8xf32>
    %205 = vector.shape_cast %201 : vector<4x8xf32> to vector<1x4x8xf32>
    %206 = vector.shape_cast %202 : vector<4x8xf32> to vector<1x4x8xf32>
    %207 = vector.shape_cast %203 : vector<4x8xf32> to vector<1x4x8xf32>
    %208 = tpu.concatenate %204, %205, %206, %207 in 0 : vector<1x4x8xf32>, vector<1x4x8xf32>, vector<1x4x8xf32>, vector<1x4x8xf32> -> vector<4x4x8xf32>
    %209 = arith.truncf %208 : vector<4x4x8xf32> to vector<4x4x8xbf16>
    %210 = vector.extract_strided_slice %189 {offsets = [0, 0], sizes = [4, 8], strides = [1, 1]} : vector<4x32xf32> to vector<4x8xf32>
    %211 = vector.extract_strided_slice %189 {offsets = [0, 8], sizes = [4, 8], strides = [1, 1]} : vector<4x32xf32> to vector<4x8xf32>
    %212 = vector.extract_strided_slice %189 {offsets = [0, 16], sizes = [4, 8], strides = [1, 1]} : vector<4x32xf32> to vector<4x8xf32>
    %213 = vector.extract_strided_slice %189 {offsets = [0, 24], sizes = [4, 8], strides = [1, 1]} : vector<4x32xf32> to vector<4x8xf32>
    %214 = vector.shape_cast %210 : vector<4x8xf32> to vector<1x4x8xf32>
    %215 = vector.shape_cast %211 : vector<4x8xf32> to vector<1x4x8xf32>
    %216 = vector.shape_cast %212 : vector<4x8xf32> to vector<1x4x8xf32>
    %217 = vector.shape_cast %213 : vector<4x8xf32> to vector<1x4x8xf32>
    %218 = tpu.concatenate %214, %215, %216, %217 in 0 : vector<1x4x8xf32>, vector<1x4x8xf32>, vector<1x4x8xf32>, vector<1x4x8xf32> -> vector<4x4x8xf32>
    %219 = arith.truncf %218 : vector<4x4x8xf32> to vector<4x4x8xbf16>
    "tpu.trace_start"() <{level = 10 : i32, message = "hqc,hkc->hqk"}> : () -> ()
    %cst_71 = arith.constant dense<0.000000e+00> : vector<4x4x4xf32>
    %220 = tpu.matmul %199, %209, %cst_71 {dimension_numbers = #tpu.dot_dimension_numbers<[2], [2], [1], [1], [0, 0, 0, 1, 1, 1], [0], [0]>} : vector<4x4x8xbf16>, vector<4x4x8xbf16>, vector<4x4x4xf32> -> vector<4x4x4xf32>
    "tpu.trace_stop"() : () -> ()
    %cst_72 = arith.constant dense<0xFF800000> : vector<4x4xf32>
    %221 = vector.multi_reduction <maximumf>, %220, %cst_72 [2] : vector<4x4x4xf32> to vector<4x4xf32>
    %222 = vector.shape_cast %221 : vector<4x4xf32> to vector<4x4x1xf32>
    %223 = vector.broadcast %222 : vector<4x4x1xf32> to vector<4x4x4xf32>
    %224 = arith.subf %220, %223 : vector<4x4x4xf32>
    %225 = math.exp %224 : vector<4x4x4xf32>
    %cst_73 = arith.constant dense<0.000000e+00> : vector<4x4xf32>
    %226 = vector.multi_reduction <add>, %225, %cst_73 [2] : vector<4x4x4xf32> to vector<4x4xf32>
    %227 = vector.shape_cast %226 : vector<4x4xf32> to vector<4x4x1xf32>
    %228 = tpu.reciprocal %227 {approx = true} : vector<4x4x1xf32> -> vector<4x4x1xf32>
    %229 = vector.broadcast %228 : vector<4x4x1xf32> to vector<4x4x4xf32>
    %230 = arith.mulf %225, %229 : vector<4x4x4xf32>
    %231 = arith.truncf %230 : vector<4x4x4xf32> to vector<4x4x4xbf16>
    "tpu.trace_start"() <{level = 10 : i32, message = "hqk,hkc->hqc"}> : () -> ()
    %cst_74 = arith.constant dense<0.000000e+00> : vector<4x4x8xf32>
    %232 = tpu.matmul %231, %219, %cst_74 {dimension_numbers = #tpu.dot_dimension_numbers<[2], [1], [1], [2], [0, 0, 0, 1, 1, 2], [0], [0]>} : vector<4x4x4xbf16>, vector<4x4x8xbf16>, vector<4x4x8xf32> -> vector<4x4x8xf32>
    "tpu.trace_stop"() : () -> ()
    %233 = vector.extract_strided_slice %232 {offsets = [0, 0, 0], sizes = [1, 4, 8], strides = [1, 1, 1]} : vector<4x4x8xf32> to vector<1x4x8xf32>
    %234 = vector.shape_cast %233 : vector<1x4x8xf32> to vector<4x8xf32>
    %235 = vector.extract_strided_slice %232 {offsets = [1, 0, 0], sizes = [1, 4, 8], strides = [1, 1, 1]} : vector<4x4x8xf32> to vector<1x4x8xf32>
    %236 = vector.shape_cast %235 : vector<1x4x8xf32> to vector<4x8xf32>
    %237 = vector.extract_strided_slice %232 {offsets = [2, 0, 0], sizes = [1, 4, 8], strides = [1, 1, 1]} : vector<4x4x8xf32> to vector<1x4x8xf32>
    %238 = vector.shape_cast %237 : vector<1x4x8xf32> to vector<4x8xf32>
    %239 = vector.extract_strided_slice %232 {offsets = [3, 0, 0], sizes = [1, 4, 8], strides = [1, 1, 1]} : vector<4x4x8xf32> to vector<1x4x8xf32>
    %240 = vector.shape_cast %239 : vector<1x4x8xf32> to vector<4x8xf32>
    %241 = tpu.concatenate %234, %236, %238, %240 in 1 : vector<4x8xf32>, vector<4x8xf32>, vector<4x8xf32>, vector<4x8xf32> -> vector<4x32xf32>
    %242 = arith.truncf %241 : vector<4x32xf32> to vector<4x32xbf16>
    %c0_75 = arith.constant 0 : index
    %c0_76 = arith.constant 0 : index
    %243 = vector.load %arg21[%c0_75, %c0_76] : memref<32x32xbf16, #tpu.memory_space<vmem>>, vector<32x32xbf16>
    %cst_77 = arith.constant dense<0.000000e+00> : vector<4x32xf32>
    %244 = tpu.matmul %242, %243, %cst_77 {dimension_numbers = #tpu.dot_dimension_numbers<[1], [0], [0], [1], [0, 0, 1, 1], [], []>} : vector<4x32xbf16>, vector<32x32xbf16>, vector<4x32xf32> -> vector<4x32xf32>
    %c0_78 = arith.constant 0 : index
    %c0_79 = arith.constant 0 : index
    %245 = vector.load %arg22[%c0_78, %c0_79] : memref<1x32xf32, #tpu.memory_space<vmem>>, vector<1x32xf32>
    %246 = vector.broadcast %245 : vector<1x32xf32> to vector<4x32xf32>
    %247 = arith.addf %244, %246 : vector<4x32xf32>
    %248 = arith.addf %154, %247 : vector<4x32xf32>
    %c0_80 = arith.constant 0 : index
    %c0_81 = arith.constant 0 : index
    %249 = vector.load %arg23[%c0_80, %c0_81] : memref<1x32xf32, #tpu.memory_space<vmem>>, vector<1x32xf32>
    %c0_82 = arith.constant 0 : index
    %c0_83 = arith.constant 0 : index
    %250 = vector.load %arg24[%c0_82, %c0_83] : memref<1x32xf32, #tpu.memory_space<vmem>>, vector<1x32xf32>
    %cst_84 = arith.constant dense<0.000000e+00> : vector<4xf32>
    %251 = vector.multi_reduction <add>, %248, %cst_84 [1] : vector<4x32xf32> to vector<4xf32>
    %252 = vector.shape_cast %251 : vector<4xf32> to vector<4x1xf32>
    %cst_85 = arith.constant 3.200000e+01 : f32
    %253 = vector.broadcast %cst_85 : f32 to vector<4x1xf32>
    %254 = arith.divf %252, %253 : vector<4x1xf32>
    %255 = vector.broadcast %254 : vector<4x1xf32> to vector<4x32xf32>
    %256 = arith.subf %248, %255 : vector<4x32xf32>
    %257 = arith.mulf %256, %256 : vector<4x32xf32>
    %cst_86 = arith.constant dense<0.000000e+00> : vector<4xf32>
    %258 = vector.multi_reduction <add>, %257, %cst_86 [1] : vector<4x32xf32> to vector<4xf32>
    %259 = vector.shape_cast %258 : vector<4xf32> to vector<4x1xf32>
    %cst_87 = arith.constant 3.200000e+01 : f32
    %260 = vector.broadcast %cst_87 : f32 to vector<4x1xf32>
    %261 = arith.divf %259, %260 : vector<4x1xf32>
    %262 = vector.broadcast %254 : vector<4x1xf32> to vector<4x32xf32>
    %263 = arith.subf %248, %262 : vector<4x32xf32>
    %cst_88 = arith.constant 9.99999974E-6 : f32
    %264 = vector.broadcast %cst_88 : f32 to vector<4x1xf32>
    %265 = arith.addf %261, %264 : vector<4x1xf32>
    %266 = math.rsqrt %265 : vector<4x1xf32>
    %267 = vector.broadcast %266 : vector<4x1xf32> to vector<4x32xf32>
    %268 = arith.mulf %263, %267 : vector<4x32xf32>
    %269 = vector.broadcast %249 : vector<1x32xf32> to vector<4x32xf32>
    %270 = arith.mulf %268, %269 : vector<4x32xf32>
    %271 = vector.broadcast %250 : vector<1x32xf32> to vector<4x32xf32>
    %272 = arith.addf %270, %271 : vector<4x32xf32>
    %273 = arith.truncf %272 : vector<4x32xf32> to vector<4x32xbf16>
    %c0_89 = arith.constant 0 : index
    %c0_90 = arith.constant 0 : index
    %274 = vector.load %arg25[%c0_89, %c0_90] : memref<32x64xbf16, #tpu.memory_space<vmem>>, vector<32x64xbf16>
    %cst_91 = arith.constant dense<0.000000e+00> : vector<4x64xf32>
    %275 = tpu.matmul %273, %274, %cst_91 {dimension_numbers = #tpu.dot_dimension_numbers<[1], [0], [0], [1], [0, 0, 1, 1], [], []>} : vector<4x32xbf16>, vector<32x64xbf16>, vector<4x64xf32> -> vector<4x64xf32>
    %c0_92 = arith.constant 0 : index
    %c0_93 = arith.constant 0 : index
    %276 = vector.load %arg26[%c0_92, %c0_93] : memref<1x64xf32, #tpu.memory_space<vmem>>, vector<1x64xf32>
    %277 = vector.broadcast %276 : vector<1x64xf32> to vector<4x64xf32>
    %278 = arith.addf %275, %277 : vector<4x64xf32>
    %279 = arith.mulf %278, %278 : vector<4x64xf32>
    %280 = arith.mulf %278, %279 : vector<4x64xf32>
    %cst_94 = arith.constant 4.471500e-02 : f32
    %281 = vector.broadcast %cst_94 : f32 to vector<4x64xf32>
    %282 = arith.mulf %281, %280 : vector<4x64xf32>
    %283 = arith.addf %278, %282 : vector<4x64xf32>
    %cst_95 = arith.constant 0.797884583 : f32
    %284 = vector.broadcast %cst_95 : f32 to vector<4x64xf32>
    %285 = arith.mulf %284, %283 : vector<4x64xf32>
    %286 = math.tanh %285 : vector<4x64xf32>
    %cst_96 = arith.constant 1.000000e+00 : f32
    %287 = vector.broadcast %cst_96 : f32 to vector<4x64xf32>
    %288 = arith.addf %287, %286 : vector<4x64xf32>
    %cst_97 = arith.constant 5.000000e-01 : f32
    %289 = vector.broadcast %cst_97 : f32 to vector<4x64xf32>
    %290 = arith.mulf %289, %288 : vector<4x64xf32>
    %291 = arith.mulf %278, %290 : vector<4x64xf32>
    %292 = arith.truncf %291 : vector<4x64xf32> to vector<4x64xbf16>
    %c0_98 = arith.constant 0 : index
    %c0_99 = arith.constant 0 : index
    %293 = vector.load %arg27[%c0_98, %c0_99] : memref<64x32xbf16, #tpu.memory_space<vmem>>, vector<64x32xbf16>
    %cst_100 = arith.constant dense<0.000000e+00> : vector<4x32xf32>
    %294 = tpu.matmul %292, %293, %cst_100 {dimension_numbers = #tpu.dot_dimension_numbers<[1], [0], [0], [1], [0, 0, 1, 1], [], []>} : vector<4x64xbf16>, vector<64x32xbf16>, vector<4x32xf32> -> vector<4x32xf32>
    %c0_101 = arith.constant 0 : index
    %c0_102 = arith.constant 0 : index
    %295 = vector.load %arg28[%c0_101, %c0_102] : memref<1x32xf32, #tpu.memory_space<vmem>>, vector<1x32xf32>
    %296 = vector.broadcast %295 : vector<1x32xf32> to vector<4x32xf32>
    %297 = arith.addf %294, %296 : vector<4x32xf32>
    %298 = arith.addf %248, %297 : vector<4x32xf32>
    %c0_103 = arith.constant 0 : index
    %c0_104 = arith.constant 0 : index
    %299 = vector.load %arg29[%c0_103, %c0_104] : memref<1x32xf32, #tpu.memory_space<vmem>>, vector<1x32xf32>
    %c0_105 = arith.constant 0 : index
    %c0_106 = arith.constant 0 : index
    %300 = vector.load %arg30[%c0_105, %c0_106] : memref<1x32xf32, #tpu.memory_space<vmem>>, vector<1x32xf32>
    %cst_107 = arith.constant dense<0.000000e+00> : vector<4xf32>
    %301 = vector.multi_reduction <add>, %298, %cst_107 [1] : vector<4x32xf32> to vector<4xf32>
    %302 = vector.shape_cast %301 : vector<4xf32> to vector<4x1xf32>
    %cst_108 = arith.constant 3.200000e+01 : f32
    %303 = vector.broadcast %cst_108 : f32 to vector<4x1xf32>
    %304 = arith.divf %302, %303 : vector<4x1xf32>
    %305 = vector.broadcast %304 : vector<4x1xf32> to vector<4x32xf32>
    %306 = arith.subf %298, %305 : vector<4x32xf32>
    %307 = arith.mulf %306, %306 : vector<4x32xf32>
    %cst_109 = arith.constant dense<0.000000e+00> : vector<4xf32>
    %308 = vector.multi_reduction <add>, %307, %cst_109 [1] : vector<4x32xf32> to vector<4xf32>
    %309 = vector.shape_cast %308 : vector<4xf32> to vector<4x1xf32>
    %cst_110 = arith.constant 3.200000e+01 : f32
    %310 = vector.broadcast %cst_110 : f32 to vector<4x1xf32>
    %311 = arith.divf %309, %310 : vector<4x1xf32>
    %312 = vector.broadcast %304 : vector<4x1xf32> to vector<4x32xf32>
    %313 = arith.subf %298, %312 : vector<4x32xf32>
    %cst_111 = arith.constant 9.99999974E-6 : f32
    %314 = vector.broadcast %cst_111 : f32 to vector<4x1xf32>
    %315 = arith.addf %311, %314 : vector<4x1xf32>
    %316 = math.rsqrt %315 : vector<4x1xf32>
    %317 = vector.broadcast %316 : vector<4x1xf32> to vector<4x32xf32>
    %318 = arith.mulf %313, %317 : vector<4x32xf32>
    %319 = vector.broadcast %299 : vector<1x32xf32> to vector<4x32xf32>
    %320 = arith.mulf %318, %319 : vector<4x32xf32>
    %321 = vector.broadcast %300 : vector<1x32xf32> to vector<4x32xf32>
    %322 = arith.addf %320, %321 : vector<4x32xf32>
    %323 = arith.truncf %322 : vector<4x32xf32> to vector<4x32xbf16>
    %c0_112 = arith.constant 0 : index
    %c0_113 = arith.constant 0 : index
    %324 = vector.load %arg31[%c0_112, %c0_113] : memref<32x16xbf16, #tpu.memory_space<vmem>>, vector<32x16xbf16>
    %cst_114 = arith.constant dense<0.000000e+00> : vector<4x16xf32>
    %325 = tpu.matmul %323, %324, %cst_114 {dimension_numbers = #tpu.dot_dimension_numbers<[1], [0], [0], [1], [0, 0, 1, 1], [], []>} : vector<4x32xbf16>, vector<32x16xbf16>, vector<4x16xf32> -> vector<4x16xf32>
    %c0_115 = arith.constant 0 : index
    %c0_116 = arith.constant 0 : index
    %326 = vector.load %arg32[%c0_115, %c0_116] : memref<1x16xf32, #tpu.memory_space<vmem>>, vector<1x16xf32>
    %327 = vector.broadcast %326 : vector<1x16xf32> to vector<4x16xf32>
    %328 = arith.addf %325, %327 : vector<4x16xf32>
    %c0_117 = arith.constant 0 : index
    %c0_118 = arith.constant 0 : index
    %c0_119 = arith.constant 0 : index
    %329 = vector.load %arg33[%c0_117, %c0_118, %c0_119] : memref<1x4x16xf32, #tpu.memory_space<vmem>>, vector<1x4x16xf32>
    %330 = vector.shape_cast %329 : vector<1x4x16xf32> to vector<4x16xf32>
    %331 = vector.shape_cast %328 : vector<4x16xf32> to vector<1x4x16xf32>
    tpu.vector_store %arg33[%c0_117, %c0_118, %c0_119], %331 {strides = array<i32>} : memref<1x4x16xf32, #tpu.memory_space<vmem>>, vector<1x4x16xf32>,
    return
  }
  func.func @transform_0(%arg0: i32) -> (i32, i32, i32) {
    %c0_i32 = arith.constant 0 : i32
    %c0_i32_0 = arith.constant 0 : i32
    %c0_i32_1 = arith.constant 0 : i32
    return %arg0, %c0_i32, %c0_i32_0 : i32, i32, i32
  }
  func.func @transform_1(%arg0: i32) -> (i32, i32, i32) {
    %c0_i32 = arith.constant 0 : i32
    %c0_i32_0 = arith.constant 0 : i32
    %c0_i32_1 = arith.constant 0 : i32
    return %arg0, %c0_i32, %c0_i32_0 : i32, i32, i32
  }
  func.func @transform_2(%arg0: i32) -> (i32, i32) {
    %c0_i32 = arith.constant 0 : i32
    %c0_i32_0 = arith.constant 0 : i32
    %c0_i32_1 = arith.constant 0 : i32
    return %c0_i32, %c0_i32_0 : i32, i32
  }
  func.func @transform_3(%arg0: i32) -> (i32, i32) {
    %c0_i32 = arith.constant 0 : i32
    %c0_i32_0 = arith.constant 0 : i32
    %c0_i32_1 = arith.constant 0 : i32
    return %c0_i32, %c0_i32_0 : i32, i32
  }
  func.func @transform_4(%arg0: i32) -> (i32, i32) {
    %c0_i32 = arith.constant 0 : i32
    %c0_i32_0 = arith.constant 0 : i32
    %c0_i32_1 = arith.constant 0 : i32
    return %c0_i32, %c0_i32_0 : i32, i32
  }
  func.func @transform_5(%arg0: i32) -> (i32, i32) {
    %c0_i32 = arith.constant 0 : i32
    %c0_i32_0 = arith.constant 0 : i32
    %c0_i32_1 = arith.constant 0 : i32
    return %c0_i32, %c0_i32_0 : i32, i32
  }
  func.func @transform_6(%arg0: i32) -> (i32, i32) {
    %c0_i32 = arith.constant 0 : i32
    %c0_i32_0 = arith.constant 0 : i32
    %c0_i32_1 = arith.constant 0 : i32
    return %c0_i32, %c0_i32_0 : i32, i32
  }
  func.func @transform_7(%arg0: i32) -> (i32, i32) {
    %c0_i32 = arith.constant 0 : i32
    %c0_i32_0 = arith.constant 0 : i32
    %c0_i32_1 = arith.constant 0 : i32
    return %c0_i32, %c0_i32_0 : i32, i32
  }
  func.func @transform_8(%arg0: i32) -> (i32, i32) {
    %c0_i32 = arith.constant 0 : i32
    %c0_i32_0 = arith.constant 0 : i32
    %c0_i32_1 = arith.constant 0 : i32
    return %c0_i32, %c0_i32_0 : i32, i32
  }
  func.func @transform_9(%arg0: i32) -> (i32, i32) {
    %c0_i32 = arith.constant 0 : i32
    %c0_i32_0 = arith.constant 0 : i32
    %c0_i32_1 = arith.constant 0 : i32
    return %c0_i32, %c0_i32_0 : i32, i32
  }
  func.func @transform_10(%arg0: i32) -> (i32, i32) {
    %c0_i32 = arith.constant 0 : i32
    %c0_i32_0 = arith.constant 0 : i32
    %c0_i32_1 = arith.constant 0 : i32
    return %c0_i32, %c0_i32_0 : i32, i32
  }
  func.func @transform_11(%arg0: i32) -> (i32, i32) {
    %c0_i32 = arith.constant 0 : i32
    %c0_i32_0 = arith.constant 0 : i32
    %c0_i32_1 = arith.constant 0 : i32
    return %c0_i32, %c0_i32_0 : i32, i32
  }
  func.func @transform_12(%arg0: i32) -> (i32, i32) {
    %c0_i32 = arith.constant 0 : i32
    %c0_i32_0 = arith.constant 0 : i32
    %c0_i32_1 = arith.constant 0 : i32
    return %c0_i32, %c0_i32_0 : i32, i32
  }
  func.func @transform_13(%arg0: i32) -> (i32, i32) {
    %c0_i32 = arith.constant 0 : i32
    %c0_i32_0 = arith.constant 0 : i32
    %c0_i32_1 = arith.constant 0 : i32
    return %c0_i32, %c0_i32_0 : i32, i32
  }
  func.func @transform_14(%arg0: i32) -> (i32, i32) {
    %c0_i32 = arith.constant 0 : i32
    %c0_i32_0 = arith.constant 0 : i32
    %c0_i32_1 = arith.constant 0 : i32
    return %c0_i32, %c0_i32_0 : i32, i32
  }
  func.func @transform_15(%arg0: i32) -> (i32, i32) {
    %c0_i32 = arith.constant 0 : i32
    %c0_i32_0 = arith.constant 0 : i32
    %c0_i32_1 = arith.constant 0 : i32
    return %c0_i32, %c0_i32_0 : i32, i32
  }
  func.func @transform_16(%arg0: i32) -> (i32, i32) {
    %c0_i32 = arith.constant 0 : i32
    %c0_i32_0 = arith.constant 0 : i32
    %c0_i32_1 = arith.constant 0 : i32
    return %c0_i32, %c0_i32_0 : i32, i32
  }
  func.func @transform_17(%arg0: i32) -> (i32, i32) {
    %c0_i32 = arith.constant 0 : i32
    %c0_i32_0 = arith.constant 0 : i32
    %c0_i32_1 = arith.constant 0 : i32
    return %c0_i32, %c0_i32_0 : i32, i32
  }
  func.func @transform_18(%arg0: i32) -> (i32, i32) {
    %c0_i32 = arith.constant 0 : i32
    %c0_i32_0 = arith.constant 0 : i32
    %c0_i32_1 = arith.constant 0 : i32
    return %c0_i32, %c0_i32_0 : i32, i32
  }
  func.func @transform_19(%arg0: i32) -> (i32, i32) {
    %c0_i32 = arith.constant 0 : i32
    %c0_i32_0 = arith.constant 0 : i32
    %c0_i32_1 = arith.constant 0 : i32
    return %c0_i32, %c0_i32_0 : i32, i32
  }
  func.func @transform_20(%arg0: i32) -> (i32, i32) {
    %c0_i32 = arith.constant 0 : i32
    %c0_i32_0 = arith.constant 0 : i32
    %c0_i32_1 = arith.constant 0 : i32
    return %c0_i32, %c0_i32_0 : i32, i32
  }
  func.func @transform_21(%arg0: i32) -> (i32, i32) {
    %c0_i32 = arith.constant 0 : i32
    %c0_i32_0 = arith.constant 0 : i32
    %c0_i32_1 = arith.constant 0 : i32
    return %c0_i32, %c0_i32_0 : i32, i32
  }
  func.func @transform_22(%arg0: i32) -> (i32, i32) {
    %c0_i32 = arith.constant 0 : i32
    %c0_i32_0 = arith.constant 0 : i32
    %c0_i32_1 = arith.constant 0 : i32
    return %c0_i32, %c0_i32_0 : i32, i32
  }
  func.func @transform_23(%arg0: i32) -> (i32, i32) {
    %c0_i32 = arith.constant 0 : i32
    %c0_i32_0 = arith.constant 0 : i32
    %c0_i32_1 = arith.constant 0 : i32
    return %c0_i32, %c0_i32_0 : i32, i32
  }
  func.func @transform_24(%arg0: i32) -> (i32, i32) {
    %c0_i32 = arith.constant 0 : i32
    %c0_i32_0 = arith.constant 0 : i32
    %c0_i32_1 = arith.constant 0 : i32
    return %c0_i32, %c0_i32_0 : i32, i32
  }
  func.func @transform_25(%arg0: i32) -> (i32, i32) {
    %c0_i32 = arith.constant 0 : i32
    %c0_i32_0 = arith.constant 0 : i32
    %c0_i32_1 = arith.constant 0 : i32
    return %c0_i32, %c0_i32_0 : i32, i32
  }
  func.func @transform_26(%arg0: i32) -> (i32, i32) {
    %c0_i32 = arith.constant 0 : i32
    %c0_i32_0 = arith.constant 0 : i32
    %c0_i32_1 = arith.constant 0 : i32
    return %c0_i32, %c0_i32_0 : i32, i32
  }
  func.func @transform_27(%arg0: i32) -> (i32, i32) {
    %c0_i32 = arith.constant 0 : i32
    %c0_i32_0 = arith.constant 0 : i32
    %c0_i32_1 = arith.constant 0 : i32
    return %c0_i32, %c0_i32_0 : i32, i32
  }
  func.func @transform_28(%arg0: i32) -> (i32, i32) {
    %c0_i32 = arith.constant 0 : i32
    %c0_i32_0 = arith.constant 0 : i32
    %c0_i32_1 = arith.constant 0 : i32
    return %c0_i32, %c0_i32_0 : i32, i32
  }
  func.func @transform_29(%arg0: i32) -> (i32, i32) {
    %c0_i32 = arith.constant 0 : i32
    %c0_i32_0 = arith.constant 0 : i32
    %c0_i32_1 = arith.constant 0 : i32
    return %c0_i32, %c0_i32_0 : i32, i32
  }
  func.func @transform_30(%arg0: i32) -> (i32, i32) {
    %c0_i32 = arith.constant 0 : i32
    %c0_i32_0 = arith.constant 0 : i32
    %c0_i32_1 = arith.constant 0 : i32
    return %c0_i32, %c0_i32_0 : i32, i32
  }
  func.func @transform_31(%arg0: i32) -> (i32, i32) {
    %c0_i32 = arith.constant 0 : i32
    %c0_i32_0 = arith.constant 0 : i32
    %c0_i32_1 = arith.constant 0 : i32
    return %c0_i32, %c0_i32_0 : i32, i32
  }
  func.func @transform_32(%arg0: i32) -> (i32, i32, i32) {
    %c0_i32 = arith.constant 0 : i32
    %c0_i32_0 = arith.constant 0 : i32
    %c0_i32_1 = arith.constant 0 : i32
    return %arg0, %c0_i32, %c0_i32_0 : i32, i32, i32
  }
}

</mosaic_0001>

<bundles_post_ra>
// kernel: masked_ae_forward.3
= control target key start
LH: loop header
LB: loop body
LE: loop exit
PB: predicated region body
PF: predicated region fallthrough
CT: control target
= control target key end

     0   :  { %s2738_s6 = smov 1   ;;  %s2739_s10 = smov 2   ;;  %s3158_s0 = inlined_call_operand.smem [shape: u32[30], index: -1, kind: input, shape index: {}] }
   0x1   :  { %s2781_s5 = sld [smem:[%s3158_s0]]   ;;  %s2740_s14 = smov 3  }
   0x2   :  { %s2786_s9 = sld [smem:[%s3158_s0 + %s2738_s6]]   ;;  %s2741_s18 = smov 4  }
   0x3   :  { %s2791_s13 = sld [smem:[%s3158_s0 + %s2739_s10]]   ;;  %s2742_s22 = smov 5  }
   0x4   :  { %s2796_s17 = sld [smem:[%s3158_s0 + %s2740_s14]]   ;;  %s2743_s26 = smov 6  }
   0x5   :  { %s2801_s21 = sld [smem:[%s3158_s0 + %s2741_s18]]   ;;  %s2744_s30 = smov 7  }
   0x6   :  { %s2806_s25 = sld [smem:[%s3158_s0 + %s2742_s22]]   ;;  %s2745_s4 = smov 8  }
   0x7   :  { %s2811_s29 = sld [smem:[%s3158_s0 + %s2743_s26]]   ;;  %s2746_s10 = smov 9  }
   0x8   :  { %s2816_s3 = sld [smem:[%s3158_s0 + %s2744_s30]]   ;;  %s2747_s15 = smov 10  }
   0x9   :  { %s2821_s8 = sld [smem:[%s3158_s0 + %s2745_s4]]   ;;  %s2748_s20 = smov 11  }
   0xa   :  { %s2826_s14 = sld [smem:[%s3158_s0 + %s2746_s10]]   ;;  %s2749_s26 = smov 12  }
   0xb   :  { %s2831_s19 = sld [smem:[%s3158_s0 + %s2747_s15]]   ;;  %s2750_s1 = smov 13  }
   0xc   :  { %s2836_s24 = sld [smem:[%s3158_s0 + %s2748_s20]]   ;;  %s2751_s7 = smov 14  }
   0xd   :  { %s2841_s30 = sld [smem:[%s3158_s0 + %s2749_s26]]   ;;  %s2752_s15 = smov 15  }
   0xe   :  { %s2846_s6 = sld [smem:[%s3158_s0 + %s2750_s1]]   ;;  %s2753_s22 = smov 16  }
   0xf   :  { %s2851_s12 = sld [smem:[%s3158_s0 + %s2751_s7]]   ;;  %s2754_s28 = smov 17  }
  0x10   :  { %s2856_s20 = sld [smem:[%s3158_s0 + %s2752_s15]]   ;;  %s2755_s7 = smov 18  }
  0x11   :  { %s2861_s27 = sld [smem:[%s3158_s0 + %s2753_s22]]   ;;  %s2756_s15 = smov 19  }
  0x12   :  { %s2866_s4 = sld [smem:[%s3158_s0 + %s2754_s28]]   ;;  %s2757_s22 = smov 20  }
  0x13   :  { %s2758_s28 = smov 21  }
  0x14   :  { %3160 = sst [smem:[#allocation2_spill]] %s2846_s6 }
  0x15   :  { %3161 = sst [smem:[#allocation3_spill]] %s2851_s12 }
  0x16   :  { %s2871_s12 = sld [smem:[%s3158_s0 + %s2755_s7]]   ;;  %s2759_s7 = smov 22  }
  0x17   :  { %3162 = sst [smem:[#allocation4_spill]] %s2861_s27 }
  0x18   :  { %3163 = sst [smem:[#allocation5_spill]] %s2866_s4 }
  0x19   :  { %s2876_s6 = sld [smem:[%s3158_s0 + %s2756_s15]]   ;;  %s2760_s15 = smov 23  }
  0x1a   :  { %s2881_s27 = sld [smem:[%s3158_s0 + %s2757_s22]]   ;;  %s2761_s22 = smov 24  }
  0x1b   :  { %s2886_s4 = sld [smem:[%s3158_s0 + %s2758_s28]]   ;;  %s2762_s28 = smov 25  }
  0x1c   :  { %3164 = sst [smem:[#allocation6_spill]] %s2871_s12 }
  0x1d   :  { %s2891_s12 = sld [smem:[%s3158_s0 + %s2759_s7]]   ;;  %s2763_s7 = smov 26  }
  0x1f   :  { %3165 = sst [smem:[#allocation7_spill]] %s2876_s6 }
  0x20   :  { %3166 = sst [smem:[#allocation8_spill]] %s2881_s27 }
  0x21   :  { %3167 = sst [smem:[#allocation9_spill]] %s2886_s4 }
  0x22   :  { %s2896_s6 = sld [smem:[%s3158_s0 + %s2760_s15]]   ;;  %s2764_s15 = smov 27  }
  0x23   :  { %3168 = sst [smem:[#allocation10_spill]] %s2891_s12 }
  0x24   :  { %s2901_s27 = sld [smem:[%s3158_s0 + %s2761_s22]]   ;;  %s2765_s22 = smov 28  }
  0x25   :  { %s2906_s4 = sld [smem:[%s3158_s0 + %s2762_s28]]   ;;  %s2766_s28 = smov 29  }
  0x26   :  { %s2911_s12 = sld [smem:[%s3158_s0 + %s2763_s7]]   ;;  %s2928_s7 = smov 0  }
  0x28   :  { %3169 = sst [smem:[#allocation11_spill]] %s2896_s6 }
  0x29   :  { %s2916_s6 = sld [smem:[%s3158_s0 + %s2764_s15]]  }
  0x2a   :  { %3170 = sst [smem:[#allocation12_spill]] %s2901_s27 }
  0x2b   :  { %3171 = sst [smem:[#allocation13_spill]] %s2906_s4 }
  0x2c   :  { %s2921_s27 = sld [smem:[%s3158_s0 + %s2765_s22]]  }
  0x2d   :  { %s2926_s4 = sld [smem:[%s3158_s0 + %s2766_s28]]  }
  0x2e LB: > { %s2374_s10 = sadd.s32 4294967295, %s2736_s7   ;;  %p2378_p0 = scmp.ge.s32.totalorder %s2736_s7, 1  ;;  %s2736_s7 = sphi %s2928_s7, %s69_s7  }
  0x2f   : > { %p817_p1 = scmp.lt.s32.totalorder %s2736_s7, 3 }
  0x31   : > { %p818_p2 = pnand %p2378_p0, %p817_p1 }
  0x32   : > { %p893_p3 = scmp.lt.s32.totalorder (!%p818_p2), %s2374_s10, 1  ;;  %vm908_vm0 = vcmask (!%p818_p2), 130048   ;;  %v2651_v14 = vld [vmem:[%s2796_s17] sm:$0xff] (!%p818_p2)   ;;  %v2767_v15 = vmov (!%p818_p2), 0.0   ;;  %vm2768_vm1 = vmmov (!%p818_p2), 0   ;;  %s2769_s15 = smov (!%p818_p2), 120  }
  0x33   : > { %821 = sbr.rel (%p818_p2) target bundleno = 5902 (0x170e), region = 136  ;;  %2472 = vmatprep.subr.bf16.mxu0 (!%p818_p2), %v2767_v15  ;;  %2474 = vmatprep.mubr.msk.bf16.mxu0 (!%p818_p2), %vm2768_vm1, %v2767_v15  ;;  %v2383_v24 = vld [vmem:[%s2786_s9] ss:$0 sm:$0xff] (!%p818_p2)  ;;  %s2770_s16 = smov (!%p818_p2), 112   ;;  %vm1037_vm2 = vcmask (!%p818_p2), 64512   ;;  %vm1493_vm3 = vcmask (!%p818_p2), 261120  }
  0x34   : > { %2473 = vmatpush3.bf16.msra.mxu0 (!%p818_p2), %v2651_v14  ;;  %2478 = vmatprep.subr.bf16.mxu1 (!%p818_p2), %v2767_v15  ;;  %v2384_v28 = vld [vmem:[%s2791_s13] ss:$0 sm:$0xff] (!%p818_p2)  ;;  %s2771_s18 = smov (!%p818_p2), 96   ;;  %s2772_s22 = smov (!%p818_p2), 8   ;;  %vm2286_vm4 = vcmask (!%p818_p2), 523264   ;;  %vm2288_vm5 = vcmask (!%p818_p2), 519168  }
  0x35   : > { %2484 = vmatprep.subr.bf16.mxu0 (!%p818_p2), %v2767_v15  ;;  %2480 = vmatprep.mubr.msk.bf16.mxu1 (!%p818_p2), %vm2768_vm1, %v2767_v15  ;;  %v2385_v33 = vld [vmem:[%s2801_s21] ss:$0 sm:$0xff] (!%p818_p2)  ;;  %s3172_s23 = sld [smem:[#allocation2_spill]] (!%p818_p2)  ;;  %s3173_s26 = sld [smem:[#allocation3_spill]] (!%p818_p2) }
  0x36   : > { %s3174_s28 = sld [smem:[#allocation4_spill]] (!%p818_p2)  ;;  %s3175_s1 = sld [smem:[#allocation5_spill]] (!%p818_p2) }
  0x37   : > { %s3176_s2 = sld [smem:[#allocation6_spill]] (!%p818_p2) }
  0x3a   : > { %s3185_s10 = smov (!%p893_p3, %s2374_s10), 1 }
  0x3b   : > { %s2434_s0 = sshll.u32 %s3185_s10, 4 }
  0x3c   : > { %s897_s11 = scalar_lea.vmem %s2781_s5, %s2434_s0 }
  0x3d   : > { %v2942_v0 = vld [vmem:[%s897_s11] sm:$0xff]  ;;  %v2944_v1 = vld [vmem:[%s897_s11 + $0x8] sm:$0xff]  ;;  %s3177_s11 = sld [smem:[#allocation9_spill]] }
  0x3e   : > { %v909_v2 = vsel %vm908_vm0, %v2942_v0, 0.0  ;;  %v912_v3 = vsel %vm908_vm0, %v2944_v1, 0.0 }
  0x3f   : > { %910 = vadd.xlane.f32.xlu0 %v909_v2 }
  0x43   : > { %913 = vadd.xlane.f32.xlu0 %v912_v3 }
  0xcc   : > { %v911_v4 = vpop.xlane.xlu0 %910 }
  0xcd   : > { %v916_v5 = vmul.f32 0.0625, %v911_v4 }
  0xcf   : > { %v918_v6 = vsub.f32 %v2942_v0, %v916_v5 }
  0xd0   : > { %v914_v7 = vpop.xlane.xlu0 %913 }
  0xd1   : > { %v917_v8 = vmul.f32 0.0625, %v914_v7  ;;  %v920_v9 = vmul.f32 %v918_v6, %v918_v6 }
  0xd3   : > { %v919_v10 = vsub.f32 %v2944_v1, %v917_v8  ;;  %v922_v11 = vsel %vm908_vm0, %v920_v9, 0.0 }
  0xd4   : > { %923 = vadd.xlane.f32.xlu1 %v922_v11 }
  0xd5   : > { %v921_v12 = vmul.f32 %v919_v10, %v919_v10 }
  0xd7   : > { %v925_v13 = vsel %vm908_vm0, %v921_v12, 0.0 }
  0xd8   : > { %926 = vadd.xlane.f32.xlu1 %v925_v13 }
 0x161   : > { %v924_v16 = vpop.xlane.xlu1 %923 }
 0x162   : > { %v928_v17 = vmul.f32 0.0625, %v924_v16 }
 0x164   : > { %v930_v18 = vadd.f32 1e-05, %v928_v17 }
 0x165   : > { %v927_v19 = vpop.xlane.xlu1 %926 }
 0x166   : > { %2662 = vrsqrt.f32 %v930_v18  ;;  %v929_v20 = vmul.f32 0.0625, %v927_v19 }
 0x168   : > { %v931_v21 = vadd.f32 1e-05, %v929_v20 }
 0x16a   : > { %2664 = vrsqrt.f32 %v931_v21 }
 0x170   : > { %v2663_v22 = vpop.eup %2662 }
 0x171   : > { %v934_v23 = vmul.f32 %v2663_v22, %v918_v6 }
 0x173   : > { %v942_v27 = vmul.f32 %v2383_v24, %v934_v23 }
 0x174   : > { %v2665_v25 = vpop.eup %2664 }
 0x175   : > { %v935_v26 = vmul.f32 %v2665_v25, %v919_v10  ;;  %v950_v30 = vadd.f32 %v2384_v28, %v942_v27 }
 0x177   : > { %v943_v29 = vmul.f32 %v2383_v24, %v935_v26 }
 0x179   : > { %v951_v31 = vadd.f32 %v2384_v28, %v943_v29 }
 0x17b   : > { %v952_v32 = vpack.c.bf16 %v951_v31, %v950_v30 }
 0x17d   : > { %2475 = vmatmul.mubr.msk.bf16.vlgmr.msra.gmra.mrb[0].mxu0 %vm908_vm0, %v952_v32 }
 0x17e   : > { %2486 = vmatprep.mubr.msk.bf16.mxu0 %vm2768_vm1, %v2767_v15 }
 0x250   : > { %v1005_v34 = vpop.f32.mrb[0].mxu0 }
 0x251   : > { %v1006_v35 = vadd.f32 %v2385_v33, %v1005_v34  ;;  %v2476_v36 = vpop.f32.mrb[1].mxu0 }
 0x252   : > { %v1008_v37 = vpop.f32.mrb[2].mxu0 }
 0x253   : > { %v1009_v38 = vadd.f32 %v2385_v33, %v1008_v37  ;;  %v2477_v39 = vpop.f32.mrb[3].mxu0  ;;  %v1012_v40 = vmul.f32 0.35355338, %v1006_v35 }
 0x255   : > { %v1013_v41 = vmul.f32 0.35355338, %v1009_v38  ;;  %v2621_v42 = vpack.i.bf16 %v1009_v38, %v1006_v35  ;;  %v2968_v43 = vpack.c.bf16 %v1009_v38, %v1006_v35 }
 0x257   : > { %v1022_v44 = vpack.c.bf16 %v1013_v41, %v1012_v40  ;;  %2622 = vrot.lane.b32.xlu0 %v2621_v42, %s2769_s15  ;;  %v2626_v45 = vpack.i.bf16 %v1013_v41, %v1012_v40 }
 0x2c9   : > { %v2623_v46 = vpop.permute.xlu0 %2622 }
 0x2ca   : > { %v2625_v47 = vunpack.i.h.bf16 %v2623_v46  ;;  %v2624_v48 = vunpack.i.l.bf16 %v2623_v46 }
 0x2cc   : > { %v2971_v49 = vpack.c.bf16 %v2625_v47, %v2624_v48 }
 0x2ce   : > { %1086 = vrot.lane.b32.xlu1 %v2971_v49, %s2770_s16 }
 0x2d2   : > { %2627 = vrot.lane.b32.xlu1 %v2626_v45, %s2769_s15  ;;  %v2652_v45 = vld [vmem:[%s2806_s25] sm:$0xff]  }
 0x2d6   : > { %1035 = vrot.lane.b32.xlu1 %v2968_v43, %s2770_s16 }
 0x340   : > { %v1087_v50 = vpop.permute.xlu1 %1086 }
 0x341   : > { %v1092_v51 = vsel %vm1037_vm2, %v1087_v50, 0 }
 0x342   : > { %2485 = vmatpush3.bf16.xpose.msra.mxu0 %v1092_v51 }
 0x343   : > { %2496 = vmatprep.subr.bf16.mxu0 %v2767_v15 }
 0x344   : > { %v2628_v52 = vpop.permute.xlu1 %2627 }
 0x345   : > { %v2630_v53 = vunpack.i.h.bf16 %v2628_v52  ;;  %v2629_v54 = vunpack.i.l.bf16 %v2628_v52 }
 0x347   : > { %v1023_v55 = vpack.c.bf16 %v2630_v53, %v2629_v54 }
 0x348   : > { %v1036_v56 = vpop.permute.xlu1 %1035 }
 0x349   : > { %2487 = vmatmul.mubr.msk.bf16.vlgmr.msra.gmra.mrb[4].mxu0 %vm1037_vm2, %v1023_v55  ;;  %v1042_v57 = vsel %vm1037_vm2, %v1036_v56, 0 }
 0x34a   : > { %2479 = vmatpush3.bf16.xpose.msra.mxu1 %v1042_v57  ;;  %2498 = vmatprep.mubr.msk.bf16.mxu0 %vm2768_vm1, %v2767_v15 }
 0x34b   : > { %2490 = vmatprep.subr.bf16.mxu1 %v2767_v15 }
 0x351   : > { %2481 = vmatmul.mubr.msk.bf16.vlgmr.msra.gmra.mrb[0].mxu1 %vm1037_vm2, %v1022_v44 }
 0x352   : > { %2492 = vmatprep.mubr.msk.bf16.mxu1 %vm2768_vm1, %v2767_v15 }
 0x41c   : > { %v1128_v58 = vpop.f32.mrb[4].mxu0 }
 0x41d   : > { %v2488_v59 = vpop.f32.mrb[5].mxu0  ;;  %v1141_v60 = vsel %vm908_vm0, %v1128_v58, -inf }
 0x41e   : > { %1142 = vmax.xlane.f32.xlu0 %v1141_v60  ;;  %v1131_v61 = vpop.f32.mrb[6].mxu0 }
 0x41f   : > { %v2489_v62 = vpop.f32.mrb[7].mxu0  ;;  %v1144_v63 = vsel %vm908_vm0, %v1131_v61, -inf }
 0x420   : > { %1145 = vmax.xlane.f32.xlu1 %v1144_v63 }
 0x424   : > { %v1078_v2 = vpop.f32.mrb[0].mxu1 }
 0x425   : > { %v2482_v3 = vpop.f32.mrb[1].mxu1  ;;  %v1135_v4 = vsel %vm908_vm0, %v1078_v2, -inf }
 0x426   : > { %v1081_v5 = vpop.f32.mrb[2].mxu1  ;;  %1136 = vmax.xlane.f32.xlu0 %v1135_v4 }
 0x427   : > { %v2483_v6 = vpop.f32.mrb[3].mxu1  ;;  %v1138_v7 = vsel %vm908_vm0, %v1081_v5, -inf }
 0x42a   : > { %1139 = vmax.xlane.f32.xlu0 %v1138_v7 }
 0x4ab   : > { %v1143_v8 = vpop.xlane.xlu0 %1142 }
 0x4ac   : > { %v1149_v9 = vsub.f32 %v1128_v58, %v1143_v8 }
 0x4ad   : > { %v1146_v10 = vpop.xlane.xlu1 %1145 }
 0x4ae   : > { %v1155_v11 = vmul.f32 1.442695, %v1149_v9  ;;  %v1150_v12 = vsub.f32 %v1131_v61, %v1146_v10  ;;  %v2392_v61 = vld [vmem:[%s2811_s29] ss:$0 sm:$0xff] }
 0x4b0   : > { %2666 = vpow2.f32 %v1155_v11  ;;  %v1157_v13 = vmul.f32 1.442695, %v1150_v12 }
 0x4b2   : > { %2668 = vpow2.f32 %v1157_v13 }
 0x4b3   : > { %v1137_v14 = vpop.xlane.xlu0 %1136 }
 0x4b4   : > { %v1147_v16 = vsub.f32 %v1078_v2, %v1137_v14 }
 0x4b6   : > { %v1151_v17 = vmul.f32 1.442695, %v1147_v16 }
 0x4b7   : > { %v1140_v18 = vpop.xlane.xlu0 %1139 }
 0x4b8   : > { %2670 = vpow2.f32 %v1151_v17  ;;  %v1148_v19 = vsub.f32 %v1081_v5, %v1140_v18 }
 0x4ba   : > { %v2667_v20 = vpop.eup %2666  ;;  %v1153_v21 = vmul.f32 1.442695, %v1148_v19  ;;  %v2653_v19 = vld [vmem:[%s2826_s14] sm:$0xff]  }
 0x4bb   : > { %v1165_v22 = vsel %vm908_vm0, %v2667_v20, 0.0 }
 0x4bc   : > { %v2669_v23 = vpop.eup %2668  ;;  %2672 = vpow2.f32 %v1153_v21  ;;  %1166 = vadd.xlane.f32.xlu0 %v1165_v22 }
 0x4bd   : > { %v1168_v24 = vsel %vm908_vm0, %v2669_v23, 0.0 }
 0x4be   : > { %1169 = vadd.xlane.f32.xlu1 %v1168_v24 }
 0x4c2   : > { %v2671_v25 = vpop.eup %2670 }
 0x4c3   : > { %v1159_v26 = vsel %vm908_vm0, %v2671_v25, 0.0 }
 0x4c4   : > { %1160 = vadd.xlane.f32.xlu1 %v1159_v26 }
 0x4c6   : > { %v2673_v27 = vpop.eup %2672 }
 0x4c7   : > { %v1162_v28 = vsel %vm908_vm0, %v2673_v27, 0.0 }
 0x4c8   : > { %1163 = vadd.xlane.f32.xlu1 %v1162_v28  ;;  %v2395_v28 = vld [vmem:[%s2816_s3] ss:$0 sm:$0xff] }
 0x4d2   : > { %1228 = vrot.lane.b32.xlu0 %v2971_v49, %s2771_s18 }
 0x4d9   : > { %1181 = vrot.lane.b32.xlu1 %v2968_v43, %s2771_s18 }
 0x549   : > { %v1167_v29 = vpop.xlane.xlu0 %1166 }
 0x54a   : > { %2674 = vrcp.f32 %v1167_v29 }
 0x54b   : > { %v1170_v30 = vpop.xlane.xlu1 %1169 }
 0x54c   : > { %2676 = vrcp.f32 %v1170_v30 }
 0x54d   : > { %v1229_v31 = vpop.permute.xlu0 %1228 }
 0x54e   : > { %2497 = vmatpush3.bf16.msra.mxu0 %v1229_v31 }
 0x54f   : > { %2508 = vmatprep.subr.bf16.mxu0 %v2767_v15 }
 0x551   : > { %v1161_v32 = vpop.xlane.xlu1 %1160 }
 0x552   : > { %2678 = vrcp.f32 %v1161_v32  ;;  %v2396_v32 = vld [vmem:[%s2821_s8] ss:$0 sm:$0xff] }
 0x554   : > { %v2675_v33 = vpop.eup %2674 }
 0x555   : > { %v1164_v34 = vpop.xlane.xlu1 %1163  ;;  %v1177_v36 = vmul.f32 %v2675_v33, %v2667_v20 }
 0x556   : > { %v2677_v35 = vpop.eup %2676  ;;  %2680 = vrcp.f32 %v1164_v34 }
 0x557   : > { %v1178_v37 = vmul.f32 %v2677_v35, %v2669_v23 }
 0x559   : > { %v1182_v38 = vpop.permute.xlu1 %1181  ;;  %v1180_v39 = vpack.c.bf16 %v1178_v37, %v1177_v36  ;;  %v2654_v37 = vld [vmem:[%s2836_s24] sm:$0xff]  }
 0x55a   : > { %2491 = vmatpush3.bf16.msra.mxu1 %v1182_v38  ;;  %v2655_v38 = vld [vmem:[%s2836_s24 + $0x8] sm:$0xff]  }
 0x55b   : > { %2499 = vmatmul.mubr.msk.bf16.vlgmr.msra.gmra.mrb[8].mxu0 %vm908_vm0, %v1180_v39  ;;  %2502 = vmatprep.subr.bf16.mxu1 %v2767_v15  ;;  %v2397_v39 = vld [vmem:[%s2831_s19] ss:$0 sm:$0xff] }
 0x55c   : > { %2510 = vmatprep.mubr.msk.bf16.mxu0 %vm2768_vm1, %v2767_v15  ;;  %v2679_v40 = vpop.eup %2678  ;;  %2509 = vmatpush3.bf16.msra.mxu0 %v2653_v19 }
 0x55d   : > { %v1175_v42 = vmul.f32 %v2679_v40, %v2671_v25  ;;  %2522 = vmatprep.subr.bf16.mxu0 %v2767_v15 }
 0x560   : > { %v2681_v41 = vpop.eup %2680 }
 0x561   : > { %v1176_v43 = vmul.f32 %v2681_v41, %v2673_v27 }
 0x563   : > { %v1179_v44 = vpack.c.bf16 %v1176_v43, %v1175_v42 }
 0x565   : > { %2493 = vmatmul.mubr.msk.bf16.vlgmr.msra.gmra.mrb[4].mxu1 %vm908_vm0, %v1179_v44 }
 0x566   : > { %2504 = vmatprep.mubr.msk.bf16.mxu1 %vm2768_vm1, %v2767_v15  ;;  %2503 = vmatpush3.bf16.msra.mxu1 %v2652_v45 }
 0x567   : > { %2514 = vmatprep.subr.bf16.mxu1 %v2767_v15 }
 0x62e   : > { %v1268_v46 = vpop.f32.mrb[8].mxu0 }
 0x62f   : > { %v2500_v47 = vpop.f32.mrb[9].mxu0 }
 0x630   : > { %v1271_v48 = vpop.f32.mrb[10].mxu0 }
 0x631   : > { %v2631_v49 = vpack.i.bf16 %v1271_v48, %v1268_v46  ;;  %v2501_v50 = vpop.f32.mrb[11].mxu0 }
 0x633   : > { %2632 = vrot.lane.b32.xlu0 %v2631_v49, %s2772_s22 }
 0x638   : > { %v1221_v51 = vpop.f32.mrb[4].mxu1 }
 0x639   : > { %v2494_v52 = vpop.f32.mrb[5].mxu1 }
 0x63a   : > { %v1224_v53 = vpop.f32.mrb[6].mxu1 }
 0x63b   : > { %v2495_v54 = vpop.f32.mrb[7].mxu1 }
 0x6a5   : > { %v2633_v55 = vpop.permute.xlu0 %2632 }
 0x6a6   : > { %v2635_v56 = vunpack.i.h.bf16 %v2633_v55  ;;  %v2634_v57 = vunpack.i.l.bf16 %v2633_v55 }
 0x6a8   : > { %v1284_v58 = vsel %vm1037_vm2, %v1224_v53, %v2635_v56  ;;  %v1283_v59 = vsel %vm1037_vm2, %v1221_v51, %v2634_v57 }
 0x6a9   : > { %v1285_v60 = vpack.c.bf16 %v1284_v58, %v1283_v59 }
 0x6ab   : > { %2505 = vmatmul.mubr.msk.bf16.vlgmr.msra.gmra.mrb[8].mxu1 %vm908_vm0, %v1285_v60 }
 0x6ac   : > { %2518 = vmatprep.mubr.msk.bf16.mxu1 %vm2768_vm1, %v2767_v15  ;;  %2515 = vmatpush3.bf16.msra.mxu1 %v2654_v37 }
 0x6ad   : > { %2516 = vmatprep.subr.bf16.mxu1 %v2767_v15 }
 0x6b0   : > { %2517 = vmatpush3.bf16.msra.mxu1 %v2655_v38 }
 0x6b1   : > { %2528 = vmatprep.subr.bf16.mxu1 %v2767_v15 }
 0x77e   : > { %v1338_v62 = vpop.f32.mrb[8].mxu1 }
 0x77f   : > { %v1339_v63 = vadd.f32 %v2392_v61, %v1338_v62  ;;  %v2506_v2 = vpop.f32.mrb[9].mxu1 }
 0x780   : > { %v1341_v3 = vpop.f32.mrb[10].mxu1 }
 0x781   : > { %v3018_v4 = vadd.f32 %v1339_v63, %v2942_v0  ;;  %v1342_v5 = vadd.f32 %v2392_v61, %v1341_v3  ;;  %v2507_v6 = vpop.f32.mrb[11].mxu1  ;;  %v2400_v3 = vld [vmem:[%s2841_s30] ss:$0 sm:$0xff] }
 0x783   : > { %v3021_v7 = vadd.f32 %v1342_v5, %v2944_v1  ;;  %v1349_v8 = vsel %vm908_vm0, %v3018_v4, 0.0 }
 0x784   : > { %1350 = vadd.xlane.f32.xlu1 %v1349_v8 }
 0x785   : > { %v1352_v9 = vsel %vm908_vm0, %v3021_v7, 0.0 }
 0x786   : > { %1353 = vadd.xlane.f32.xlu0 %v1352_v9 }
 0x811   : > { %v1351_v10 = vpop.xlane.xlu1 %1350 }
 0x812   : > { %v1355_v11 = vmul.f32 0.0625, %v1351_v10 }
 0x813   : > { %v1354_v12 = vpop.xlane.xlu0 %1353 }
 0x814   : > { %v1357_v0 = vsub.f32 %v3018_v4, %v1355_v11  ;;  %v1356_v13 = vmul.f32 0.0625, %v1354_v12 }
 0x816   : > { %v1358_v14 = vsub.f32 %v3021_v7, %v1356_v13  ;;  %v1359_v16 = vmul.f32 %v1357_v0, %v1357_v0 }
 0x818   : > { %v1361_v1 = vsel %vm908_vm0, %v1359_v16, 0.0  ;;  %v1360_v17 = vmul.f32 %v1358_v14, %v1358_v14 }
 0x819   : > { %1362 = vadd.xlane.f32.xlu0 %v1361_v1 }
 0x81a   : > { %v1364_v18 = vsel %vm908_vm0, %v1360_v17, 0.0 }
 0x81d   : > { %1365 = vadd.xlane.f32.xlu0 %v1364_v18 }
 0x8a6   : > { %v1363_v20 = vpop.xlane.xlu0 %1362 }
 0x8a7   : > { %v1367_v21 = vmul.f32 0.0625, %v1363_v20 }
 0x8a9   : > { %v1369_v22 = vadd.f32 1e-05, %v1367_v21 }
 0x8aa   : > { %v1366_v23 = vpop.xlane.xlu0 %1365 }
 0x8ab   : > { %2682 = vrsqrt.f32 %v1369_v22  ;;  %v1368_v24 = vmul.f32 0.0625, %v1366_v23  ;;  %v2656_v23 = vld [vmem:[%s2856_s20] sm:$0xff]  }
 0x8ad   : > { %v1370_v25 = vadd.f32 1e-05, %v1368_v24 }
 0x8af   : > { %2684 = vrsqrt.f32 %v1370_v25 }
 0x8b5   : > { %v2683_v26 = vpop.eup %2682 }
 0x8b6   : > { %v1373_v27 = vmul.f32 %v2683_v26, %v1357_v0 }
 0x8b8   : > { %v1381_v30 = vmul.f32 %v2395_v28, %v1373_v27 }
 0x8b9   : > { %v2685_v29 = vpop.eup %2684 }
 0x8ba   : > { %v1374_v31 = vmul.f32 %v2685_v29, %v1358_v14  ;;  %v1389_v34 = vadd.f32 %v2396_v32, %v1381_v30 }
 0x8bc   : > { %v1382_v33 = vmul.f32 %v2395_v28, %v1374_v31  ;;  %v2404_v31 = vld [vmem:[%s3172_s23] ss:$0 sm:$0xff]  ;;  %s3182_s23 = sld [smem:[#allocation12_spill]] }
 0x8be   : > { %v1390_v35 = vadd.f32 %v2396_v32, %v1382_v33 }
 0x8c0   : > { %v1391_v36 = vpack.c.bf16 %v1390_v35, %v1389_v34 }
 0x8c2   : > { %2511 = vmatmul.mubr.msk.bf16.vlgmr.msra.gmra.mrb[12].mxu0 %vm908_vm0, %v1391_v36  ;;  %v2405_v36 = vld [vmem:[%s3173_s26] ss:$0 sm:$0xff]  ;;  %s3183_s26 = sld [smem:[#allocation13_spill]] }
 0x8c3   : > { %2524 = vmatprep.mubr.msk.bf16.mxu0 %vm2768_vm1, %v2767_v15  ;;  %2523 = vmatpush3.bf16.msra.mxu0 %v2656_v23 }
 0x8c4   : > { %2534 = vmatprep.subr.bf16.mxu0 %v2767_v15 }
 0x995   : > { %v1444_v40 = vpop.f32.mrb[12].mxu0 }
 0x996   : > { %v1445_v41 = vadd.f32 %v2397_v39, %v1444_v40  ;;  %v2512_v42 = vpop.f32.mrb[13].mxu0 }
 0x997   : > { %v1447_v43 = vpop.f32.mrb[14].mxu0 }
 0x998   : > { %v1451_v44 = vmul.f32 %v1445_v41, %v1445_v41  ;;  %v1448_v45 = vadd.f32 %v2397_v39, %v1447_v43  ;;  %v2513_v46 = vpop.f32.mrb[15].mxu0 }
 0x99a   : > { %v1453_v47 = vmul.f32 %v1451_v44, %v1445_v41  ;;  %v1452_v48 = vmul.f32 %v1448_v45, %v1448_v45 }
 0x99c   : > { %v1455_v49 = vmul.f32 0.044715, %v1453_v47  ;;  %v1454_v50 = vmul.f32 %v1452_v48, %v1448_v45 }
 0x99e   : > { %v1457_v51 = vadd.f32 %v1455_v49, %v1445_v41  ;;  %v1456_v52 = vmul.f32 0.044715, %v1454_v50 }
 0x9a0   : > { %v1459_v53 = vmul.f32 0.7978846, %v1457_v51  ;;  %v1458_v54 = vadd.f32 %v1456_v52, %v1448_v45 }
 0x9a2   : > { %2686 = vtanh.f32 %v1459_v53  ;;  %v1460_v55 = vmul.f32 0.7978846, %v1458_v54 }
 0x9a4   : > { %2688 = vtanh.f32 %v1460_v55 }
 0x9ac   : > { %v2687_v56 = vpop.eup %2686 }
 0x9ad   : > { %v1463_v57 = vadd.f32 1.0, %v2687_v56 }
 0x9ae   : > { %v2689_v58 = vpop.eup %2688 }
 0x9af   : > { %v1465_v59 = vmul.f32 0.5, %v1463_v57  ;;  %v1464_v60 = vadd.f32 1.0, %v2689_v58 }
 0x9b1   : > { %v1466_v61 = vmul.f32 0.5, %v1464_v60  ;;  %v1467_v62 = vmul.f32 %v1465_v59, %v1445_v41  ;;  %v2406_v41 = vld [vmem:[%s3174_s28] ss:$0 sm:$0xff]  ;;  %s902_s28 = scalar_lea.vmem %s2926_s4, %s2434_s0 }
 0x9b3   : > { %v1468_v63 = vmul.f32 %v1466_v61, %v1448_v45 }
 0x9b5   : > { %v1469_v2 = vpack.c.bf16 %v1468_v63, %v1467_v62 }
 0x9b7   : > { %2519 = vmatmul.mubr.msk.bf16.vlgmr.msra.gmra.mrb[12].mxu1 %vm1493_vm3, %v1469_v2 }
 0x9b8   : > { %2530 = vmatprep.mubr.msk.bf16.mxu1 %vm2768_vm1, %v2767_v15 }
 0xa8a   : > { %v1531_v5 = vpop.f32.mrb[12].mxu1 }
 0xa8b   : > { %v1532_v6 = vadd.f32 %v2400_v3, %v1531_v5  ;;  %v2520_v8 = vpop.f32.mrb[13].mxu1 }
 0xa8c   : > { %v1534_v9 = vpop.f32.mrb[14].mxu1 }
 0xa8d   : > { %v3048_v10 = vadd.f32 %v1532_v6, %v3018_v4  ;;  %v1535_v11 = vadd.f32 %v2400_v3, %v1534_v9  ;;  %v2521_v12 = vpop.f32.mrb[15].mxu1 }
 0xa8f   : > { %v3051_v0 = vadd.f32 %v1535_v11, %v3021_v7  ;;  %v1542_v13 = vsel %vm908_vm0, %v3048_v10, 0.0 }
 0xa90   : > { %1543 = vadd.xlane.f32.xlu1 %v1542_v13 }
 0xa91   : > { %v1545_v14 = vsel %vm908_vm0, %v3051_v0, 0.0 }
 0xa92   : > { %1546 = vadd.xlane.f32.xlu0 %v1545_v14 }
 0xb1d   : > { %v1544_v16 = vpop.xlane.xlu1 %1543 }
 0xb1e   : > { %v1548_v1 = vmul.f32 0.0625, %v1544_v16 }
 0xb1f   : > { %v1547_v17 = vpop.xlane.xlu0 %1546 }
 0xb20   : > { %v1550_v4 = vsub.f32 %v3048_v10, %v1548_v1  ;;  %v1549_v18 = vmul.f32 0.0625, %v1547_v17 }
 0xb22   : > { %v1551_v19 = vsub.f32 %v3051_v0, %v1549_v18  ;;  %v1552_v20 = vmul.f32 %v1550_v4, %v1550_v4 }
 0xb24   : > { %v1554_v7 = vsel %vm908_vm0, %v1552_v20, 0.0  ;;  %v1553_v21 = vmul.f32 %v1551_v19, %v1551_v19 }
 0xb25   : > { %1555 = vadd.xlane.f32.xlu1 %v1554_v7 }
 0xb26   : > { %v1557_v22 = vsel %vm908_vm0, %v1553_v21, 0.0 }
 0xb27   : > { %1558 = vadd.xlane.f32.xlu0 %v1557_v22 }
 0xbb2   : > { %v1556_v24 = vpop.xlane.xlu1 %1555 }
 0xbb3   : > { %v1560_v25 = vmul.f32 0.0625, %v1556_v24 }
 0xbb4   : > { %v1559_v26 = vpop.xlane.xlu0 %1558 }
 0xbb5   : > { %v1562_v27 = vadd.f32 1e-05, %v1560_v25  ;;  %v1561_v28 = vmul.f32 0.0625, %v1559_v26 }
 0xbb7   : > { %2690 = vrsqrt.f32 %v1562_v27  ;;  %v1563_v29 = vadd.f32 1e-05, %v1561_v28 }
 0xbb9   : > { %2692 = vrsqrt.f32 %v1563_v29 }
 0xbc1   : > { %v2691_v30 = vpop.eup %2690 }
 0xbc2   : > { %v1566_v32 = vmul.f32 %v2691_v30, %v1550_v4 }
 0xbc3   : > { %v2693_v33 = vpop.eup %2692 }
 0xbc4   : > { %v1574_v34 = vmul.f32 %v2404_v31, %v1566_v32  ;;  %v1567_v35 = vmul.f32 %v2693_v33, %v1551_v19 }
 0xbc6   : > { %v1575_v37 = vmul.f32 %v2404_v31, %v1567_v35  ;;  %v1582_v38 = vadd.f32 %v2405_v36, %v1574_v34 }
 0xbc8   : > { %v1583_v39 = vadd.f32 %v2405_v36, %v1575_v37 }
 0xbca   : > { %v1584_v40 = vpack.c.bf16 %v1583_v39, %v1582_v38 }
 0xbcc   : > { %2525 = vmatmul.mubr.msk.bf16.vlgmr.msra.gmra.mrb[16].mxu0 %vm908_vm0, %v1584_v40 }
 0xbcd   : > { %2536 = vmatprep.mubr.msk.bf16.mxu0 %vm2768_vm1, %v2767_v15 }
 0xc9f   : > { %v1637_v42 = vpop.f32.mrb[16].mxu0 }
 0xca0   : > { %v1638_v43 = vadd.f32 %v2406_v41, %v1637_v42  ;;  %v2526_v44 = vpop.f32.mrb[17].mxu0 }
 0xca1   : > { %v1640_v45 = vpop.f32.mrb[18].mxu0 }
 0xca2   : > { %v1641_v46 = vadd.f32 %v2406_v41, %v1640_v45  ;;  %v2527_v47 = vpop.f32.mrb[19].mxu0  ;;  %v1644_v48 = vmul.f32 0.35355338, %v1638_v43 }
 0xca4   : > { %v1645_v49 = vmul.f32 0.35355338, %v1641_v46  ;;  %v2636_v50 = vpack.i.bf16 %v1641_v46, %v1638_v43  ;;  %v3069_v51 = vpack.c.bf16 %v1641_v46, %v1638_v43 }
 0xca6   : > { %v1654_v52 = vpack.c.bf16 %v1645_v49, %v1644_v48  ;;  %2637 = vrot.lane.b32.xlu1 %v2636_v50, %s2769_s15  ;;  %v2641_v53 = vpack.i.bf16 %v1645_v49, %v1644_v48 }
 0xcaa   : > { %2642 = vrot.lane.b32.xlu1 %v2641_v53, %s2769_s15  ;;  %v2657_v53 = vld [vmem:[%s3175_s1] sm:$0xff]   ;;  %s3178_s15 = sld [smem:[#allocation7_spill]] }
 0xcae   : > { %1667 = vrot.lane.b32.xlu1 %v3069_v51, %s2770_s16 }
 0xd18   : > { %v2638_v54 = vpop.permute.xlu1 %2637 }
 0xd19   : > { %v2640_v55 = vunpack.i.h.bf16 %v2638_v54  ;;  %v2639_v56 = vunpack.i.l.bf16 %v2638_v54 }
 0xd1b   : > { %v1665_v57 = vpack.c.bf16 %v2640_v55, %v2639_v56 }
 0xd1c   : > { %v2643_v58 = vpop.permute.xlu1 %2642 }
 0xd1d   : > { %1717 = vrot.lane.b32.xlu0 %v1665_v57, %s2770_s16  ;;  %v2645_v63 = vunpack.i.h.bf16 %v2643_v58  ;;  %v2644_v2 = vunpack.i.l.bf16 %v2643_v58  ;;  %s3179_s16 = sld [smem:[#allocation8_spill]] }
 0xd1f   : > { %v1655_v3 = vpack.c.bf16 %v2645_v63, %v2644_v2 }
 0xd20   : > { %v1668_v59 = vpop.permute.xlu1 %1667 }
 0xd21   : > { %v1673_v60 = vsel %vm1037_vm2, %v1668_v59, 0 }
 0xd22   : > { %2529 = vmatpush3.bf16.xpose.msra.mxu1 %v1673_v60 }
 0xd23   : > { %2540 = vmatprep.subr.bf16.mxu1 %v2767_v15 }
 0xd29   : > { %2531 = vmatmul.mubr.msk.bf16.vlgmr.msra.gmra.mrb[16].mxu1 %vm1037_vm2, %v1654_v52 }
 0xd2a   : > { %2542 = vmatprep.mubr.msk.bf16.mxu1 %vm2768_vm1, %v2767_v15 }
 0xd8f   : > { %v1718_v61 = vpop.permute.xlu0 %1717 }
 0xd90   : > { %v1723_v62 = vsel %vm1037_vm2, %v1718_v61, 0 }
 0xd91   : > { %2535 = vmatpush3.bf16.xpose.msra.mxu0 %v1723_v62 }
 0xd92   : > { %2546 = vmatprep.subr.bf16.mxu0 %v2767_v15 }
 0xd98   : > { %2537 = vmatmul.mubr.msk.bf16.vlgmr.msra.gmra.mrb[20].mxu0 %vm1037_vm2, %v1655_v3 }
 0xd99   : > { %2548 = vmatprep.mubr.msk.bf16.mxu0 %vm2768_vm1, %v2767_v15 }
 0xdfc   : > { %v1709_v5 = vpop.f32.mrb[16].mxu1 }
 0xdfd   : > { %v2532_v6 = vpop.f32.mrb[17].mxu1  ;;  %v1766_v17 = vsel %vm908_vm0, %v1709_v5, -inf }
 0xdfe   : > { %v1712_v8 = vpop.f32.mrb[18].mxu1 }
 0xdff   : > { %v2533_v9 = vpop.f32.mrb[19].mxu1  ;;  %v1769_v4 = vsel %vm908_vm0, %v1712_v8, -inf }
 0xe00   : > { %v2413_v9 = vld [vmem:[%s3176_s2] ss:$0 sm:$0xff] }
 0xe6b   : > { %v1759_v11 = vpop.f32.mrb[20].mxu0 }
 0xe6c   : > { %v2538_v12 = vpop.f32.mrb[21].mxu0  ;;  %v1772_v13 = vsel %vm908_vm0, %v1759_v11, -inf }
 0xe6d   : > { %1773 = vmax.xlane.f32.xlu1 %v1772_v13  ;;  %v1762_v14 = vpop.f32.mrb[22].mxu0 }
 0xe6e   : > { %v2539_v16 = vpop.f32.mrb[23].mxu0  ;;  %v1775_v1 = vsel %vm908_vm0, %v1762_v14, -inf }
 0xe6f   : > { %1776 = vmax.xlane.f32.xlu0 %v1775_v1 }
 0xe73   : > { %1767 = vmax.xlane.f32.xlu0 %v1766_v17 }
 0xe77   : > { %1770 = vmax.xlane.f32.xlu0 %v1769_v4 }
 0xefa   : > { %v1774_v18 = vpop.xlane.xlu1 %1773 }
 0xefb   : > { %v1780_v19 = vsub.f32 %v1759_v11, %v1774_v18 }
 0xefc   : > { %v1777_v20 = vpop.xlane.xlu0 %1776 }
 0xefd   : > { %v1786_v7 = vmul.f32 1.442695, %v1780_v19  ;;  %v1781_v21 = vsub.f32 %v1762_v14, %v1777_v20 }
 0xeff   : > { %2694 = vpow2.f32 %v1786_v7  ;;  %v1788_v22 = vmul.f32 1.442695, %v1781_v21 }
 0xf00   : > { %v1768_v23 = vpop.xlane.xlu0 %1767 }
 0xf01   : > { %2696 = vpow2.f32 %v1788_v22  ;;  %v1778_v24 = vsub.f32 %v1709_v5, %v1768_v23 }
 0xf03   : > { %v1782_v25 = vmul.f32 1.442695, %v1778_v24 }
 0xf04   : > { %v1771_v26 = vpop.xlane.xlu0 %1770 }
 0xf05   : > { %2698 = vpow2.f32 %v1782_v25  ;;  %v1779_v27 = vsub.f32 %v1712_v8, %v1771_v26 }
 0xf07   : > { %v1784_v28 = vmul.f32 1.442695, %v1779_v27  ;;  %v2658_v27 = vld [vmem:[%s3177_s11] sm:$0xff]  }
 0xf09   : > { %v2695_v29 = vpop.eup %2694  ;;  %2700 = vpow2.f32 %v1784_v28 }
 0xf0a   : > { %v1796_v30 = vsel %vm908_vm0, %v2695_v29, 0.0 }
 0xf0b   : > { %v2697_v31 = vpop.eup %2696  ;;  %1797 = vadd.xlane.f32.xlu1 %v1796_v30 }
 0xf0c   : > { %v1799_v32 = vsel %vm908_vm0, %v2697_v31, 0.0 }
 0xf0d   : > { %1800 = vadd.xlane.f32.xlu0 %v1799_v32 }
 0xf0f   : > { %v2699_v33 = vpop.eup %2698 }
 0xf10   : > { %v1790_v34 = vsel %vm908_vm0, %v2699_v33, 0.0 }
 0xf11   : > { %1791 = vadd.xlane.f32.xlu0 %v1790_v34 }
 0xf13   : > { %v2701_v35 = vpop.eup %2700 }
 0xf14   : > { %v1793_v36 = vsel %vm908_vm0, %v2701_v35, 0.0 }
 0xf15   : > { %1794 = vadd.xlane.f32.xlu0 %v1793_v36  ;;  %v2416_v36 = vld [vmem:[%s3178_s15] ss:$0 sm:$0xff] }
 0xf1c   : > { %1859 = vrot.lane.b32.xlu1 %v1665_v57, %s2771_s18 }
 0xf2b   : > { %1812 = vrot.lane.b32.xlu0 %v3069_v51, %s2771_s18  ;;  %s3180_s18 = sld [smem:[#allocation11_spill]] }
 0xf98   : > { %v1798_v37 = vpop.xlane.xlu1 %1797 }
 0xf99   : > { %2702 = vrcp.f32 %v1798_v37 }
 0xf9a   : > { %v1801_v38 = vpop.xlane.xlu0 %1800 }
 0xf9b   : > { %2704 = vrcp.f32 %v1801_v38 }
 0xf9c   : > { %v1860_v39 = vpop.permute.xlu1 %1859 }
 0xf9d   : > { %2547 = vmatpush3.bf16.msra.mxu0 %v1860_v39 }
 0xf9e   : > { %v1792_v40 = vpop.xlane.xlu0 %1791  ;;  %2558 = vmatprep.subr.bf16.mxu0 %v2767_v15 }
 0xf9f   : > { %2706 = vrcp.f32 %v1792_v40  ;;  %v2417_v40 = vld [vmem:[%s3179_s16] ss:$0 sm:$0xff] }
 0xfa2   : > { %v1795_v41 = vpop.xlane.xlu0 %1794 }
 0xfa3   : > { %v2703_v42 = vpop.eup %2702  ;;  %2708 = vrcp.f32 %v1795_v41 }
 0xfa4   : > { %v1808_v44 = vmul.f32 %v2703_v42, %v2695_v29 }
 0xfa5   : > { %v2705_v43 = vpop.eup %2704 }
 0xfa6   : > { %v1809_v45 = vmul.f32 %v2705_v43, %v2697_v31  ;;  %v1813_v46 = vpop.permute.xlu0 %1812 }
 0xfa7   : > { %2541 = vmatpush3.bf16.msra.mxu1 %v1813_v46  ;;  %v2660_v46 = vld [vmem:[%s3180_s18 + $0x8] sm:$0xff]  }
 0xfa8   : > { %v1811_v47 = vpack.c.bf16 %v1809_v45, %v1808_v44  ;;  %2552 = vmatprep.subr.bf16.mxu1 %v2767_v15  ;;  %v2659_v45 = vld [vmem:[%s3180_s18] sm:$0xff]  }
 0xfa9   : > { %v2707_v48 = vpop.eup %2706 }
 0xfaa   : > { %2549 = vmatmul.mubr.msk.bf16.vlgmr.msra.gmra.mrb[24].mxu0 %vm908_vm0, %v1811_v47  ;;  %v1806_v50 = vmul.f32 %v2707_v48, %v2699_v33 }
 0xfab   : > { %2560 = vmatprep.mubr.msk.bf16.mxu0 %vm2768_vm1, %v2767_v15  ;;  %2559 = vmatpush3.bf16.msra.mxu0 %v2658_v27 }
 0xfac   : > { %2572 = vmatprep.subr.bf16.mxu0 %v2767_v15 }
 0xfad   : > { %v2709_v49 = vpop.eup %2708 }
 0xfae   : > { %v1807_v51 = vmul.f32 %v2709_v49, %v2701_v35 }
 0xfb0   : > { %v1810_v52 = vpack.c.bf16 %v1807_v51, %v1806_v50 }
 0xfb2   : > { %2543 = vmatmul.mubr.msk.bf16.vlgmr.msra.gmra.mrb[20].mxu1 %vm908_vm0, %v1810_v52 }
 0xfb3   : > { %2554 = vmatprep.mubr.msk.bf16.mxu1 %vm2768_vm1, %v2767_v15  ;;  %2553 = vmatpush3.bf16.msra.mxu1 %v2657_v53 }
 0xfb4   : > { %2564 = vmatprep.subr.bf16.mxu1 %v2767_v15 }
0x107d   : > { %v1899_v54 = vpop.f32.mrb[24].mxu0 }
0x107e   : > { %v2550_v55 = vpop.f32.mrb[25].mxu0 }
0x107f   : > { %v1902_v56 = vpop.f32.mrb[26].mxu0 }
0x1080   : > { %v2646_v57 = vpack.i.bf16 %v1902_v56, %v1899_v54  ;;  %v2551_v58 = vpop.f32.mrb[27].mxu0 }
0x1082   : > { %2647 = vrot.lane.b32.xlu1 %v2646_v57, %s2772_s22  ;;  %s3181_s22 = sld [smem:[#allocation10_spill]] }
0x1085   : > { %v1852_v59 = vpop.f32.mrb[20].mxu1 }
0x1086   : > { %v2544_v60 = vpop.f32.mrb[21].mxu1 }
0x1087   : > { %v1855_v61 = vpop.f32.mrb[22].mxu1 }
0x1088   : > { %v2545_v62 = vpop.f32.mrb[23].mxu1  ;;  %v2418_v47 = vld [vmem:[%s3181_s22] ss:$0 sm:$0xff] }
0x10f4   : > { %v2648_v63 = vpop.permute.xlu1 %2647 }
0x10f5   : > { %v2650_v2 = vunpack.i.h.bf16 %v2648_v63  ;;  %v2649_v3 = vunpack.i.l.bf16 %v2648_v63 }
0x10f7   : > { %v1915_v5 = vsel %vm1037_vm2, %v1855_v61, %v2650_v2  ;;  %v1914_v6 = vsel %vm1037_vm2, %v1852_v59, %v2649_v3 }
0x10f8   : > { %v1916_v8 = vpack.c.bf16 %v1915_v5, %v1914_v6 }
0x10fa   : > { %2555 = vmatmul.mubr.msk.bf16.vlgmr.msra.gmra.mrb[24].mxu1 %vm908_vm0, %v1916_v8 }
0x10fb   : > { %2568 = vmatprep.mubr.msk.bf16.mxu1 %vm2768_vm1, %v2767_v15  ;;  %2565 = vmatpush3.bf16.msra.mxu1 %v2659_v45 }
0x10fc   : > { %2566 = vmatprep.subr.bf16.mxu1 %v2767_v15 }
0x10ff   : > { %2567 = vmatpush3.bf16.msra.mxu1 %v2660_v46 }
0x11cd   : > { %v1969_v11 = vpop.f32.mrb[24].mxu1 }
0x11ce   : > { %v1970_v12 = vadd.f32 %v2413_v9, %v1969_v11  ;;  %v2556_v13 = vpop.f32.mrb[25].mxu1 }
0x11cf   : > { %v1972_v14 = vpop.f32.mrb[26].mxu1  ;;  %v2421_v13 = vld [vmem:[%s3182_s23] ss:$0 sm:$0xff] }
0x11d0   : > { %v3115_v16 = vadd.f32 %v1970_v12, %v3048_v10  ;;  %v1973_v1 = vadd.f32 %v2413_v9, %v1972_v14  ;;  %v2557_v17 = vpop.f32.mrb[27].mxu1 }
0x11d2   : > { %v3118_v4 = vadd.f32 %v1973_v1, %v3051_v0  ;;  %v1980_v18 = vsel %vm908_vm0, %v3115_v16, 0.0 }
0x11d3   : > { %1981 = vadd.xlane.f32.xlu1 %v1980_v18 }
0x11d4   : > { %v1983_v19 = vsel %vm908_vm0, %v3118_v4, 0.0 }
0x11d5   : > { %1984 = vadd.xlane.f32.xlu0 %v1983_v19 }
0x1260   : > { %v1982_v20 = vpop.xlane.xlu1 %1981 }
0x1261   : > { %v1986_v7 = vmul.f32 0.0625, %v1982_v20 }
0x1262   : > { %v1985_v21 = vpop.xlane.xlu0 %1984 }
0x1263   : > { %v1988_v10 = vsub.f32 %v3115_v16, %v1986_v7  ;;  %v1987_v22 = vmul.f32 0.0625, %v1985_v21 }
0x1265   : > { %v1989_v23 = vsub.f32 %v3118_v4, %v1987_v22  ;;  %v1990_v24 = vmul.f32 %v1988_v10, %v1988_v10 }
0x1267   : > { %v1992_v0 = vsel %vm908_vm0, %v1990_v24, 0.0  ;;  %v1991_v25 = vmul.f32 %v1989_v23, %v1989_v23 }
0x1268   : > { %1993 = vadd.xlane.f32.xlu1 %v1992_v0 }
0x1269   : > { %v1995_v26 = vsel %vm908_vm0, %v1991_v25, 0.0 }
0x126c   : > { %1996 = vadd.xlane.f32.xlu1 %v1995_v26 }
0x12f5   : > { %v1994_v28 = vpop.xlane.xlu1 %1993 }
0x12f6   : > { %v1998_v29 = vmul.f32 0.0625, %v1994_v28 }
0x12f8   : > { %v2000_v30 = vadd.f32 1e-05, %v1998_v29 }
0x12f9   : > { %v1997_v31 = vpop.xlane.xlu1 %1996 }
0x12fa   : > { %2710 = vrsqrt.f32 %v2000_v30  ;;  %v1999_v32 = vmul.f32 0.0625, %v1997_v31 }
0x12fc   : > { %v2001_v33 = vadd.f32 1e-05, %v1999_v32 }
0x12fe   : > { %2712 = vrsqrt.f32 %v2001_v33 }
0x1304   : > { %v2711_v34 = vpop.eup %2710 }
0x1305   : > { %v2004_v35 = vmul.f32 %v2711_v34, %v1988_v10 }
0x1307   : > { %v2012_v38 = vmul.f32 %v2416_v36, %v2004_v35 }
0x1308   : > { %v2713_v37 = vpop.eup %2712 }
0x1309   : > { %v2005_v39 = vmul.f32 %v2713_v37, %v1989_v23  ;;  %v2020_v42 = vadd.f32 %v2417_v40, %v2012_v38  ;;  %v2425_v38 = vld [vmem:[%s3183_s26] ss:$0 sm:$0xff] }
0x130b   : > { %v2013_v41 = vmul.f32 %v2416_v36, %v2005_v39 }
0x130d   : > { %v2021_v43 = vadd.f32 %v2417_v40, %v2013_v41 }
0x130f   : > { %v2022_v44 = vpack.c.bf16 %v2021_v43, %v2020_v42  ;;  %v2426_v43 = vld [vmem:[%s2911_s12] ss:$0 sm:$0xff] }
0x1311   : > { %2561 = vmatmul.mubr.msk.bf16.vlgmr.msra.gmra.mrb[28].mxu0 %vm908_vm0, %v2022_v44 }
0x1312   : > { %2574 = vmatprep.mubr.msk.bf16.mxu0 %vm2768_vm1, %v2767_v15 }
0x13e4   : > { %v2075_v48 = vpop.f32.mrb[28].mxu0 }
0x13e5   : > { %v2076_v49 = vadd.f32 %v2418_v47, %v2075_v48  ;;  %v2562_v50 = vpop.f32.mrb[29].mxu0  ;;  %v2427_v48 = vld [vmem:[%s2921_s27] ss:$0 sm:$0xff] }
0x13e6   : > { %v2078_v51 = vpop.f32.mrb[30].mxu0 }
0x13e7   : > { %v2082_v52 = vmul.f32 %v2076_v49, %v2076_v49  ;;  %v2079_v53 = vadd.f32 %v2418_v47, %v2078_v51  ;;  %v2563_v54 = vpop.f32.mrb[31].mxu0 }
0x13e9   : > { %v2084_v55 = vmul.f32 %v2082_v52, %v2076_v49  ;;  %v2083_v56 = vmul.f32 %v2079_v53, %v2079_v53 }
0x13eb   : > { %v2086_v57 = vmul.f32 0.044715, %v2084_v55  ;;  %v2085_v58 = vmul.f32 %v2083_v56, %v2079_v53 }
0x13ed   : > { %v2088_v59 = vadd.f32 %v2086_v57, %v2076_v49  ;;  %v2087_v60 = vmul.f32 0.044715, %v2085_v58 }
0x13ef   : > { %v2090_v61 = vmul.f32 0.7978846, %v2088_v59  ;;  %v2089_v62 = vadd.f32 %v2087_v60, %v2079_v53 }
0x13f1   : > { %2714 = vtanh.f32 %v2090_v61  ;;  %v2091_v15 = vmul.f32 0.7978846, %v2089_v62 }
0x13f3   : > { %2716 = vtanh.f32 %v2091_v15 }
0x13fb   : > { %v2715_v63 = vpop.eup %2714 }
0x13fc   : > { %v2094_v2 = vadd.f32 1.0, %v2715_v63 }
0x13fd   : > { %v2717_v3 = vpop.eup %2716 }
0x13fe   : > { %v2096_v5 = vmul.f32 0.5, %v2094_v2  ;;  %v2095_v6 = vadd.f32 1.0, %v2717_v3 }
0x1400   : > { %v2097_v8 = vmul.f32 0.5, %v2095_v6  ;;  %v2098_v9 = vmul.f32 %v2096_v5, %v2076_v49 }
0x1402   : > { %v2099_v11 = vmul.f32 %v2097_v8, %v2079_v53 }
0x1404   : > { %v2100_v12 = vpack.c.bf16 %v2099_v11, %v2098_v9 }
0x1406   : > { %2569 = vmatmul.mubr.msk.bf16.vlgmr.msra.gmra.mrb[28].mxu1 %vm1493_vm3, %v2100_v12 }
0x14d9   : > { %v2161_v14 = vpop.f32.mrb[28].mxu1 }
0x14da   : > { %v2162_v1 = vadd.f32 %v2421_v13, %v2161_v14  ;;  %v2570_v17 = vpop.f32.mrb[29].mxu1 }
0x14db   : > { %v2164_v18 = vpop.f32.mrb[30].mxu1 }
0x14dc   : > { %v2165_v19 = vadd.f32 %v2421_v13, %v2164_v18  ;;  %v2571_v20 = vpop.f32.mrb[31].mxu1  ;;  %v2168_v7 = vadd.f32 %v2162_v1, %v3115_v16 }
0x14de   : > { %v2172_v21 = vsel %vm908_vm0, %v2168_v7, 0.0  ;;  %v2169_v10 = vadd.f32 %v2165_v19, %v3118_v4  ;;  %v2661_v4 = vld [vmem:[%s2916_s6] sm:$0xff]  }
0x14df   : > { %2173 = vadd.xlane.f32.xlu0 %v2172_v21  ;;  %2573 = vmatpush3.bf16.msra.mxu0 %v2661_v4 }
0x14e0   : > { %v2175_v22 = vsel %vm908_vm0, %v2169_v10, 0.0 }
0x14e1   : > { %2176 = vadd.xlane.f32.xlu1 %v2175_v22 }
0x156c   : > { %v2174_v23 = vpop.xlane.xlu0 %2173 }
0x156d   : > { %v2178_v24 = vmul.f32 0.0625, %v2174_v23 }
0x156e   : > { %v2177_v0 = vpop.xlane.xlu1 %2176 }
0x156f   : > { %v2180_v25 = vsub.f32 %v2168_v7, %v2178_v24  ;;  %v2179_v26 = vmul.f32 0.0625, %v2177_v0 }
0x1571   : > { %v2181_v27 = vsub.f32 %v2169_v10, %v2179_v26  ;;  %v2182_v28 = vmul.f32 %v2180_v25, %v2180_v25 }
0x1573   : > { %v2184_v29 = vsel %vm908_vm0, %v2182_v28, 0.0  ;;  %v2183_v16 = vmul.f32 %v2181_v27, %v2181_v27 }
0x1574   : > { %2185 = vadd.xlane.f32.xlu0 %v2184_v29 }
0x1575   : > { %v2187_v30 = vsel %vm908_vm0, %v2183_v16, 0.0 }
0x1576   : > { %2188 = vadd.xlane.f32.xlu1 %v2187_v30 }
0x1601   : > { %v2186_v31 = vpop.xlane.xlu0 %2185 }
0x1602   : > { %v2190_v32 = vmul.f32 0.0625, %v2186_v31 }
0x1603   : > { %v2189_v33 = vpop.xlane.xlu1 %2188 }
0x1604   : > { %v2192_v34 = vadd.f32 1e-05, %v2190_v32  ;;  %v2191_v35 = vmul.f32 0.0625, %v2189_v33 }
0x1606   : > { %2718 = vrsqrt.f32 %v2192_v34  ;;  %v2193_v36 = vadd.f32 1e-05, %v2191_v35 }
0x1608   : > { %2720 = vrsqrt.f32 %v2193_v36 }
0x1610   : > { %v2719_v37 = vpop.eup %2718 }
0x1611   : > { %v2196_v39 = vmul.f32 %v2719_v37, %v2180_v25 }
0x1612   : > { %v2721_v40 = vpop.eup %2720 }
0x1613   : > { %v2204_v41 = vmul.f32 %v2425_v38, %v2196_v39  ;;  %v2197_v42 = vmul.f32 %v2721_v40, %v2181_v27 }
0x1615   : > { %v2205_v44 = vmul.f32 %v2425_v38, %v2197_v42  ;;  %v2212_v45 = vadd.f32 %v2426_v43, %v2204_v41 }
0x1617   : > { %v2213_v46 = vadd.f32 %v2426_v43, %v2205_v44 }
0x1619   : > { %v2214_v47 = vpack.c.bf16 %v2213_v46, %v2212_v45 }
0x161b   : > { %2575 = vmatmul.mubr.msk.bf16.vlgmr.msra.gmra.mrb[32].mxu0 %vm908_vm0, %v2214_v47 }
0x16ee   : > { %v2267_v49 = vpop.f32.mrb[32].mxu0 }
0x16ef   : > { %v2268_v50 = vadd.f32 %v2427_v48, %v2267_v49  ;;  %v2576_v51 = vpop.f32.mrb[33].mxu0 }
0x16f0   : > { %v2270_v52 = vpop.f32.mrb[34].mxu0 }
0x16f1   : > { %v2430_v53 = vmul.f32 -1.442695, %v2268_v50  ;;  %v2271_v54 = vadd.f32 %v2427_v48, %v2270_v52  ;;  %v2577_v55 = vpop.f32.mrb[35].mxu0 }
0x16f3   : > { %2722 = vpow2.f32 %v2430_v53  ;;  %v2431_v56 = vmul.f32 -1.442695, %v2271_v54 }
0x16f5   : > { %2724 = vpow2.f32 %v2431_v56 }
0x16fd   : > { %v2723_v57 = vpop.eup %2722 }
0x16fe   : > { %v2280_v58 = vadd.f32 1.0, %v2723_v57 }
0x16ff   : > { %v2725_v59 = vpop.eup %2724 }
0x1700   : > { %2726 = vrcp.f32 %v2280_v58  ;;  %v2281_v60 = vadd.f32 1.0, %v2725_v59 }
0x1702   : > { %2728 = vrcp.f32 %v2281_v60 }
0x170a   : > { %v2727_v61 = vpop.eup %2726 }
0x170b   : > { %2287 = vst.msk [vmem:[%s902_s28] sm:$0xff] %vm2286_vm4, %v2727_v61 }
0x170c   : > { %v2729_v62 = vpop.eup %2728 }
0x170d   : > { %2289 = vst.msk [vmem:[%s902_s28 + $0x8] sm:$0xf] %vm2288_vm5, %v2729_v62 }
0x170e PF: > { %s69_s7 = sadd.s32 1, %s2736_s7  }
0x170f   : > { %p66_p4 = scmp.ge.s32.totalorder %s69_s7, 4  }
0x1711   :  { %68 = sbr.rel (!%p66_p4) target bundleno = 46 (0x2e), region = 195 }

// kernel: masked_ae_forward.2
= control target key start
LH: loop header
LB: loop body
LE: loop exit
PB: predicated region body
PF: predicated region fallthrough
CT: control target
= control target key end

     0   :  { %s3425_s6 = smov 1   ;;  %s3426_s10 = smov 2   ;;  %s3956_s0 = inlined_call_operand.smem [shape: u32[33], index: -1, kind: input, shape index: {}] }
   0x1   :  { %s3475_s5 = sld [smem:[%s3956_s0]]   ;;  %s3427_s14 = smov 3  }
   0x2   :  { %s3480_s9 = sld [smem:[%s3956_s0 + %s3425_s6]]   ;;  %s3428_s18 = smov 4  }
   0x3   :  { %s3485_s13 = sld [smem:[%s3956_s0 + %s3426_s10]]   ;;  %s3429_s22 = smov 5  }
   0x4   :  { %s3490_s17 = sld [smem:[%s3956_s0 + %s3427_s14]]   ;;  %s3430_s26 = smov 6  }
   0x5   :  { %s3495_s21 = sld [smem:[%s3956_s0 + %s3428_s18]]   ;;  %s3431_s30 = smov 7  }
   0x6   :  { %s3500_s25 = sld [smem:[%s3956_s0 + %s3429_s22]]   ;;  %s3432_s4 = smov 8  }
   0x7   :  { %s3505_s29 = sld [smem:[%s3956_s0 + %s3430_s26]]   ;;  %s3433_s10 = smov 9  }
   0x8   :  { %s3510_s3 = sld [smem:[%s3956_s0 + %s3431_s30]]   ;;  %s3434_s15 = smov 10  }
   0x9   :  { %s3515_s8 = sld [smem:[%s3956_s0 + %s3432_s4]]   ;;  %s3435_s20 = smov 11  }
   0xa   :  { %s3520_s14 = sld [smem:[%s3956_s0 + %s3433_s10]]   ;;  %s3436_s26 = smov 12  }
   0xb   :  { %s3525_s19 = sld [smem:[%s3956_s0 + %s3434_s15]]   ;;  %s3437_s1 = smov 13  }
   0xc   :  { %s3530_s24 = sld [smem:[%s3956_s0 + %s3435_s20]]   ;;  %s3438_s7 = smov 14  }
   0xd   :  { %s3535_s30 = sld [smem:[%s3956_s0 + %s3436_s26]]   ;;  %s3439_s15 = smov 15  }
   0xe   :  { %s3540_s6 = sld [smem:[%s3956_s0 + %s3437_s1]]   ;;  %s3440_s22 = smov 16  }
   0xf   :  { %s3545_s12 = sld [smem:[%s3956_s0 + %s3438_s7]]   ;;  %s3441_s28 = smov 17  }
  0x10   :  { %s3550_s20 = sld [smem:[%s3956_s0 + %s3439_s15]]   ;;  %s3442_s7 = smov 18  }
  0x11   :  { %s3555_s27 = sld [smem:[%s3956_s0 + %s3440_s22]]   ;;  %s3443_s15 = smov 19  }
  0x12   :  { %s3560_s4 = sld [smem:[%s3956_s0 + %s3441_s28]]   ;;  %s3444_s22 = smov 20  }
  0x13   :  { %s3445_s28 = smov 21  }
  0x14   :  { %3962 = sst [smem:[#allocation2_spill]] %s3540_s6 }
  0x15   :  { %s3565_s6 = sld [smem:[%s3956_s0 + %s3442_s7]]   ;;  %s3446_s7 = smov 22  }
  0x16   :  { %3963 = sst [smem:[#allocation3_spill]] %s3550_s20 }
  0x17   :  { %3964 = sst [smem:[#allocation4_spill]] %s3555_s27 }
  0x18   :  { %3965 = sst [smem:[#allocation5_spill]] %s3560_s4 }
  0x19   :  { %s3570_s20 = sld [smem:[%s3956_s0 + %s3443_s15]]   ;;  %s3447_s15 = smov 23  }
  0x1a   :  { %s3575_s27 = sld [smem:[%s3956_s0 + %s3444_s22]]   ;;  %s3448_s22 = smov 24  }
  0x1b   :  { %3966 = sst [smem:[#allocation6_spill]] %s3565_s6 }
  0x1c   :  { %s3580_s4 = sld [smem:[%s3956_s0 + %s3445_s28]]   ;;  %s3449_s28 = smov 25  }
  0x1d   :  { %s3585_s6 = sld [smem:[%s3956_s0 + %s3446_s7]]   ;;  %s3450_s7 = smov 26  }
  0x1f   :  { %3967 = sst [smem:[#allocation7_spill]] %s3570_s20 }
  0x20   :  { %3968 = sst [smem:[#allocation8_spill]] %s3575_s27 }
  0x21   :  { %s3590_s20 = sld [smem:[%s3956_s0 + %s3447_s15]]   ;;  %s3451_s15 = smov 27  }
  0x22   :  { %3969 = sst [smem:[#allocation9_spill]] %s3580_s4 }
  0x23   :  { %3970 = sst [smem:[#allocation10_spill]] %s3585_s6 }
  0x24   :  { %s3595_s27 = sld [smem:[%s3956_s0 + %s3448_s22]]   ;;  %s3452_s22 = smov 28  }
  0x25   :  { %s3600_s4 = sld [smem:[%s3956_s0 + %s3449_s28]]   ;;  %s3453_s28 = smov 29  }
  0x26   :  { %s3605_s6 = sld [smem:[%s3956_s0 + %s3450_s7]]   ;;  %s3454_s7 = smov 30  }
  0x27   :  { %3971 = sst [smem:[#allocation11_spill]] %s3590_s20 }
  0x28   :  { %s3610_s20 = sld [smem:[%s3956_s0 + %s3451_s15]]   ;;  %s3455_s15 = smov 31  }
  0x2a   :  { %3972 = sst [smem:[#allocation12_spill]] %s3595_s27 }
  0x2b   :  { %3973 = sst [smem:[#allocation13_spill]] %s3600_s4 }
  0x2c   :  { %3974 = sst [smem:[#allocation14_spill]] %s3605_s6 }
  0x2d   :  { %s3615_s27 = sld [smem:[%s3956_s0 + %s3452_s22]]   ;;  %s3456_s22 = smov 32  }
  0x2e   :  { %3975 = sst [smem:[#allocation15_spill]] %s3610_s20 }
  0x2f   :  { %s3620_s4 = sld [smem:[%s3956_s0 + %s3453_s28]]   ;;  %s3637_s28 = smov 0  }
  0x30   :  { %s3625_s6 = sld [smem:[%s3956_s0 + %s3454_s7]]  }
  0x31   :  { %s3630_s20 = sld [smem:[%s3956_s0 + %s3455_s15]]  }
  0x33   :  { %3976 = sst [smem:[#allocation16_spill]] %s3615_s27 }
  0x34   :  { %s3635_s27 = sld [smem:[%s3956_s0 + %s3456_s22]]  }
  0x35 LB: > { %s2957_s1 = sadd.s32 4294967295, %s3423_s28   ;;  %p2961_p0 = scmp.ge.s32.totalorder %s3423_s28, 1  ;;  %s3423_s28 = sphi %s3637_s28, %s75_s28  }
  0x36   : > { %p903_p1 = scmp.lt.s32.totalorder %s3423_s28, 3 }
  0x38   : > { %p904_p2 = pnand %p2961_p0, %p903_p1 }
  0x39   : > { %v3345_v0 = vld [vmem:[%s3485_s13] sm:$0xff] (!%p904_p2)   ;;  %v3457_v1 = vmov (!%p904_p2), 0.0   ;;  %v3346_v2 = vld [vmem:[%s3485_s13 + $0x8] sm:$0xff] (!%p904_p2)   ;;  %vm3458_vm0 = vmmov (!%p904_p2), 0   ;;  %p987_p3 = scmp.lt.s32.totalorder (!%p904_p2), %s2957_s1, 1  ;;  %v3347_v3 = vld [vmem:[%s3485_s13 + $0x10] sm:$0xff] (!%p904_p2)  }
  0x3a   : > { %907 = sbr.rel (%p904_p2) target bundleno = 6071 (0x17b7), region = 148  ;;  %3107 = vmatprep.subr.bf16.mxu0 (!%p904_p2), %v3457_v1  ;;  %3119 = vmatprep.subr.bf16.mxu1 (!%p904_p2), %v3457_v1  ;;  %vm1041_vm1 = vcmask (!%p904_p2), 523264   ;;  %v3348_v4 = vld [vmem:[%s3485_s13 + $0x18] sm:$0xff] (!%p904_p2)   ;;  %v2965_v7 = vld [vmem:[%s3490_s17] ss:$0 sm:$0xff] (!%p904_p2)  ;;  %vm1089_vm2 = vcmask (!%p904_p2), 257024  }
  0x3b   : > { %3108 = vmatpush3.bf16.msra.mxu0 (!%p904_p2), %v3345_v0  ;;  %3115 = vmatprep.mubr.msk.bf16.mxu0 (!%p904_p2), %vm3458_vm0, %v3457_v1  ;;  %v3349_v21 = vld [vmem:[%s3505_s29] sm:$0xff] (!%p904_p2)   ;;  %v3350_v22 = vld [vmem:[%s3505_s29 + $0x8] sm:$0xff] (!%p904_p2)   ;;  %vm1142_vm3 = vcmask (!%p904_p2), 261120   ;;  %s3459_s10 = smov (!%p904_p2), 104   ;;  %s3460_s11 = smov (!%p904_p2), 120   ;;  %vm1218_vm4 = vcmask (!%p904_p2), 64512  }
  0x3c   : > { %3109 = vmatprep.subr.bf16.mxu0 (!%p904_p2), %v3457_v1  ;;  %3123 = vmatprep.mubr.msk.bf16.mxu1 (!%p904_p2), %vm3458_vm0, %v3457_v1  ;;  %v2971_v27 = vld [vmem:[%s3495_s21] ss:$0 sm:$0xff] (!%p904_p2)  ;;  %s3461_s15 = smov (!%p904_p2), 112   ;;  %s3462_s16 = smov (!%p904_p2), 96   ;;  %vm1412_vm5 = vcmask (!%p904_p2), 27648   ;;  %vm1467_vm6 = vcmask (!%p904_p2), 1041408  }
  0x3d   : > { %3120 = vmatpush3.bf16.msra.mxu1 (!%p904_p2), %v3349_v21  ;;  %v2972_v29 = vld [vmem:[%s3500_s25] ss:$0 sm:$0xff] (!%p904_p2)  ;;  %s3463_s18 = smov (!%p904_p2), 64   ;;  %vm1463_vm7 = vcmask (!%p904_p2), 31744   ;;  %s3464_s22 = smov (!%p904_p2), 8   ;;  %vm1668_vm8 = vcmask (!%p904_p2), 130048  }
  0x3e   : > { %3121 = vmatprep.subr.bf16.mxu1 (!%p904_p2), %v3457_v1  ;;  %v2973_v33 = vld [vmem:[%s3510_s3] ss:$0 sm:$0xff] (!%p904_p2)  ;;  %s3465_s23 = smov (!%p904_p2), 16   ;;  %s3961_s26 = smov (!%p904_p2), 24   ;;  %vm1670_vm9 = vcmask (!%p904_p2), 195584   ;;  %vm2858_vm10 = vcmask (!%p904_p2), 125952  }
  0x3f   : > { %3110 = vmatpush3.bf16.msra.mxu0 (!%p904_p2), %v3346_v2 }
  0x40   : > { %3111 = vmatprep.subr.bf16.mxu0 (!%p904_p2), %v3457_v1 }
  0x41   : > { %s3994_s1 = smov (!%p987_p3, %s2957_s1), 1  ;;  %3122 = vmatpush3.bf16.msra.mxu1 %v3350_v22 }
  0x42   : > { %s3655_s0 = sshll.u32 %s3994_s1, 2  ;;  %3127 = vmatprep.subr.bf16.mxu1 %v3457_v1  ;;  %s3977_s1 = sld [smem:[#allocation2_spill]] }
  0x43   : > { %s990_s2 = scalar_lea.vmem %s3475_s5, %s3655_s0  ;;  %3112 = vmatpush3.bf16.msra.mxu0 %v3347_v3  ;;  %s994_s7 = scalar_lea.vmem %s3480_s9, %s3655_s0 }
  0x44   : > { %v1000_v5 = vld [vmem:[%s990_s2] sm:$0xf]  ;;  %3113 = vmatprep.subr.bf16.mxu0 %v3457_v1  ;;  %s3978_s2 = sld [smem:[#allocation3_spill]] }
  0x45   : > { %v1001_v6 = vpack.c.bf16 %v1000_v5, %v1000_v5  ;;  %v1085_v9 = vld [vmem:[%s994_s7] sm:$0xf]  ;;  %s3979_s7 = sld [smem:[#allocation6_spill]] }
  0x47   : > { %3114 = vmatpush3.bf16.msra.mxu0 %v3348_v4 }
  0x48   : > { %3133 = vmatprep.subr.bf16.mxu0 %v3457_v1 }
  0x4a   : > { %3116 = vmatmul.mubr.msk.bf16.vlgmr.msra.gmra.mrb[0].mxu0 %vm1041_vm1, %v1001_v6 }
  0x4b   : > { %3135 = vmatprep.mubr.msk.bf16.mxu0 %vm3458_vm0, %v3457_v1 }
 0x11d   : > { %v1079_v8 = vpop.f32.mrb[0].mxu0 }
 0x11e   : > { %v1080_v10 = vadd.f32 %v2965_v7, %v1079_v8  ;;  %v3117_v11 = vpop.f32.mrb[1].mxu0 }
 0x11f   : > { %v1082_v12 = vpop.f32.mrb[2].mxu0 }
 0x120   : > { %v3669_v13 = vadd.f32 %v1085_v9, %v1080_v10  ;;  %v3118_v14 = vpop.f32.mrb[3].mxu0 }
 0x122   : > { %v1090_v15 = vsel %vm1089_vm2, %v3669_v13, 0.0 }
 0x123   : > { %1091 = vadd.xlane.f32.xlu0 %v1090_v15 }
 0x1b0   : > { %v1092_v16 = vpop.xlane.xlu0 %1091 }
 0x1b1   : > { %v1094_v17 = vmul.f32 0.03125, %v1092_v16 }
 0x1b3   : > { %v1095_v18 = vsub.f32 %v3669_v13, %v1094_v17 }
 0x1b5   : > { %v1096_v19 = vmul.f32 %v1095_v18, %v1095_v18 }
 0x1b7   : > { %v1097_v20 = vsel %vm1089_vm2, %v1096_v19, 0.0 }
 0x1b8   : > { %1098 = vadd.xlane.f32.xlu0 %v1097_v20 }
 0x245   : > { %v1099_v23 = vpop.xlane.xlu0 %1098 }
 0x246   : > { %v1100_v24 = vmul.f32 0.03125, %v1099_v23 }
 0x248   : > { %v1101_v25 = vadd.f32 1e-05, %v1100_v24 }
 0x24a   : > { %3371 = vrsqrt.f32 %v1101_v25 }
 0x254   : > { %v3372_v26 = vpop.eup %3371 }
 0x255   : > { %v1103_v28 = vmul.f32 %v3372_v26, %v1095_v18 }
 0x257   : > { %v1110_v30 = vmul.f32 %v2971_v27, %v1103_v28 }
 0x259   : > { %v1117_v31 = vadd.f32 %v2972_v29, %v1110_v30 }
 0x25b   : > { %v1118_v32 = vpack.c.bf16 %v1117_v31, %v1117_v31 }
 0x25d   : > { %3124 = vmatmul.mubr.msk.bf16.vlgmr.msra.gmra.mrb[0].mxu1 %vm1142_vm3, %v1118_v32 }
 0x25e   : > { %3129 = vmatprep.mubr.msk.bf16.mxu1 %vm3458_vm0, %v3457_v1 }
 0x330   : > { %v1180_v34 = vpop.f32.mrb[0].mxu1 }
 0x331   : > { %v1181_v35 = vadd.f32 %v2973_v33, %v1180_v34  ;;  %v3125_v36 = vpop.f32.mrb[1].mxu1 }
 0x332   : > { %v1183_v37 = vpop.f32.mrb[2].mxu1 }
 0x333   : > { %1208 = vrot.lane.b32.xlu0 %v1181_v35, %s3459_s10  ;;  %1202 = vrot.lane.b32.xlu1 %v1181_v35, %s3460_s11  ;;  %v3126_v38 = vpop.f32.mrb[3].mxu1  ;;  %v1186_v39 = vmul.f32 0.35355338, %v1181_v35  ;;  %v3689_v40 = vpack.c.bf16 %v1181_v35, %v1181_v35 }
 0x335   : > { %v1197_v49 = vpack.c.bf16 %v1186_v39, %v1186_v39 }
 0x337   : > { %1205 = vrot.lane.b32.xlu1 %v1181_v35, %s3461_s15  ;;  %1194 = vrot.lane.b32.xlu0 %v1186_v39, %s3459_s10 }
 0x33b   : > { %1216 = vrot.lane.b32.xlu1 %v3689_v40, %s3462_s16 }
 0x33f   : > { %1188 = vrot.lane.b32.xlu1 %v1186_v39, %s3460_s11 }
 0x3a5   : > { %v1203_v41 = vpop.permute.xlu1 %1202  ;;  %v1209_v45 = vpop.permute.xlu0 %1208 }
 0x3a6   : > { %v3694_v42 = vpack.c.bf16 %v1203_v41, %v1203_v41  ;;  %v3702_v47 = vpack.c.bf16 %v1209_v45, %v1209_v45 }
 0x3a8   : > { %1266 = vrot.lane.b32.xlu1 %v3694_v42, %s3462_s16 }
 0x3a9   : > { %v1206_v43 = vpop.permute.xlu1 %1205  ;;  %v1195_v58 = vpop.permute.xlu0 %1194 }
 0x3aa   : > { %v3698_v44 = vpack.c.bf16 %v1206_v43, %v1206_v43  ;;  %v1200_v61 = vpack.c.bf16 %v1195_v58, %v1195_v58 }
 0x3ac   : > { %1315 = vrot.lane.b32.xlu1 %v3698_v44, %s3462_s16 }
 0x3ad   : > { %v1217_v46 = vpop.permute.xlu1 %1216 }
 0x3ae   : > { %v1223_v48 = vsel %vm1218_vm4, %v1217_v46, 0 }
 0x3af   : > { %3128 = vmatpush3.bf16.xpose.msra.mxu1 %v1223_v48 }
 0x3b0   : > { %1364 = vrot.lane.b32.xlu1 %v3702_v47, %s3462_s16  ;;  %3139 = vmatprep.subr.bf16.mxu1 %v3457_v1 }
 0x3b1   : > { %v1189_v50 = vpop.permute.xlu1 %1188 }
 0x3b2   : > { %v1198_v55 = vpack.c.bf16 %v1189_v50, %v1189_v50 }
 0x3b4   : > { %1191 = vrot.lane.b32.xlu1 %v1186_v39, %s3461_s15 }
 0x3b6   : > { %3130 = vmatmul.mubr.msk.bf16.vlgmr.msra.gmra.mrb[4].mxu1 %vm1218_vm4, %v1197_v49 }
 0x3b7   : > { %3141 = vmatprep.mubr.msk.bf16.mxu1 %vm3458_vm0, %v3457_v1 }
 0x41a   : > { %v1267_v51 = vpop.permute.xlu1 %1266 }
 0x41b   : > { %v1272_v52 = vsel %vm1218_vm4, %v1267_v51, 0 }
 0x41c   : > { %3134 = vmatpush3.bf16.xpose.msra.mxu0 %v1272_v52 }
 0x41d   : > { %3145 = vmatprep.subr.bf16.mxu0 %v3457_v1 }
 0x41e   : > { %v1316_v53 = vpop.permute.xlu1 %1315 }
 0x41f   : > { %v1321_v54 = vsel %vm1218_vm4, %v1316_v53, 0 }
 0x420   : > { %3140 = vmatpush3.bf16.xpose.msra.mxu1 %v1321_v54 }
 0x421   : > { %3151 = vmatprep.subr.bf16.mxu1 %v3457_v1 }
 0x422   : > { %v1365_v56 = vpop.permute.xlu1 %1364 }
 0x423   : > { %v1370_v57 = vsel %vm1218_vm4, %v1365_v56, 0  ;;  %3136 = vmatmul.mubr.msk.bf16.vlgmr.msra.gmra.mrb[4].mxu0 %vm1218_vm4, %v1198_v55 }
 0x424   : > { %3146 = vmatpush3.bf16.xpose.msra.mxu0 %v1370_v57  ;;  %3147 = vmatprep.mubr.msk.bf16.mxu0 %vm3458_vm0, %v3457_v1 }
 0x425   : > { %3157 = vmatprep.subr.bf16.mxu0 %v3457_v1 }
 0x426   : > { %v1192_v59 = vpop.permute.xlu1 %1191 }
 0x427   : > { %v1199_v60 = vpack.c.bf16 %v1192_v59, %v1192_v59 }
 0x429   : > { %3142 = vmatmul.mubr.msk.bf16.vlgmr.msra.gmra.mrb[8].mxu1 %vm1218_vm4, %v1199_v60 }
 0x42a   : > { %3153 = vmatprep.mubr.msk.bf16.mxu1 %vm3458_vm0, %v3457_v1 }
 0x42b   : > { %3148 = vmatmul.mubr.msk.bf16.vlgmr.msra.gmra.mrb[8].mxu0 %vm1218_vm4, %v1200_v61 }
 0x42c   : > { %3159 = vmatprep.mubr.msk.bf16.mxu0 %vm3458_vm0, %v3457_v1 }
 0x489   : > { %v1259_v62 = vpop.f32.mrb[4].mxu1 }
 0x48a   : > { %v3131_v63 = vpop.f32.mrb[5].mxu1  ;;  %v1413_v0 = vsel %vm1412_vm5, %v1259_v62, -inf }
 0x48b   : > { %1414 = vmax.xlane.f32.xlu1 %v1413_v0  ;;  %v1262_v2 = vpop.f32.mrb[6].mxu1 }
 0x48c   : > { %v3132_v3 = vpop.f32.mrb[7].mxu1 }
 0x4f6   : > { %v1308_v4 = vpop.f32.mrb[4].mxu0 }
 0x4f7   : > { %v3137_v5 = vpop.f32.mrb[5].mxu0  ;;  %v1416_v6 = vsel %vm1412_vm5, %v1308_v4, -inf }
 0x4f8   : > { %1417 = vmax.xlane.f32.xlu0 %v1416_v6  ;;  %v1311_v7 = vpop.f32.mrb[6].mxu0  ;;  %v3351_v5 = vld [vmem:[%s3515_s8] sm:$0xff]   ;;  %v3352_v6 = vld [vmem:[%s3515_s8 + $0x8] sm:$0xff]  }
 0x4f9   : > { %v3138_v8 = vpop.f32.mrb[7].mxu0 }
 0x4fc   : > { %v1357_v9 = vpop.f32.mrb[8].mxu1 }
 0x4fd   : > { %v3143_v10 = vpop.f32.mrb[9].mxu1  ;;  %v1419_v11 = vsel %vm1412_vm5, %v1357_v9, -inf }
 0x4fe   : > { %v1360_v12 = vpop.f32.mrb[10].mxu1  ;;  %1420 = vmax.xlane.f32.xlu0 %v1419_v11  ;;  %v1406_v14 = vpop.f32.mrb[8].mxu0 }
 0x4ff   : > { %v3144_v15 = vpop.f32.mrb[11].mxu1  ;;  %v3149_v16 = vpop.f32.mrb[9].mxu0  ;;  %v1422_v17 = vsel %vm1412_vm5, %v1406_v14, -inf }
 0x500   : > { %1423 = vmax.xlane.f32.xlu1 %v1422_v17  ;;  %v1409_v18 = vpop.f32.mrb[10].mxu0 }
 0x501   : > { %v3150_v19 = vpop.f32.mrb[11].mxu0 }
 0x511   : > { %1511 = vrot.lane.b32.xlu1 %v3694_v42, %s3463_s18 }
 0x514   : > { %1461 = vrot.lane.b32.xlu0 %v3689_v40, %s3463_s18 }
 0x518   : > { %v1415_v20 = vpop.xlane.xlu1 %1414 }
 0x519   : > { %v1425_v21 = vsub.f32 %v1259_v62, %v1415_v20 }
 0x51b   : > { %v1429_v22 = vmul.f32 1.442695, %v1425_v21 }
 0x51d   : > { %3373 = vpow2.f32 %v1429_v22 }
 0x527   : > { %v3374_v23 = vpop.eup %3373 }
 0x528   : > { %v1437_v24 = vsel %vm1412_vm5, %v3374_v23, 0.0 }
 0x533   : > { %1438 = vadd.xlane.f32.xlu0 %v1437_v24 }
 0x585   : > { %v1418_v25 = vpop.xlane.xlu0 %1417 }
 0x586   : > { %v1426_v26 = vsub.f32 %v1308_v4, %v1418_v25 }
 0x588   : > { %v1431_v27 = vmul.f32 1.442695, %v1426_v26 }
 0x58a   : > { %3375 = vpow2.f32 %v1431_v27  ;;  %v2985_v27 = vld [vmem:[%s3520_s14] ss:$0 sm:$0xff] }
 0x58b   : > { %v1421_v28 = vpop.xlane.xlu0 %1420 }
 0x58c   : > { %v1427_v29 = vsub.f32 %v1357_v9, %v1421_v28 }
 0x58d   : > { %v1424_v30 = vpop.xlane.xlu1 %1423 }
 0x58e   : > { %v1433_v31 = vmul.f32 1.442695, %v1427_v29  ;;  %v1428_v32 = vsub.f32 %v1406_v14, %v1424_v30 }
 0x58f   : > { %v1462_v33 = vpop.permute.xlu0 %1461 }
 0x590   : > { %3377 = vpow2.f32 %v1433_v31  ;;  %v1435_v34 = vmul.f32 1.442695, %v1428_v32  ;;  %v1469_v35 = vsel %vm1467_vm6, %v1462_v33, 0 }
 0x591   : > { %3152 = vmatpush3.bf16.msra.mxu1 %v1469_v35  ;;  %v1512_v36 = vpop.permute.xlu1 %1511 }
 0x592   : > { %3379 = vpow2.f32 %v1435_v34  ;;  %v1517_v37 = vsel %vm1467_vm6, %v1512_v36, 0  ;;  %3163 = vmatprep.subr.bf16.mxu1 %v3457_v1 }
 0x593   : > { %3158 = vmatpush3.bf16.msra.mxu0 %v1517_v37 }
 0x594   : > { %v3376_v38 = vpop.eup %3375  ;;  %3169 = vmatprep.subr.bf16.mxu0 %v3457_v1 }
 0x595   : > { %v1440_v39 = vsel %vm1412_vm5, %v3376_v38, 0.0 }
 0x596   : > { %1441 = vadd.xlane.f32.xlu1 %v1440_v39 }
 0x59a   : > { %v3378_v40 = vpop.eup %3377 }
 0x59b   : > { %v1443_v41 = vsel %vm1412_vm5, %v3378_v40, 0.0 }
 0x59c   : > { %v3380_v42 = vpop.eup %3379  ;;  %1444 = vadd.xlane.f32.xlu0 %v1443_v41  ;;  %v3354_v41 = vld [vmem:[%s3535_s30 + $0x8] sm:$0xff]  }
 0x59d   : > { %v1446_v43 = vsel %vm1412_vm5, %v3380_v42, 0.0 }
 0x59e   : > { %1447 = vadd.xlane.f32.xlu1 %v1446_v43 }
 0x5af   : > { %1559 = vrot.lane.b32.xlu1 %v3698_v44, %s3463_s18 }
 0x5b2   : > { %1607 = vrot.lane.b32.xlu0 %v3702_v47, %s3463_s18 }
 0x5c0   : > { %v1439_v45 = vpop.xlane.xlu0 %1438 }
 0x5c1   : > { %3381 = vrcp.f32 %v1439_v45 }
 0x5cb   : > { %v3382_v46 = vpop.eup %3381 }
 0x5cc   : > { %v1453_v48 = vmul.f32 %v3382_v46, %v3374_v23  ;;  %v2989_v46 = vld [vmem:[%s3525_s19] ss:$0 sm:$0xff] }
 0x5ce   : > { %v1457_v49 = vpack.c.bf16 %v1453_v48, %v1453_v48 }
 0x5d0   : > { %3154 = vmatmul.mubr.msk.bf16.vlgmr.msra.gmra.mrb[12].mxu1 %vm1463_vm7, %v1457_v49  ;;  %v2990_v49 = vld [vmem:[%s3530_s24] ss:$0 sm:$0xff] }
 0x5d1   : > { %3165 = vmatprep.mubr.msk.bf16.mxu1 %vm3458_vm0, %v3457_v1 }
 0x623   : > { %v1442_v50 = vpop.xlane.xlu1 %1441 }
 0x624   : > { %3383 = vrcp.f32 %v1442_v50 }
 0x629   : > { %v1445_v51 = vpop.xlane.xlu0 %1444 }
 0x62a   : > { %3385 = vrcp.f32 %v1445_v51 }
 0x62b   : > { %v1448_v52 = vpop.xlane.xlu1 %1447 }
 0x62c   : > { %3387 = vrcp.f32 %v1448_v52 }
 0x62d   : > { %v1608_v54 = vpop.permute.xlu0 %1607 }
 0x62e   : > { %v3384_v44 = vpop.eup %3383  ;;  %v1613_v57 = vsel %vm1467_vm6, %v1608_v54, 0  ;;  %v3358_v54 = vld [vmem:[%s3545_s12 + $0x18] sm:$0xff]  }
 0x62f   : > { %v1454_v53 = vmul.f32 %v3384_v44, %v3376_v38  ;;  %v1560_v47 = vpop.permute.xlu1 %1559  ;;  %v3355_v44 = vld [vmem:[%s3545_s12] sm:$0xff]  }
 0x630   : > { %v1565_v55 = vsel %vm1467_vm6, %v1560_v47, 0  ;;  %v3357_v47 = vld [vmem:[%s3545_s12 + $0x10] sm:$0xff]  }
 0x631   : > { %3164 = vmatpush3.bf16.msra.mxu1 %v1565_v55  ;;  %v1458_v56 = vpack.c.bf16 %v1454_v53, %v1454_v53  ;;  %v3356_v53 = vld [vmem:[%s3545_s12 + $0x8] sm:$0xff]   ;;  %v2991_v55 = vld [vmem:[%s3977_s1] ss:$0 sm:$0xff]  ;;  %s3980_s1 = sld [smem:[#allocation4_spill]] }
 0x632   : > { %3175 = vmatprep.subr.bf16.mxu1 %v3457_v1 }
 0x633   : > { %3160 = vmatmul.mubr.msk.bf16.vlgmr.msra.gmra.mrb[12].mxu0 %vm1463_vm7, %v1458_v56 }
 0x634   : > { %v3386_v58 = vpop.eup %3385  ;;  %3170 = vmatpush3.bf16.msra.mxu0 %v1613_v57  ;;  %3171 = vmatprep.mubr.msk.bf16.mxu0 %vm3458_vm0, %v3457_v1 }
 0x635   : > { %v1455_v59 = vmul.f32 %v3386_v58, %v3378_v40  ;;  %3183 = vmatprep.subr.bf16.mxu0 %v3457_v1  ;;  %v3353_v40 = vld [vmem:[%s3535_s30] sm:$0xff]  }
 0x636   : > { %v3388_v60 = vpop.eup %3387 }
 0x637   : > { %v1456_v61 = vmul.f32 %v3388_v60, %v3380_v42  ;;  %v1459_v62 = vpack.c.bf16 %v1455_v59, %v1455_v59 }
 0x639   : > { %3166 = vmatmul.mubr.msk.bf16.vlgmr.msra.gmra.mrb[16].mxu1 %vm1463_vm7, %v1459_v62  ;;  %v1460_v63 = vpack.c.bf16 %v1456_v61, %v1456_v61 }
 0x63a   : > { %3179 = vmatprep.mubr.msk.bf16.mxu1 %vm3458_vm0, %v3457_v1  ;;  %3176 = vmatpush3.bf16.msra.mxu1 %v3351_v5 }
 0x63b   : > { %3172 = vmatmul.mubr.msk.bf16.vlgmr.msra.gmra.mrb[16].mxu0 %vm1463_vm7, %v1460_v63  ;;  %3177 = vmatprep.subr.bf16.mxu1 %v3457_v1 }
 0x63c   : > { %3187 = vmatprep.mubr.msk.bf16.mxu0 %vm3458_vm0, %v3457_v1  ;;  %3184 = vmatpush3.bf16.msra.mxu0 %v3353_v40 }
 0x63d   : > { %3185 = vmatprep.subr.bf16.mxu0 %v3457_v1 }
 0x63e   : > { %3178 = vmatpush3.bf16.msra.mxu1 %v3352_v6 }
 0x63f   : > { %3191 = vmatprep.subr.bf16.mxu1 %v3457_v1 }
 0x640   : > { %3186 = vmatpush3.bf16.msra.mxu0 %v3354_v41 }
 0x641   : > { %3203 = vmatprep.subr.bf16.mxu0 %v3457_v1 }
 0x6a3   : > { %v1505_v0 = vpop.f32.mrb[12].mxu1 }
 0x6a4   : > { %v3155_v2 = vpop.f32.mrb[13].mxu1 }
 0x6a5   : > { %v1508_v3 = vpop.f32.mrb[14].mxu1 }
 0x6a6   : > { %v3156_v4 = vpop.f32.mrb[15].mxu1 }
 0x706   : > { %v1553_v7 = vpop.f32.mrb[12].mxu0 }
 0x707   : > { %1656 = vrot.lane.b32.xlu1 %v1553_v7, %s3464_s22  ;;  %v3161_v8 = vpop.f32.mrb[13].mxu0 }
 0x708   : > { %v1556_v9 = vpop.f32.mrb[14].mxu0  ;;  %v2995_v8 = vld [vmem:[%s3978_s2] ss:$0 sm:$0xff]  ;;  %s3981_s2 = sld [smem:[#allocation5_spill]] }
 0x709   : > { %v3162_v10 = vpop.f32.mrb[15].mxu0 }
 0x70c   : > { %v1601_v11 = vpop.f32.mrb[16].mxu1 }
 0x70d   : > { %1660 = vrot.lane.b32.xlu0 %v1601_v11, %s3465_s23  ;;  %v3167_v12 = vpop.f32.mrb[17].mxu1 }
 0x70e   : > { %v1604_v14 = vpop.f32.mrb[18].mxu1  ;;  %v1649_v15 = vpop.f32.mrb[16].mxu0 }
 0x70f   : > { %v3168_v16 = vpop.f32.mrb[19].mxu1  ;;  %1664 = vrot.lane.b32.xlu1 %v1649_v15, %s3961_s26  ;;  %v3173_v17 = vpop.f32.mrb[17].mxu0  ;;  %s3982_s26 = sld [smem:[#allocation7_spill]] }
 0x710   : > { %v1652_v18 = vpop.f32.mrb[18].mxu0 }
 0x711   : > { %v3174_v19 = vpop.f32.mrb[19].mxu0 }
 0x779   : > { %v1657_v20 = vpop.permute.xlu1 %1656 }
 0x77a   : > { %v1667_v21 = vsel %vm1218_vm4, %v1505_v0, %v1657_v20 }
 0x77f   : > { %v1661_v22 = vpop.permute.xlu0 %1660 }
 0x780   : > { %v1669_v23 = vsel %vm1668_vm8, %v1667_v21, %v1661_v22  ;;  %v3359_v22 = vld [vmem:[%s3979_s7] sm:$0xff]  }
 0x781   : > { %v1665_v24 = vpop.permute.xlu1 %1664 }
 0x782   : > { %v1671_v25 = vsel %vm1670_vm9, %v1669_v23, %v1665_v24  ;;  %v3360_v23 = vld [vmem:[%s3979_s7 + $0x8] sm:$0xff]  }
 0x783   : > { %v1672_v26 = vpack.c.bf16 %v1671_v25, %v1671_v25 }
 0x785   : > { %3180 = vmatmul.mubr.msk.bf16.vlgmr.msra.gmra.mrb[20].mxu1 %vm1142_vm3, %v1672_v26 }
 0x786   : > { %3199 = vmatprep.mubr.msk.bf16.mxu1 %vm3458_vm0, %v3457_v1  ;;  %3192 = vmatpush3.bf16.msra.mxu1 %v3355_v44 }
 0x787   : > { %3193 = vmatprep.subr.bf16.mxu1 %v3457_v1 }
 0x78a   : > { %3194 = vmatpush3.bf16.msra.mxu1 %v3356_v53 }
 0x78b   : > { %3195 = vmatprep.subr.bf16.mxu1 %v3457_v1 }
 0x78e   : > { %3196 = vmatpush3.bf16.msra.mxu1 %v3357_v47 }
 0x78f   : > { %3197 = vmatprep.subr.bf16.mxu1 %v3457_v1 }
 0x792   : > { %3198 = vmatpush3.bf16.msra.mxu1 %v3358_v54 }
 0x793   : > { %3217 = vmatprep.subr.bf16.mxu1 %v3457_v1 }
 0x858   : > { %v1733_v28 = vpop.f32.mrb[20].mxu1 }
 0x859   : > { %v1734_v29 = vadd.f32 %v2985_v27, %v1733_v28  ;;  %v3181_v30 = vpop.f32.mrb[21].mxu1  ;;  %v3001_v28 = vld [vmem:[%s3980_s1] ss:$0 sm:$0xff]  ;;  %s3991_s1 = sld [smem:[#allocation15_spill]] }
 0x85a   : > { %v1736_v31 = vpop.f32.mrb[22].mxu1  ;;  %v3002_v30 = vld [vmem:[%s3981_s2] ss:$0 sm:$0xff]  ;;  %s3992_s2 = sld [smem:[#allocation16_spill]] }
 0x85b   : > { %v3778_v32 = vadd.f32 %v1734_v29, %v3669_v13  ;;  %v3182_v33 = vpop.f32.mrb[23].mxu1 }
 0x85d   : > { %v1742_v34 = vsel %vm1089_vm2, %v3778_v32, 0.0 }
 0x85e   : > { %1743 = vadd.xlane.f32.xlu0 %v1742_v34  ;;  %v3003_v34 = vld [vmem:[%s3982_s26] ss:$0 sm:$0xff]  ;;  %s3990_s26 = sld [smem:[#allocation13_spill]] }
 0x8eb   : > { %v1744_v35 = vpop.xlane.xlu0 %1743 }
 0x8ec   : > { %v1745_v36 = vmul.f32 0.03125, %v1744_v35 }
 0x8ee   : > { %v1746_v37 = vsub.f32 %v3778_v32, %v1745_v36 }
 0x8f0   : > { %v1747_v38 = vmul.f32 %v1746_v37, %v1746_v37 }
 0x8f2   : > { %v1748_v39 = vsel %vm1089_vm2, %v1747_v38, 0.0 }
 0x8f3   : > { %1749 = vadd.xlane.f32.xlu1 %v1748_v39 }
 0x980   : > { %v1750_v13 = vpop.xlane.xlu1 %1749 }
 0x981   : > { %v1751_v42 = vmul.f32 0.03125, %v1750_v13 }
 0x983   : > { %v1752_v43 = vadd.f32 1e-05, %v1751_v42 }
 0x985   : > { %3389 = vrsqrt.f32 %v1752_v43 }
 0x98f   : > { %v3390_v45 = vpop.eup %3389 }
 0x990   : > { %v1754_v48 = vmul.f32 %v3390_v45, %v1746_v37 }
 0x992   : > { %v1761_v50 = vmul.f32 %v2989_v46, %v1754_v48 }
 0x994   : > { %v1768_v51 = vadd.f32 %v2990_v49, %v1761_v50 }
 0x996   : > { %v1769_v52 = vpack.c.bf16 %v1768_v51, %v1768_v51 }
 0x998   : > { %3188 = vmatmul.mubr.msk.bf16.vlgmr.msra.gmra.mrb[20].mxu0 %vm1142_vm3, %v1769_v52 }
 0x999   : > { %3207 = vmatprep.mubr.msk.bf16.mxu0 %vm3458_vm0, %v3457_v1  ;;  %3204 = vmatpush3.bf16.msra.mxu0 %v3359_v22 }
 0x99a   : > { %3205 = vmatprep.subr.bf16.mxu0 %v3457_v1 }
 0x99d   : > { %3206 = vmatpush3.bf16.msra.mxu0 %v3360_v23 }
 0x99e   : > { %3211 = vmatprep.subr.bf16.mxu0 %v3457_v1 }
 0xa6b   : > { %v1830_v56 = vpop.f32.mrb[20].mxu0 }
 0xa6c   : > { %v1831_v57 = vadd.f32 %v2991_v55, %v1830_v56  ;;  %v3189_v58 = vpop.f32.mrb[21].mxu0 }
 0xa6d   : > { %v1833_v59 = vpop.f32.mrb[22].mxu0 }
 0xa6e   : > { %v1836_v60 = vmul.f32 %v1831_v57, %v1831_v57  ;;  %v3190_v61 = vpop.f32.mrb[23].mxu0 }
 0xa70   : > { %v1837_v62 = vmul.f32 %v1836_v60, %v1831_v57 }
 0xa72   : > { %v1838_v63 = vmul.f32 0.044715, %v1837_v62 }
 0xa74   : > { %v1839_v0 = vadd.f32 %v1838_v63, %v1831_v57 }
 0xa76   : > { %v1840_v2 = vmul.f32 0.7978846, %v1839_v0 }
 0xa78   : > { %3391 = vtanh.f32 %v1840_v2 }
 0xa82   : > { %v3392_v3 = vpop.eup %3391 }
 0xa83   : > { %v1842_v4 = vadd.f32 1.0, %v3392_v3 }
 0xa85   : > { %v1843_v5 = vmul.f32 0.5, %v1842_v4 }
 0xa87   : > { %v1844_v6 = vmul.f32 %v1843_v5, %v1831_v57 }
 0xa89   : > { %v1845_v7 = vpack.c.bf16 %v1844_v6, %v1844_v6 }
 0xa8b   : > { %3200 = vmatmul.mubr.msk.bf16.vlgmr.msra.gmra.mrb[24].mxu1 %vm1041_vm1, %v1845_v7 }
 0xa8c   : > { %3219 = vmatprep.mubr.msk.bf16.mxu1 %vm3458_vm0, %v3457_v1 }
 0xb5e   : > { %v1922_v9 = vpop.f32.mrb[24].mxu1 }
 0xb5f   : > { %v1923_v10 = vadd.f32 %v2995_v8, %v1922_v9  ;;  %v3201_v11 = vpop.f32.mrb[25].mxu1 }
 0xb60   : > { %v1925_v12 = vpop.f32.mrb[26].mxu1 }
 0xb61   : > { %v3807_v14 = vadd.f32 %v1923_v10, %v3778_v32  ;;  %v3202_v15 = vpop.f32.mrb[27].mxu1 }
 0xb63   : > { %v1931_v16 = vsel %vm1089_vm2, %v3807_v14, 0.0 }
 0xb64   : > { %1932 = vadd.xlane.f32.xlu0 %v1931_v16 }
 0xbf1   : > { %v1933_v17 = vpop.xlane.xlu0 %1932 }
 0xbf2   : > { %v1934_v18 = vmul.f32 0.03125, %v1933_v17 }
 0xbf4   : > { %v1935_v19 = vsub.f32 %v3807_v14, %v1934_v18 }
 0xbf6   : > { %v1936_v20 = vmul.f32 %v1935_v19, %v1935_v19 }
 0xbf8   : > { %v1937_v21 = vsel %vm1089_vm2, %v1936_v20, 0.0 }
 0xbf9   : > { %1938 = vadd.xlane.f32.xlu0 %v1937_v21 }
 0xc86   : > { %v1939_v24 = vpop.xlane.xlu0 %1938 }
 0xc87   : > { %v1940_v25 = vmul.f32 0.03125, %v1939_v24 }
 0xc89   : > { %v1941_v26 = vadd.f32 1e-05, %v1940_v25 }
 0xc8b   : > { %3393 = vrsqrt.f32 %v1941_v26 }
 0xc95   : > { %v3394_v27 = vpop.eup %3393 }
 0xc96   : > { %v1943_v29 = vmul.f32 %v3394_v27, %v1935_v19 }
 0xc98   : > { %v1950_v31 = vmul.f32 %v3001_v28, %v1943_v29 }
 0xc9a   : > { %v1957_v32 = vadd.f32 %v3002_v30, %v1950_v31 }
 0xc9c   : > { %v1958_v33 = vpack.c.bf16 %v1957_v32, %v1957_v32 }
 0xc9e   : > { %3208 = vmatmul.mubr.msk.bf16.vlgmr.msra.gmra.mrb[24].mxu0 %vm1142_vm3, %v1958_v33 }
 0xc9f   : > { %3213 = vmatprep.mubr.msk.bf16.mxu0 %vm3458_vm0, %v3457_v1 }
 0xd71   : > { %v2019_v35 = vpop.f32.mrb[24].mxu0 }
 0xd72   : > { %v2020_v36 = vadd.f32 %v3003_v34, %v2019_v35  ;;  %v3209_v37 = vpop.f32.mrb[25].mxu0 }
 0xd73   : > { %v2022_v38 = vpop.f32.mrb[26].mxu0 }
 0xd74   : > { %2044 = vrot.lane.b32.xlu0 %v2020_v36, %s3461_s15  ;;  %2041 = vrot.lane.b32.xlu1 %v2020_v36, %s3460_s11  ;;  %v3210_v39 = vpop.f32.mrb[27].mxu0  ;;  %v3826_v40 = vpack.c.bf16 %v2020_v36, %v2020_v36  ;;  %v2025_v41 = vmul.f32 0.35355338, %v2020_v36 }
 0xd76   : > { %v2036_v51 = vpack.c.bf16 %v2025_v41, %v2025_v41 }
 0xd78   : > { %2047 = vrot.lane.b32.xlu1 %v2020_v36, %s3459_s10 }
 0xd7c   : > { %2055 = vrot.lane.b32.xlu1 %v3826_v40, %s3462_s16 }
 0xd80   : > { %2027 = vrot.lane.b32.xlu1 %v2025_v41, %s3460_s11  ;;  %s3984_s11 = sld [smem:[#allocation9_spill]] }
 0xde6   : > { %v2042_v13 = vpop.permute.xlu1 %2041  ;;  %v2045_v43 = vpop.permute.xlu0 %2044 }
 0xde7   : > { %v3831_v42 = vpack.c.bf16 %v2042_v13, %v2042_v13  ;;  %v3835_v46 = vpack.c.bf16 %v2045_v43, %v2045_v43 }
 0xde9   : > { %2104 = vrot.lane.b32.xlu0 %v3831_v42, %s3462_s16 }
 0xdea   : > { %v2048_v45 = vpop.permute.xlu1 %2047 }
 0xdeb   : > { %v3837_v48 = vpack.c.bf16 %v2048_v45, %v2048_v45 }
 0xded   : > { %2153 = vrot.lane.b32.xlu0 %v3835_v46, %s3462_s16  ;;  %2202 = vrot.lane.b32.xlu1 %v3837_v48, %s3462_s16  ;;  %s3986_s16 = sld [smem:[#allocation12_spill]] }
 0xdee   : > { %v2056_v49 = vpop.permute.xlu1 %2055 }
 0xdef   : > { %v2061_v50 = vsel %vm1218_vm4, %v2056_v49, 0 }
 0xdf0   : > { %3212 = vmatpush3.bf16.xpose.msra.mxu0 %v2061_v50 }
 0xdf1   : > { %2030 = vrot.lane.b32.xlu0 %v2025_v41, %s3461_s15  ;;  %2033 = vrot.lane.b32.xlu1 %v2025_v41, %s3459_s10  ;;  %s3983_s10 = sld [smem:[#allocation8_spill]]  ;;  %s3985_s15 = smov 24  }
 0xdf2   : > { %3223 = vmatprep.subr.bf16.mxu0 %v3457_v1  ;;  %v2028_v53 = vpop.permute.xlu1 %2027 }
 0xdf3   : > { %v2037_v56 = vpack.c.bf16 %v2028_v53, %v2028_v53 }
 0xdf7   : > { %3214 = vmatmul.mubr.msk.bf16.vlgmr.msra.gmra.mrb[28].mxu0 %vm1218_vm4, %v2036_v51 }
 0xdf8   : > { %3225 = vmatprep.mubr.msk.bf16.mxu0 %vm3458_vm0, %v3457_v1 }
 0xe5b   : > { %v2105_v52 = vpop.permute.xlu0 %2104 }
 0xe5c   : > { %v2110_v44 = vsel %vm1218_vm4, %v2105_v52, 0 }
 0xe5d   : > { %3218 = vmatpush3.bf16.xpose.msra.mxu1 %v2110_v44 }
 0xe5e   : > { %3229 = vmatprep.subr.bf16.mxu1 %v3457_v1 }
 0xe5f   : > { %v2154_v47 = vpop.permute.xlu0 %2153  ;;  %v2203_v55 = vpop.permute.xlu1 %2202 }
 0xe60   : > { %v2159_v54 = vsel %vm1218_vm4, %v2154_v47, 0  ;;  %v2208_v58 = vsel %vm1218_vm4, %v2203_v55, 0 }
 0xe61   : > { %3224 = vmatpush3.bf16.xpose.msra.mxu0 %v2159_v54 }
 0xe62   : > { %3235 = vmatprep.subr.bf16.mxu0 %v3457_v1 }
 0xe63   : > { %v2031_v57 = vpop.permute.xlu0 %2030  ;;  %v2034_v60 = vpop.permute.xlu1 %2033 }
 0xe64   : > { %3220 = vmatmul.mubr.msk.bf16.vlgmr.msra.gmra.mrb[28].mxu1 %vm1218_vm4, %v2037_v56  ;;  %v2038_v59 = vpack.c.bf16 %v2031_v57, %v2031_v57  ;;  %v2039_v61 = vpack.c.bf16 %v2034_v60, %v2034_v60 }
 0xe65   : > { %3230 = vmatpush3.bf16.xpose.msra.mxu1 %v2208_v58  ;;  %3231 = vmatprep.mubr.msk.bf16.mxu1 %vm3458_vm0, %v3457_v1 }
 0xe66   : > { %3241 = vmatprep.subr.bf16.mxu1 %v3457_v1 }
 0xe68   : > { %3226 = vmatmul.mubr.msk.bf16.vlgmr.msra.gmra.mrb[32].mxu0 %vm1218_vm4, %v2038_v59 }
 0xe69   : > { %3237 = vmatprep.mubr.msk.bf16.mxu0 %vm3458_vm0, %v3457_v1 }
 0xe6c   : > { %3232 = vmatmul.mubr.msk.bf16.vlgmr.msra.gmra.mrb[32].mxu1 %vm1218_vm4, %v2039_v61 }
 0xe6d   : > { %3243 = vmatprep.mubr.msk.bf16.mxu1 %vm3458_vm0, %v3457_v1 }
 0xeca   : > { %v2097_v62 = vpop.f32.mrb[28].mxu0 }
 0xecb   : > { %v3215_v63 = vpop.f32.mrb[29].mxu0  ;;  %v2250_v0 = vsel %vm1412_vm5, %v2097_v62, -inf }
 0xecc   : > { %2251 = vmax.xlane.f32.xlu0 %v2250_v0  ;;  %v2100_v2 = vpop.f32.mrb[30].mxu0 }
 0xecd   : > { %v3216_v3 = vpop.f32.mrb[31].mxu0 }
 0xf37   : > { %v2146_v4 = vpop.f32.mrb[28].mxu1 }
 0xf38   : > { %v3221_v5 = vpop.f32.mrb[29].mxu1  ;;  %v2253_v6 = vsel %vm1412_vm5, %v2146_v4, -inf }
 0xf39   : > { %2254 = vmax.xlane.f32.xlu1 %v2253_v6  ;;  %v2149_v7 = vpop.f32.mrb[30].mxu1  ;;  %v3361_v5 = vld [vmem:[%s3983_s10] sm:$0xff]   ;;  %v3362_v6 = vld [vmem:[%s3983_s10 + $0x8] sm:$0xff]  }
 0xf3a   : > { %v3222_v8 = vpop.f32.mrb[31].mxu1 }
 0xf3b   : > { %v2195_v9 = vpop.f32.mrb[32].mxu0 }
 0xf3c   : > { %v3227_v10 = vpop.f32.mrb[33].mxu0  ;;  %v2256_v11 = vsel %vm1412_vm5, %v2195_v9, -inf }
 0xf3d   : > { %2257 = vmax.xlane.f32.xlu0 %v2256_v11  ;;  %v2198_v12 = vpop.f32.mrb[34].mxu0 }
 0xf3e   : > { %v3228_v15 = vpop.f32.mrb[35].mxu0 }
 0xf3f   : > { %v2244_v16 = vpop.f32.mrb[32].mxu1 }
 0xf40   : > { %v3233_v17 = vpop.f32.mrb[33].mxu1  ;;  %v2259_v18 = vsel %vm1412_vm5, %v2244_v16, -inf }
 0xf41   : > { %v2247_v19 = vpop.f32.mrb[34].mxu1  ;;  %2260 = vmax.xlane.f32.xlu0 %v2259_v18 }
 0xf42   : > { %v3234_v20 = vpop.f32.mrb[35].mxu1 }
 0xf4a   : > { %2298 = vrot.lane.b32.xlu1 %v3826_v40, %s3463_s18 }
 0xf59   : > { %v2252_v21 = vpop.xlane.xlu0 %2251 }
 0xf5a   : > { %v2262_v22 = vsub.f32 %v2097_v62, %v2252_v21 }
 0xf5c   : > { %v2266_v23 = vmul.f32 1.442695, %v2262_v22 }
 0xf5e   : > { %3395 = vpow2.f32 %v2266_v23 }
 0xf68   : > { %v3396_v24 = vpop.eup %3395 }
 0xf69   : > { %v2274_v25 = vsel %vm1412_vm5, %v3396_v24, 0.0 }
 0xf6e   : > { %2275 = vadd.xlane.f32.xlu1 %v2274_v25 }
 0xfc6   : > { %v2255_v26 = vpop.xlane.xlu1 %2254 }
 0xfc7   : > { %v2263_v27 = vsub.f32 %v2146_v4, %v2255_v26 }
 0xfc9   : > { %v2268_v28 = vmul.f32 1.442695, %v2263_v27 }
 0xfca   : > { %v2299_v29 = vpop.permute.xlu1 %2298  ;;  %v2258_v30 = vpop.xlane.xlu0 %2257 }
 0xfcb   : > { %3397 = vpow2.f32 %v2268_v28  ;;  %v2304_v31 = vsel %vm1467_vm6, %v2299_v29, 0  ;;  %v2264_v32 = vsub.f32 %v2195_v9, %v2258_v30  ;;  %v3015_v28 = vld [vmem:[%s3984_s11] ss:$0 sm:$0xff]  ;;  %s998_s11 = scalar_lea.vmem %s3635_s27, %s3655_s0 }
 0xfcc   : > { %3236 = vmatpush3.bf16.msra.mxu0 %v2304_v31 }
 0xfcd   : > { %v2270_v33 = vmul.f32 1.442695, %v2264_v32  ;;  %3247 = vmatprep.subr.bf16.mxu0 %v3457_v1 }
 0xfce   : > { %v2261_v34 = vpop.xlane.xlu0 %2260 }
 0xfcf   : > { %3399 = vpow2.f32 %v2270_v33  ;;  %v2265_v35 = vsub.f32 %v2244_v16, %v2261_v34 }
 0xfd1   : > { %v2272_v36 = vmul.f32 1.442695, %v2265_v35 }
 0xfd3   : > { %3401 = vpow2.f32 %v2272_v36 }
 0xfd5   : > { %v3398_v37 = vpop.eup %3397 }
 0xfd6   : > { %v2277_v38 = vsel %vm1412_vm5, %v3398_v37, 0.0 }
 0xfd7   : > { %2278 = vadd.xlane.f32.xlu0 %v2277_v38 }
 0xfd9   : > { %v3400_v39 = vpop.eup %3399 }
 0xfda   : > { %v2280_v40 = vsel %vm1412_vm5, %v3400_v39, 0.0 }
 0xfdb   : > { %2281 = vadd.xlane.f32.xlu1 %v2280_v40 }
 0xfdd   : > { %v3402_v41 = vpop.eup %3401 }
 0xfde   : > { %v2283_v13 = vsel %vm1412_vm5, %v3402_v41, 0.0 }
 0xfdf   : > { %2284 = vadd.xlane.f32.xlu0 %v2283_v13  ;;  %v3364_v13 = vld [vmem:[%s3986_s16 + $0x8] sm:$0xff]  }
 0xfec   : > { %2394 = vrot.lane.b32.xlu1 %v3835_v46, %s3463_s18 }
 0xff0   : > { %2442 = vrot.lane.b32.xlu1 %v3837_v48, %s3463_s18 }
 0xff5   : > { %2346 = vrot.lane.b32.xlu0 %v3831_v42, %s3463_s18  ;;  %s3987_s18 = sld [smem:[#allocation10_spill]] }
 0xffb   : > { %v2276_v43 = vpop.xlane.xlu1 %2275 }
 0xffc   : > { %3403 = vrcp.f32 %v2276_v43 }
0x1006   : > { %v3404_v45 = vpop.eup %3403 }
0x1007   : > { %v2290_v49 = vmul.f32 %v3404_v45, %v3396_v24 }
0x1009   : > { %v2294_v50 = vpack.c.bf16 %v2290_v49, %v2290_v49 }
0x100b   : > { %3238 = vmatmul.mubr.msk.bf16.vlgmr.msra.gmra.mrb[36].mxu0 %vm1463_vm7, %v2294_v50  ;;  %v3019_v50 = vld [vmem:[%s3987_s18] ss:$0 sm:$0xff] }
0x100c   : > { %3249 = vmatprep.mubr.msk.bf16.mxu0 %vm3458_vm0, %v3457_v1 }
0x1064   : > { %v2279_v51 = vpop.xlane.xlu0 %2278 }
0x1065   : > { %3405 = vrcp.f32 %v2279_v51 }
0x1068   : > { %v2282_v52 = vpop.xlane.xlu1 %2281 }
0x1069   : > { %3407 = vrcp.f32 %v2282_v52 }
0x106c   : > { %v2395_v46 = vpop.permute.xlu1 %2394  ;;  %v2285_v44 = vpop.xlane.xlu0 %2284 }
0x106d   : > { %v2400_v48 = vsel %vm1467_vm6, %v2395_v46, 0  ;;  %3409 = vrcp.f32 %v2285_v44 }
0x106e   : > { %3248 = vmatpush3.bf16.msra.mxu0 %v2400_v48 }
0x106f   : > { %v3406_v42 = vpop.eup %3405  ;;  %3259 = vmatprep.subr.bf16.mxu0 %v3457_v1 }
0x1070   : > { %v2291_v53 = vmul.f32 %v3406_v42, %v3398_v37  ;;  %v2347_v47 = vpop.permute.xlu0 %2346  ;;  %v2443_v55 = vpop.permute.xlu1 %2442 }
0x1071   : > { %v2352_v54 = vsel %vm1467_vm6, %v2347_v47, 0  ;;  %v2448_v59 = vsel %vm1467_vm6, %v2443_v55, 0  ;;  %v3021_v55 = vld [vmem:[%s3990_s26] ss:$0 sm:$0xff] }
0x1072   : > { %3242 = vmatpush3.bf16.msra.mxu1 %v2352_v54  ;;  %v2295_v56 = vpack.c.bf16 %v2291_v53, %v2291_v53 }
0x1073   : > { %v3408_v57 = vpop.eup %3407  ;;  %3253 = vmatprep.subr.bf16.mxu1 %v3457_v1 }
0x1074   : > { %v2292_v58 = vmul.f32 %v3408_v57, %v3400_v39 }
0x1075   : > { %3244 = vmatmul.mubr.msk.bf16.vlgmr.msra.gmra.mrb[36].mxu1 %vm1463_vm7, %v2295_v56 }
0x1076   : > { %3254 = vmatpush3.bf16.msra.mxu1 %v2448_v59  ;;  %v2296_v60 = vpack.c.bf16 %v2292_v58, %v2292_v58  ;;  %3255 = vmatprep.mubr.msk.bf16.mxu1 %vm3458_vm0, %v3457_v1 }
0x1077   : > { %v3410_v61 = vpop.eup %3409  ;;  %3267 = vmatprep.subr.bf16.mxu1 %v3457_v1 }
0x1078   : > { %v2293_v62 = vmul.f32 %v3410_v61, %v3402_v41  ;;  %3250 = vmatmul.mubr.msk.bf16.vlgmr.msra.gmra.mrb[40].mxu0 %vm1463_vm7, %v2296_v60  ;;  %v3363_v41 = vld [vmem:[%s3986_s16] sm:$0xff]  }
0x1079   : > { %3263 = vmatprep.mubr.msk.bf16.mxu0 %vm3458_vm0, %v3457_v1  ;;  %3260 = vmatpush3.bf16.msra.mxu0 %v3361_v5 }
0x107a   : > { %v2297_v63 = vpack.c.bf16 %v2293_v62, %v2293_v62  ;;  %3261 = vmatprep.subr.bf16.mxu0 %v3457_v1 }
0x107d   : > { %3256 = vmatmul.mubr.msk.bf16.vlgmr.msra.gmra.mrb[40].mxu1 %vm1463_vm7, %v2297_v63  ;;  %3262 = vmatpush3.bf16.msra.mxu0 %v3362_v6 }
0x107e   : > { %3271 = vmatprep.mubr.msk.bf16.mxu1 %vm3458_vm0, %v3457_v1  ;;  %3275 = vmatprep.subr.bf16.mxu0 %v3457_v1 }
0x107f   : > { %3268 = vmatpush3.bf16.msra.mxu1 %v3363_v41 }
0x1080   : > { %3269 = vmatprep.subr.bf16.mxu1 %v3457_v1 }
0x1083   : > { %3270 = vmatpush3.bf16.msra.mxu1 %v3364_v13 }
0x1084   : > { %3287 = vmatprep.subr.bf16.mxu1 %v3457_v1 }
0x10de   : > { %v2340_v0 = vpop.f32.mrb[36].mxu0 }
0x10df   : > { %v3239_v2 = vpop.f32.mrb[37].mxu0 }
0x10e0   : > { %v2343_v3 = vpop.f32.mrb[38].mxu0 }
0x10e1   : > { %v3240_v4 = vpop.f32.mrb[39].mxu0 }
0x1148   : > { %v2388_v7 = vpop.f32.mrb[36].mxu1 }
0x1149   : > { %2491 = vrot.lane.b32.xlu0 %v2388_v7, %s3464_s22  ;;  %v3245_v8 = vpop.f32.mrb[37].mxu1  ;;  %s3988_s22 = sld [smem:[#allocation11_spill]] }
0x114a   : > { %v2391_v9 = vpop.f32.mrb[38].mxu1  ;;  %v3025_v8 = vld [vmem:[%s3991_s1] ss:$0 sm:$0xff] }
0x114b   : > { %v3246_v10 = vpop.f32.mrb[39].mxu1  ;;  %v2436_v11 = vpop.f32.mrb[40].mxu0 }
0x114c   : > { %2495 = vrot.lane.b32.xlu1 %v2436_v11, %s3465_s23  ;;  %v3251_v12 = vpop.f32.mrb[41].mxu0  ;;  %s3989_s23 = sld [smem:[#allocation14_spill]] }
0x114d   : > { %v2439_v15 = vpop.f32.mrb[42].mxu0 }
0x114e   : > { %v3252_v16 = vpop.f32.mrb[43].mxu0 }
0x114f   : > { %v3020_v52 = vld [vmem:[%s3988_s22] ss:$0 sm:$0xff] }
0x1150   : > { %v2484_v17 = vpop.f32.mrb[40].mxu1 }
0x1151   : > { %2499 = vrot.lane.b32.xlu0 %v2484_v17, %s3985_s15  ;;  %v3257_v18 = vpop.f32.mrb[41].mxu1 }
0x1152   : > { %v2487_v19 = vpop.f32.mrb[42].mxu1  ;;  %v3365_v42 = vld [vmem:[%s3989_s23] sm:$0xff]   ;;  %v3366_v53 = vld [vmem:[%s3989_s23 + $0x8] sm:$0xff]   ;;  %v3367_v47 = vld [vmem:[%s3989_s23 + $0x10] sm:$0xff]  }
0x1153   : > { %v3258_v20 = vpop.f32.mrb[43].mxu1  ;;  %v3368_v54 = vld [vmem:[%s3989_s23 + $0x18] sm:$0xff]  }
0x11bb   : > { %v2492_v21 = vpop.permute.xlu0 %2491 }
0x11bc   : > { %v2502_v23 = vsel %vm1218_vm4, %v2340_v0, %v2492_v21 }
0x11be   : > { %v2496_v22 = vpop.permute.xlu1 %2495 }
0x11bf   : > { %v2503_v24 = vsel %vm1668_vm8, %v2502_v23, %v2496_v22  ;;  %v3369_v23 = vld [vmem:[%s3625_s6] sm:$0xff]  }
0x11c3   : > { %v2500_v25 = vpop.permute.xlu0 %2499 }
0x11c4   : > { %v2504_v26 = vsel %vm1670_vm9, %v2503_v24, %v2500_v25  ;;  %v3370_v24 = vld [vmem:[%s3625_s6 + $0x8] sm:$0xff]  }
0x11c5   : > { %v2505_v27 = vpack.c.bf16 %v2504_v26, %v2504_v26 }
0x11c7   : > { %3264 = vmatmul.mubr.msk.bf16.vlgmr.msra.gmra.mrb[44].mxu0 %vm1142_vm3, %v2505_v27 }
0x11c8   : > { %3283 = vmatprep.mubr.msk.bf16.mxu0 %vm3458_vm0, %v3457_v1  ;;  %3276 = vmatpush3.bf16.msra.mxu0 %v3365_v42 }
0x11c9   : > { %3277 = vmatprep.subr.bf16.mxu0 %v3457_v1 }
0x11cc   : > { %3278 = vmatpush3.bf16.msra.mxu0 %v3366_v53 }
0x11cd   : > { %3279 = vmatprep.subr.bf16.mxu0 %v3457_v1 }
0x11d0   : > { %3280 = vmatpush3.bf16.msra.mxu0 %v3367_v47 }
0x11d1   : > { %3281 = vmatprep.subr.bf16.mxu0 %v3457_v1 }
0x11d4   : > { %3282 = vmatpush3.bf16.msra.mxu0 %v3368_v54 }
0x129a   : > { %v2566_v29 = vpop.f32.mrb[44].mxu0 }
0x129b   : > { %v2567_v30 = vadd.f32 %v3015_v28, %v2566_v29  ;;  %v3265_v31 = vpop.f32.mrb[45].mxu0  ;;  %v3031_v29 = vld [vmem:[%s3992_s2] ss:$0 sm:$0xff] }
0x129c   : > { %v2569_v32 = vpop.f32.mrb[46].mxu0  ;;  %v3032_v31 = vld [vmem:[%s3620_s4] ss:$0 sm:$0xff] }
0x129d   : > { %v3916_v33 = vadd.f32 %v2567_v30, %v3807_v14  ;;  %v3266_v34 = vpop.f32.mrb[47].mxu0 }
0x129f   : > { %v2575_v35 = vsel %vm1089_vm2, %v3916_v33, 0.0 }
0x12a0   : > { %2576 = vadd.xlane.f32.xlu1 %v2575_v35  ;;  %v3033_v35 = vld [vmem:[%s3630_s20] ss:$0 sm:$0xff] }
0x132d   : > { %v2577_v36 = vpop.xlane.xlu1 %2576 }
0x132e   : > { %v2578_v37 = vmul.f32 0.03125, %v2577_v36 }
0x1330   : > { %v2579_v38 = vsub.f32 %v3916_v33, %v2578_v37 }
0x1332   : > { %v2580_v39 = vmul.f32 %v2579_v38, %v2579_v38 }
0x1334   : > { %v2581_v40 = vsel %vm1089_vm2, %v2580_v39, 0.0 }
0x1335   : > { %2582 = vadd.xlane.f32.xlu0 %v2581_v40 }
0x13c2   : > { %v2583_v14 = vpop.xlane.xlu0 %2582 }
0x13c3   : > { %v2584_v43 = vmul.f32 0.03125, %v2583_v14 }
0x13c5   : > { %v2585_v45 = vadd.f32 1e-05, %v2584_v43 }
0x13c7   : > { %3411 = vrsqrt.f32 %v2585_v45 }
0x13d1   : > { %v3412_v49 = vpop.eup %3411 }
0x13d2   : > { %v2587_v51 = vmul.f32 %v3412_v49, %v2579_v38 }
0x13d4   : > { %v2594_v46 = vmul.f32 %v3019_v50, %v2587_v51 }
0x13d6   : > { %v2601_v44 = vadd.f32 %v3020_v52, %v2594_v46 }
0x13d8   : > { %v2602_v48 = vpack.c.bf16 %v2601_v44, %v2601_v44 }
0x13da   : > { %3272 = vmatmul.mubr.msk.bf16.vlgmr.msra.gmra.mrb[44].mxu1 %vm1142_vm3, %v2602_v48 }
0x13db   : > { %3291 = vmatprep.mubr.msk.bf16.mxu1 %vm3458_vm0, %v3457_v1  ;;  %3288 = vmatpush3.bf16.msra.mxu1 %v3369_v23 }
0x13dc   : > { %3289 = vmatprep.subr.bf16.mxu1 %v3457_v1 }
0x13df   : > { %3290 = vmatpush3.bf16.msra.mxu1 %v3370_v24 }
0x14ad   : > { %v2663_v56 = vpop.f32.mrb[44].mxu1 }
0x14ae   : > { %v2664_v57 = vadd.f32 %v3021_v55, %v2663_v56  ;;  %v3273_v58 = vpop.f32.mrb[45].mxu1 }
0x14af   : > { %v2666_v59 = vpop.f32.mrb[46].mxu1 }
0x14b0   : > { %v2669_v60 = vmul.f32 %v2664_v57, %v2664_v57  ;;  %v3274_v61 = vpop.f32.mrb[47].mxu1 }
0x14b2   : > { %v2670_v62 = vmul.f32 %v2669_v60, %v2664_v57 }
0x14b4   : > { %v2671_v63 = vmul.f32 0.044715, %v2670_v62 }
0x14b6   : > { %v2672_v0 = vadd.f32 %v2671_v63, %v2664_v57 }
0x14b8   : > { %v2673_v2 = vmul.f32 0.7978846, %v2672_v0 }
0x14ba   : > { %3413 = vtanh.f32 %v2673_v2 }
0x14c4   : > { %v3414_v3 = vpop.eup %3413 }
0x14c5   : > { %v2675_v4 = vadd.f32 1.0, %v3414_v3 }
0x14c7   : > { %v2676_v5 = vmul.f32 0.5, %v2675_v4 }
0x14c9   : > { %v2677_v6 = vmul.f32 %v2676_v5, %v2664_v57 }
0x14cb   : > { %v2678_v7 = vpack.c.bf16 %v2677_v6, %v2677_v6 }
0x14cd   : > { %3284 = vmatmul.mubr.msk.bf16.vlgmr.msra.gmra.mrb[48].mxu0 %vm1041_vm1, %v2678_v7 }
0x15a0   : > { %v2755_v9 = vpop.f32.mrb[48].mxu0 }
0x15a1   : > { %v2756_v10 = vadd.f32 %v3025_v8, %v2755_v9  ;;  %v3285_v11 = vpop.f32.mrb[49].mxu0 }
0x15a2   : > { %v2758_v12 = vpop.f32.mrb[50].mxu0 }
0x15a3   : > { %v3286_v15 = vpop.f32.mrb[51].mxu0  ;;  %v2761_v16 = vadd.f32 %v2756_v10, %v3916_v33 }
0x15a5   : > { %v2764_v17 = vsel %vm1089_vm2, %v2761_v16, 0.0 }
0x15a6   : > { %2765 = vadd.xlane.f32.xlu0 %v2764_v17 }
0x1633   : > { %v2766_v18 = vpop.xlane.xlu0 %2765 }
0x1634   : > { %v2767_v19 = vmul.f32 0.03125, %v2766_v18 }
0x1636   : > { %v2768_v20 = vsub.f32 %v2761_v16, %v2767_v19 }
0x1638   : > { %v2769_v21 = vmul.f32 %v2768_v20, %v2768_v20 }
0x163a   : > { %v2770_v22 = vsel %vm1089_vm2, %v2769_v21, 0.0 }
0x163b   : > { %2771 = vadd.xlane.f32.xlu1 %v2770_v22 }
0x16c8   : > { %v2772_v25 = vpop.xlane.xlu1 %2771 }
0x16c9   : > { %v2773_v26 = vmul.f32 0.03125, %v2772_v25 }
0x16cb   : > { %v2774_v27 = vadd.f32 1e-05, %v2773_v26 }
0x16cd   : > { %3415 = vrsqrt.f32 %v2774_v27 }
0x16d7   : > { %v3416_v28 = vpop.eup %3415 }
0x16d8   : > { %v2776_v30 = vmul.f32 %v3416_v28, %v2768_v20 }
0x16da   : > { %v2783_v32 = vmul.f32 %v3031_v29, %v2776_v30 }
0x16dc   : > { %v2790_v33 = vadd.f32 %v3032_v31, %v2783_v32 }
0x16de   : > { %v2791_v34 = vpack.c.bf16 %v2790_v33, %v2790_v33 }
0x16e0   : > { %3292 = vmatmul.mubr.msk.bf16.vlgmr.msra.gmra.mrb[48].mxu1 %vm1142_vm3, %v2791_v34 }
0x17b3   : > { %v2852_v36 = vpop.f32.mrb[48].mxu1 }
0x17b4   : > { %v2853_v37 = vadd.f32 %v3033_v35, %v2852_v36  ;;  %v3293_v1 = vpop.f32.mrb[49].mxu1 }
0x17b5   : > { %v2855_v38 = vpop.f32.mrb[50].mxu1 }
0x17b6   : > { %2859 = vst.msk [vmem:[%s998_s11] sm:$0xf] %vm2858_vm10, %v2853_v37  ;;  %v3294_v39 = vpop.f32.mrb[51].mxu1 }
0x17b7 PF: > { %s75_s28 = sadd.s32 1, %s3423_s28  }
0x17b8   : > { %p72_p4 = scmp.ge.s32.totalorder %s75_s28, 4  }
0x17ba   :  { %74 = sbr.rel (!%p72_p4) target bundleno = 53 (0x35), region = 213 }

</bundles_post_ra>
